<compile_context>
chip_gen: v7x
topology: tpu7x:2x2x1
jax: 0.10.0
libtpu: 0.0.40
codegen_flags: <defaults>
</compile_context>

<pallas_src>
import math
from functools import partial

import jax
import jax.numpy as jnp
from jax.experimental import pallas as pl
from jax.experimental.pallas import tpu as pltpu

NEG_INF = -100000.0
LN_EPS = 1e-5


# --------------------------------------------------------------------------
# In-kernel helpers (traced inside Pallas kernels; operands live in VMEM)
# --------------------------------------------------------------------------

def _layer_norm(x, g, b):
    mean = jnp.mean(x, axis=-1, keepdims=True)
    var = jnp.mean(jnp.square(x - mean), axis=-1, keepdims=True)
    return (x - mean) * jax.lax.rsqrt(var + LN_EPS) * g + b


def _ffn(x, w1, b1, w2, b2):
    h = jnp.maximum(jnp.dot(x, w1, preferred_element_type=jnp.float32) + b1, 0.0)
    return jnp.dot(h, w2, preferred_element_type=jnp.float32) + b2


def _mha(xq, xkv, wqkv_ref, bqkv_ref, wo_ref, bo_ref, *,
         n_heads, batch, scale, causal, pad_mask):
    """Multi-head attention on batch-major 2-D slabs.

    xq:  (batch*m, D) query-side rows (already layer-normed)
    xkv: (batch*n, D) key/value-side rows
    wqkv_ref: (3, n_heads, D, hd)   bqkv_ref: (3, n_heads, 1, hd)
    wo_ref:   (n_heads, hd, D)      bo_ref:   (1, D)
    pad_mask: None or (batch, n) float with 1.0 at positions not to attend to
    """
    nq, d = xq.shape
    nk = xkv.shape[0]
    m = nq // batch
    n = nk // batch
    hd = d // n_heads
    inv_scale = 1.0 / scale

    causal_mask = None
    if causal:
        row = jax.lax.broadcasted_iota(jnp.int32, (m, n), 0)
        col = jax.lax.broadcasted_iota(jnp.int32, (m, n), 1)
        causal_mask = (col > row)[None, :, :]                       # (1, m, n)

    out = None
    for h in range(n_heads):
        q = jnp.dot(xq, wqkv_ref[0, h], preferred_element_type=jnp.float32) + bqkv_ref[0, h]
        k = jnp.dot(xkv, wqkv_ref[1, h], preferred_element_type=jnp.float32) + bqkv_ref[1, h]
        v = jnp.dot(xkv, wqkv_ref[2, h], preferred_element_type=jnp.float32) + bqkv_ref[2, h]
        qb = (q * inv_scale).reshape(batch, m, hd)   # fold 1/sqrt(embed_dim) into Q
        kb = k.reshape(batch, n, hd)
        vb = v.reshape(batch, n, hd)

        s = jax.lax.dot_general(qb, kb, (((2,), (2,)), ((0,), (0,))),
                                preferred_element_type=jnp.float32)  # (b, m, n)
        if pad_mask is not None:
            s = jnp.where(pad_mask[:, None, :] > 0.5, NEG_INF, s)
        if causal_mask is not None:
            s = jnp.where(causal_mask, NEG_INF, s)

        s = s - jnp.max(s, axis=-1, keepdims=True)
        e = jnp.exp(s)
        w = e * pl.reciprocal(jnp.sum(e, axis=-1, keepdims=True), approx=True)

        pooled = jax.lax.dot_general(w, vb, (((2,), (1,)), ((0,), (0,))),
                                     preferred_element_type=jnp.float32)  # (b, m, hd)
        contrib = jnp.dot(pooled.reshape(nq, hd), wo_ref[h],
                          preferred_element_type=jnp.float32)             # (b*m, D)
        out = contrib if out is None else out + contrib
    return out + bo_ref[...]


# --------------------------------------------------------------------------
# Fused Pallas kernels
# --------------------------------------------------------------------------

def _encoder_layer_kernel(*refs, n_heads, batch, scale, has_mask):
    if has_mask:
        (x_ref, ln1_g, ln1_b, wqkv, bqkv, wo, bo,
         ln2_g, ln2_b, w1, b1, w2, b2, mask_ref, o_ref) = refs
        pad_mask = mask_ref[...]
    else:
        (x_ref, ln1_g, ln1_b, wqkv, bqkv, wo, bo,
         ln2_g, ln2_b, w1, b1, w2, b2, o_ref) = refs
        pad_mask = None

    x = x_ref[...]
    xn = _layer_norm(x, ln1_g[...], ln1_b[...])
    x = x + _mha(xn, xn, wqkv, bqkv, wo, bo, n_heads=n_heads, batch=batch,
                 scale=scale, causal=False, pad_mask=pad_mask)
    xn = _layer_norm(x, ln2_g[...], ln2_b[...])
    o_ref[...] = x + _ffn(xn, w1[...], b1[...], w2[...], b2[...])


def _decoder_layer_kernel(*refs, n_heads, batch, scale, has_mask):
    if has_mask:
        (x_ref, enc_ref,
         lnsa_g, lnsa_b, wqkv_sa, bqkv_sa, wo_sa, bo_sa,
         lnea_g, lnea_b, wqkv_ea, bqkv_ea, wo_ea, bo_ea,
         lnff_g, lnff_b, w1, b1, w2, b2, mask_ref, o_ref) = refs
        pad_mask = mask_ref[...]
    else:
        (x_ref, enc_ref,
         lnsa_g, lnsa_b, wqkv_sa, bqkv_sa, wo_sa, bo_sa,
         lnea_g, lnea_b, wqkv_ea, bqkv_ea, wo_ea, bo_ea,
         lnff_g, lnff_b, w1, b1, w2, b2, o_ref) = refs
        pad_mask = None

    x = x_ref[...]
    enc = enc_ref[...]

    # causal self-attention
    xn = _layer_norm(x, lnsa_g[...], lnsa_b[...])
    x = x + _mha(xn, xn, wqkv_sa, bqkv_sa, wo_sa, bo_sa, n_heads=n_heads,
                 batch=batch, scale=scale, causal=True, pad_mask=None)
    # encoder-decoder cross-attention (optional source padding mask)
    xn = _layer_norm(x, lnea_g[...], lnea_b[...])
    x = x + _mha(xn, enc, wqkv_ea, bqkv_ea, wo_ea, bo_ea, n_heads=n_heads,
                 batch=batch, scale=scale, causal=False, pad_mask=pad_mask)
    # position-wise feed-forward
    xn = _layer_norm(x, lnff_g[...], lnff_b[...])
    o_ref[...] = x + _ffn(xn, w1[...], b1[...], w2[...], b2[...])


def _layernorm_kernel(x_ref, g_ref, b_ref, o_ref):
    o_ref[...] = _layer_norm(x_ref[...], g_ref[...], b_ref[...])


def _final_head_kernel(h_ref, g_ref, b_ref, wout_ref, bout_ref, emb_ref, lb_ref, o_ref):
    # LN -> out_proj -> tied logits (h @ embed.T via dot_general) -> log_softmax, fused
    h = _layer_norm(h_ref[...], g_ref[...], b_ref[...])
    h = jnp.dot(h, wout_ref[...], preferred_element_type=jnp.float32) + bout_ref[...]
    logits = jax.lax.dot_general(h, emb_ref[...], (((1,), (1,)), ((), ())),
                                 preferred_element_type=jnp.float32) + lb_ref[...]
    mx = jnp.max(logits, axis=-1, keepdims=True)
    s = logits - mx
    lse = jnp.log(jnp.sum(jnp.exp(s), axis=-1, keepdims=True))
    o_ref[...] = s - lse


# --------------------------------------------------------------------------
# pallas_call wrappers (gridless single-block; all operands fit VMEM here)
# --------------------------------------------------------------------------

def _vmem():
    return pl.BlockSpec(memory_space=pltpu.MemorySpace.VMEM)


def _cost(in_args, out_elems, flops, transcendentals):
    return pl.CostEstimate(
        flops=int(flops),
        transcendentals=int(transcendentals),
        bytes_accessed=int(4 * (sum(int(a.size) for a in in_args) + int(out_elems))),
    )


def _mha_cost(nq, nk, batch, d, n_heads):
    hd = d // n_heads
    m, n = nq // batch, nk // batch
    flops = (2 * nq * d * d + 2 * nk * d * 2 * d        # q + kv projections
             + 4 * batch * n_heads * m * n * hd          # scores + pooling
             + 2 * nq * d * d)                           # output projection
    return flops, batch * n_heads * m * n


def encoder_layer_fwd(lp, x2d, *, n_heads, batch, scale, src_mask_bn=None):
    has_mask = src_mask_bn is not None
    args = [x2d,
            lp["ln_sa"]["g"], lp["ln_sa"]["b"],
            lp["sa"]["wqkv"], lp["sa"]["bqkv"], lp["sa"]["wo"], lp["sa"]["bo"],
            lp["ln_ff"]["g"], lp["ln_ff"]["b"],
            lp["ff1"]["w"], lp["ff1"]["b"], lp["ff2"]["w"], lp["ff2"]["b"]]
    if has_mask:
        args.append(src_mask_bn)
    nrows, d = x2d.shape
    hdim = lp["ff1"]["w"].shape[1]
    attn_flops, attn_exp = _mha_cost(nrows, nrows, batch, d, n_heads)
    cost = _cost(args, nrows * d, attn_flops + 4 * nrows * d * hdim, attn_exp)
    return pl.pallas_call(
        partial(_encoder_layer_kernel, n_heads=n_heads, batch=batch,
                scale=scale, has_mask=has_mask),
        out_shape=jax.ShapeDtypeStruct((nrows, d), jnp.float32),
        in_specs=[_vmem() for _ in args],
        out_specs=_vmem(),
        cost_estimate=cost,
    )(*args)


def decoder_layer_fwd(lp, x2d, enc2d, *, n_heads, batch, scale, src_mask_bn=None):
    has_mask = src_mask_bn is not None
    args = [x2d, enc2d,
            lp["ln_sa"]["g"], lp["ln_sa"]["b"],
            lp["sa"]["wqkv"], lp["sa"]["bqkv"], lp["sa"]["wo"], lp["sa"]["bo"],
            lp["ln_ea"]["g"], lp["ln_ea"]["b"],
            lp["ea"]["wqkv"], lp["ea"]["bqkv"], lp["ea"]["wo"], lp["ea"]["bo"],
            lp["ln_ff"]["g"], lp["ln_ff"]["b"],
            lp["ff1"]["w"], lp["ff1"]["b"], lp["ff2"]["w"], lp["ff2"]["b"]]
    if has_mask:
        args.append(src_mask_bn)
    nrows, d = x2d.shape
    nkrows = enc2d.shape[0]
    hdim = lp["ff1"]["w"].shape[1]
    sa_flops, sa_exp = _mha_cost(nrows, nrows, batch, d, n_heads)
    ea_flops, ea_exp = _mha_cost(nrows, nkrows, batch, d, n_heads)
    cost = _cost(args, nrows * d, sa_flops + ea_flops + 4 * nrows * d * hdim,
                 sa_exp + ea_exp)
    return pl.pallas_call(
        partial(_decoder_layer_kernel, n_heads=n_heads, batch=batch,
                scale=scale, has_mask=has_mask),
        out_shape=jax.ShapeDtypeStruct((nrows, d), jnp.float32),
        in_specs=[_vmem() for _ in args],
        out_specs=_vmem(),
        cost_estimate=cost,
    )(*args)


def pallas_layernorm(x2d, g, b):
    return pl.pallas_call(
        _layernorm_kernel,
        out_shape=jax.ShapeDtypeStruct(x2d.shape, jnp.float32),
        in_specs=[_vmem()] * 3,
        out_specs=_vmem(),
    )(x2d, g, b)


def final_head_fwd(h2d, ln, out_proj, embed, logits_b):
    nrows, d = h2d.shape
    vocab = embed.shape[0]
    args = [h2d, ln["g"], ln["b"], out_proj["w"], out_proj["b"], embed, logits_b]
    cost = _cost(args, nrows * vocab,
                 2 * nrows * d * d + 2 * nrows * d * vocab, nrows * vocab)
    return pl.pallas_call(
        _final_head_kernel,
        out_shape=jax.ShapeDtypeStruct((nrows, vocab), jnp.float32),
        in_specs=[_vmem() for _ in args],
        out_specs=_vmem(),
        cost_estimate=cost,
    )(*args)


# --------------------------------------------------------------------------
# Parameter setup (plain JAX; faithful to the PyTorch reference init scheme)
# --------------------------------------------------------------------------

def positional_embeddings(max_pos, dim):
    # Faithful reproduction of the reference (incl. its float floor-division behavior).
    i = jnp.arange(dim)
    dim_scale_exp = jnp.floor((2 * (i // 2)).astype(jnp.float32) / dim)
    dim_scale = jnp.power(jnp.full((dim,), 10000.0), dim_scale_exp)[None, :]
    phase = jnp.zeros((1, dim), jnp.float32).at[0, 1::2].set(math.pi / 2)
    pos = jnp.arange(max_pos, dtype=jnp.float32)[:, None]
    return jnp.sin(pos / dim_scale + phase)            # (max_pos, dim)


def _xavier(key, fan_in, fan_out, shape):
    bound = math.sqrt(6.0 / (fan_in + fan_out))
    return jax.random.uniform(key, shape, jnp.float32, -bound, bound)


def linear_params(key, in_dim, out_dim):
    # stored pre-transposed (Din, Dout) so kernels compute x @ w (no in-kernel .T)
    return {"w": _xavier(key, in_dim, out_dim, (in_dim, out_dim)),
            "b": jnp.zeros((1, out_dim), jnp.float32)}


def layernorm_params(dim):
    return {"g": jnp.ones((1, dim), jnp.float32), "b": jnp.zeros((1, dim), jnp.float32)}


def mha_params(key, embed_dim, n_heads):
    hd = embed_dim // n_heads
    kq, kk, kv, ko = jax.random.split(key, 4)
    wqkv = jnp.stack([_xavier(k, embed_dim, embed_dim, (n_heads, embed_dim, hd))
                      for k in (kq, kk, kv)], axis=0)                 # (3, h, D, hd)
    bqkv = jnp.zeros((3, n_heads, 1, hd), jnp.float32)
    wo = _xavier(ko, embed_dim, embed_dim, (n_heads, hd, embed_dim))  # (h, hd, D)
    bo = jnp.zeros((1, embed_dim), jnp.float32)
    return {"wqkv": wqkv, "bqkv": bqkv, "wo": wo, "bo": bo}


def encoder_layer_params(key, embed_dim, hidden_dim, n_heads):
    k1, k2, k3 = jax.random.split(key, 3)
    return {"ln_sa": layernorm_params(embed_dim),
            "sa": mha_params(k1, embed_dim, n_heads),
            "ln_ff": layernorm_params(embed_dim),
            "ff1": linear_params(k2, embed_dim, hidden_dim),
            "ff2": linear_params(k3, hidden_dim, embed_dim)}


def decoder_layer_params(key, embed_dim, hidden_dim, n_heads):
    k1, k2, k3, k4 = jax.random.split(key, 4)
    return {"ln_sa": layernorm_params(embed_dim),
            "sa": mha_params(k1, embed_dim, n_heads),
            "ln_ea": layernorm_params(embed_dim),
            "ea": mha_params(k2, embed_dim, n_heads),
            "ln_ff": layernorm_params(embed_dim),
            "ff1": linear_params(k3, embed_dim, hidden_dim),
            "ff2": linear_params(k4, hidden_dim, embed_dim)}


def transformer_params(key, n_layers, embed_dim, hidden_dim, n_heads, vocab_size):
    keys = jax.random.split(key, 2 * n_layers + 3)
    # nn.init.normal_(embeds.weight, std=1/sqrt(D)) in the reference overrides the
    # zeroed padding row, so no explicit zeroing of row 0 here.
    embed = jax.random.normal(keys[0], (vocab_size, embed_dim), jnp.float32) / math.sqrt(embed_dim)
    return {
        "embed": embed,                                  # tied with the logits weight
        "pos": positional_embeddings(2048, embed_dim),
        "enc_layers": [encoder_layer_params(keys[1 + l], embed_dim, hidden_dim, n_heads)
                       for l in range(n_layers)],
        "ln_enc": layernorm_params(embed_dim),
        "out_proj": linear_params(keys[1 + n_layers], embed_dim, embed_dim),
        "dec_layers": [decoder_layer_params(keys[2 + n_layers + l], embed_dim, hidden_dim, n_heads)
                       for l in range(n_layers)],
        "ln_dec": layernorm_params(embed_dim),
        "logits_b": jnp.zeros((1, vocab_size), jnp.float32),
    }


# --------------------------------------------------------------------------
# Forward pass (dropout = 0.0 -> dropouts are identity)
# --------------------------------------------------------------------------

def transformer_forward(params, src_tokens, tgt_tokens, n_heads, src_mask=None):
    embed_dim = params["embed"].shape[1]
    vocab = params["embed"].shape[0]
    scale = math.sqrt(embed_dim)

    n_src, batch = src_tokens.shape
    m_tgt = tgt_tokens.shape[0]

    # batch-major token layout so every kernel works on (batch*seq, D) slabs
    src_bt = jnp.transpose(src_tokens)                    # (b, n)
    tgt_bt = jnp.transpose(tgt_tokens)                    # (b, m)
    src_mask_bn = None
    if src_mask is not None:
        src_mask_bn = jnp.transpose(src_mask.astype(jnp.float32))   # (b, n)

    # ----- encode -----
    x = params["embed"][src_bt] * scale                   # (b, n, D)
    x = x + params["pos"][:n_src][None, :, :]
    x2 = x.reshape(batch * n_src, embed_dim)
    for lp in params["enc_layers"]:
        x2 = encoder_layer_fwd(lp, x2, n_heads=n_heads, batch=batch,
                               scale=scale, src_mask_bn=src_mask_bn)
    enc2 = pallas_layernorm(x2, params["ln_enc"]["g"], params["ln_enc"]["b"])

    # ----- decode -----
    h = params["embed"][tgt_bt] * scale                    # (b, m, D)
    h = h + params["pos"][:m_tgt][None, :, :]
    h2 = h.reshape(batch * m_tgt, embed_dim)
    for lp in params["dec_layers"]:
        h2 = decoder_layer_fwd(lp, h2, enc2, n_heads=n_heads, batch=batch,
                               scale=scale, src_mask_bn=src_mask_bn)

    # ----- output head: LN + out_proj + tied logits + log-softmax (one fused kernel) -----
    logp2 = final_head_fwd(h2, params["ln_dec"], params["out_proj"],
                           params["embed"], params["logits_b"])
    return jnp.transpose(logp2.reshape(batch, m_tgt, vocab), (1, 0, 2))   # (m, b, |V|)


# --------------------------------------------------------------------------
# Main
# --------------------------------------------------------------------------

if __name__ == "__main__":
    n_layers = 2
    embed_dim = 32
    hidden_dim = 64
    n_heads = 4
    vocab_size = 64
    src_len, tgt_len, batch = 8, 8, 2

    key = jax.random.PRNGKey(0)
    kp, ks, kt = jax.random.split(key, 3)

    params = transformer_params(kp, n_layers, embed_dim, hidden_dim, n_heads, vocab_size)
    src_tokens = jax.random.randint(ks, (src_len, batch), 1, vocab_size, dtype=jnp.int32)
    tgt_tokens = jax.random.randint(kt, (tgt_len, batch), 1, vocab_size, dtype=jnp.int32)

    fwd = jax.jit(transformer_forward, static_argnums=(3,))

    # TODO(synk): src_mask stays None for this synthetic batch (no padding tokens);
    # the padding-mask path is implemented via the optional per-kernel mask input.
    log_p = jax.block_until_ready(fwd(params, src_tokens, tgt_tokens, n_heads))

    assert log_p.shape == (tgt_len, batch, vocab_size)
    assert bool(jnp.all(jnp.isfinite(log_p)))
    # rows of log-softmax should sum to ~1 in prob space
    assert bool(jnp.allclose(jnp.sum(jnp.exp(log_p), axis=-1), 1.0, atol=1e-4))
    print("KERNEL_OK")
</pallas_src>

<mosaic_0001>
module attributes {stable_mosaic.version = 11 : i64} {
  func.func @_layernorm_kernel(%arg0: memref<16x32xf32, #tpu.memory_space<vmem>>, %arg1: memref<1x32xf32, #tpu.memory_space<vmem>>, %arg2: memref<1x32xf32, #tpu.memory_space<vmem>>, %arg3: memref<16x32xf32, #tpu.memory_space<vmem>>) attributes {dimension_semantics = [], scalar_prefetch = 0 : i64, scratch_operands = 0 : i64, tpu.core_type = #tpu.core_type<tc>} {
    %c0 = arith.constant 0 : index
    %c0_0 = arith.constant 0 : index
    %0 = vector.load %arg0[%c0, %c0_0] : memref<16x32xf32, #tpu.memory_space<vmem>>, vector<16x32xf32>
    %c0_1 = arith.constant 0 : index
    %c0_2 = arith.constant 0 : index
    %1 = vector.load %arg1[%c0_1, %c0_2] : memref<1x32xf32, #tpu.memory_space<vmem>>, vector<1x32xf32>
    %c0_3 = arith.constant 0 : index
    %c0_4 = arith.constant 0 : index
    %2 = vector.load %arg2[%c0_3, %c0_4] : memref<1x32xf32, #tpu.memory_space<vmem>>, vector<1x32xf32>
    %cst = arith.constant dense<0.000000e+00> : vector<16xf32>
    %3 = vector.multi_reduction <add>, %0, %cst [1] : vector<16x32xf32> to vector<16xf32>
    %4 = vector.shape_cast %3 : vector<16xf32> to vector<16x1xf32>
    %cst_5 = arith.constant 3.200000e+01 : f32
    %5 = vector.broadcast %cst_5 : f32 to vector<16x1xf32>
    %6 = arith.divf %4, %5 : vector<16x1xf32>
    %7 = vector.broadcast %6 : vector<16x1xf32> to vector<16x32xf32>
    %8 = arith.subf %0, %7 : vector<16x32xf32>
    %9 = arith.mulf %8, %8 : vector<16x32xf32>
    %cst_6 = arith.constant dense<0.000000e+00> : vector<16xf32>
    %10 = vector.multi_reduction <add>, %9, %cst_6 [1] : vector<16x32xf32> to vector<16xf32>
    %11 = vector.shape_cast %10 : vector<16xf32> to vector<16x1xf32>
    %cst_7 = arith.constant 3.200000e+01 : f32
    %12 = vector.broadcast %cst_7 : f32 to vector<16x1xf32>
    %13 = arith.divf %11, %12 : vector<16x1xf32>
    %14 = vector.broadcast %6 : vector<16x1xf32> to vector<16x32xf32>
    %15 = arith.subf %0, %14 : vector<16x32xf32>
    %cst_8 = arith.constant 9.99999974E-6 : f32
    %16 = vector.broadcast %cst_8 : f32 to vector<16x1xf32>
    %17 = arith.addf %13, %16 : vector<16x1xf32>
    %18 = math.rsqrt %17 : vector<16x1xf32>
    %19 = vector.broadcast %18 : vector<16x1xf32> to vector<16x32xf32>
    %20 = arith.mulf %15, %19 : vector<16x32xf32>
    %21 = vector.broadcast %1 : vector<1x32xf32> to vector<16x32xf32>
    %22 = arith.mulf %20, %21 : vector<16x32xf32>
    %23 = vector.broadcast %2 : vector<1x32xf32> to vector<16x32xf32>
    %24 = arith.addf %22, %23 : vector<16x32xf32>
    %c0_9 = arith.constant 0 : index
    %c0_10 = arith.constant 0 : index
    %25 = vector.load %arg3[%c0_9, %c0_10] : memref<16x32xf32, #tpu.memory_space<vmem>>, vector<16x32xf32>
    tpu.vector_store %arg3[%c0_9, %c0_10], %24 {strides = array<i32>} : memref<16x32xf32, #tpu.memory_space<vmem>>, vector<16x32xf32>,
    return
  }
}

module attributes {stable_mosaic.version = 11 : i64} {
  func.func @_encoder_layer_kernel(%arg0: memref<16x32xf32, #tpu.memory_space<vmem>>, %arg1: memref<1x32xf32, #tpu.memory_space<vmem>>, %arg2: memref<1x32xf32, #tpu.memory_space<vmem>>, %arg3: memref<3x4x32x8xf32, #tpu.memory_space<vmem>>, %arg4: memref<3x4x1x8xf32, #tpu.memory_space<vmem>>, %arg5: memref<4x8x32xf32, #tpu.memory_space<vmem>>, %arg6: memref<1x32xf32, #tpu.memory_space<vmem>>, %arg7: memref<1x32xf32, #tpu.memory_space<vmem>>, %arg8: memref<1x32xf32, #tpu.memory_space<vmem>>, %arg9: memref<32x64xf32, #tpu.memory_space<vmem>>, %arg10: memref<1x64xf32, #tpu.memory_space<vmem>>, %arg11: memref<64x32xf32, #tpu.memory_space<vmem>>, %arg12: memref<1x32xf32, #tpu.memory_space<vmem>>, %arg13: memref<16x32xf32, #tpu.memory_space<vmem>>) attributes {dimension_semantics = [], scalar_prefetch = 0 : i64, scratch_operands = 0 : i64, tpu.core_type = #tpu.core_type<tc>} {
    %c0 = arith.constant 0 : index
    %c0_0 = arith.constant 0 : index
    %0 = vector.load %arg0[%c0, %c0_0] : memref<16x32xf32, #tpu.memory_space<vmem>>, vector<16x32xf32>
    %c0_1 = arith.constant 0 : index
    %c0_2 = arith.constant 0 : index
    %1 = vector.load %arg1[%c0_1, %c0_2] : memref<1x32xf32, #tpu.memory_space<vmem>>, vector<1x32xf32>
    %c0_3 = arith.constant 0 : index
    %c0_4 = arith.constant 0 : index
    %2 = vector.load %arg2[%c0_3, %c0_4] : memref<1x32xf32, #tpu.memory_space<vmem>>, vector<1x32xf32>
    %cst = arith.constant dense<0.000000e+00> : vector<16xf32>
    %3 = vector.multi_reduction <add>, %0, %cst [1] : vector<16x32xf32> to vector<16xf32>
    %4 = vector.shape_cast %3 : vector<16xf32> to vector<16x1xf32>
    %cst_5 = arith.constant 3.200000e+01 : f32
    %5 = vector.broadcast %cst_5 : f32 to vector<16x1xf32>
    %6 = arith.divf %4, %5 : vector<16x1xf32>
    %7 = vector.broadcast %6 : vector<16x1xf32> to vector<16x32xf32>
    %8 = arith.subf %0, %7 : vector<16x32xf32>
    %9 = arith.mulf %8, %8 : vector<16x32xf32>
    %cst_6 = arith.constant dense<0.000000e+00> : vector<16xf32>
    %10 = vector.multi_reduction <add>, %9, %cst_6 [1] : vector<16x32xf32> to vector<16xf32>
    %11 = vector.shape_cast %10 : vector<16xf32> to vector<16x1xf32>
    %cst_7 = arith.constant 3.200000e+01 : f32
    %12 = vector.broadcast %cst_7 : f32 to vector<16x1xf32>
    %13 = arith.divf %11, %12 : vector<16x1xf32>
    %14 = vector.broadcast %6 : vector<16x1xf32> to vector<16x32xf32>
    %15 = arith.subf %0, %14 : vector<16x32xf32>
    %cst_8 = arith.constant 9.99999974E-6 : f32
    %16 = vector.broadcast %cst_8 : f32 to vector<16x1xf32>
    %17 = arith.addf %13, %16 : vector<16x1xf32>
    %18 = math.rsqrt %17 : vector<16x1xf32>
    %19 = vector.broadcast %18 : vector<16x1xf32> to vector<16x32xf32>
    %20 = arith.mulf %15, %19 : vector<16x32xf32>
    %21 = vector.broadcast %1 : vector<1x32xf32> to vector<16x32xf32>
    %22 = arith.mulf %20, %21 : vector<16x32xf32>
    %23 = vector.broadcast %2 : vector<1x32xf32> to vector<16x32xf32>
    %24 = arith.addf %22, %23 : vector<16x32xf32>
    %c0_9 = arith.constant 0 : index
    %c0_10 = arith.constant 0 : index
    %c0_11 = arith.constant 0 : index
    %c0_12 = arith.constant 0 : index
    %25 = vector.load %arg3[%c0_9, %c0_10, %c0_11, %c0_12] : memref<3x4x32x8xf32, #tpu.memory_space<vmem>>, vector<1x1x32x8xf32>
    %26 = vector.shape_cast %25 : vector<1x1x32x8xf32> to vector<32x8xf32>
    %cst_13 = arith.constant dense<0.000000e+00> : vector<16x8xf32>
    %27 = tpu.matmul %24, %26, %cst_13 {dimension_numbers = #tpu.dot_dimension_numbers<[1], [0], [0], [1], [0, 0, 1, 1], [], []>} : vector<16x32xf32>, vector<32x8xf32>, vector<16x8xf32> -> vector<16x8xf32>
    %c0_14 = arith.constant 0 : index
    %c0_15 = arith.constant 0 : index
    %c0_16 = arith.constant 0 : index
    %c0_17 = arith.constant 0 : index
    %28 = vector.load %arg4[%c0_14, %c0_15, %c0_16, %c0_17] : memref<3x4x1x8xf32, #tpu.memory_space<vmem>>, vector<1x1x1x8xf32>
    %29 = vector.shape_cast %28 : vector<1x1x1x8xf32> to vector<1x8xf32>
    %30 = vector.broadcast %29 : vector<1x8xf32> to vector<16x8xf32>
    %31 = arith.addf %27, %30 : vector<16x8xf32>
    %c1 = arith.constant 1 : index
    %c0_18 = arith.constant 0 : index
    %c0_19 = arith.constant 0 : index
    %c0_20 = arith.constant 0 : index
    %32 = vector.load %arg3[%c1, %c0_18, %c0_19, %c0_20] : memref<3x4x32x8xf32, #tpu.memory_space<vmem>>, vector<1x1x32x8xf32>
    %33 = vector.shape_cast %32 : vector<1x1x32x8xf32> to vector<32x8xf32>
    %cst_21 = arith.constant dense<0.000000e+00> : vector<16x8xf32>
    %34 = tpu.matmul %24, %33, %cst_21 {dimension_numbers = #tpu.dot_dimension_numbers<[1], [0], [0], [1], [0, 0, 1, 1], [], []>} : vector<16x32xf32>, vector<32x8xf32>, vector<16x8xf32> -> vector<16x8xf32>
    %c1_22 = arith.constant 1 : index
    %c0_23 = arith.constant 0 : index
    %c0_24 = arith.constant 0 : index
    %c0_25 = arith.constant 0 : index
    %35 = vector.load %arg4[%c1_22, %c0_23, %c0_24, %c0_25] : memref<3x4x1x8xf32, #tpu.memory_space<vmem>>, vector<1x1x1x8xf32>
    %36 = vector.shape_cast %35 : vector<1x1x1x8xf32> to vector<1x8xf32>
    %37 = vector.broadcast %36 : vector<1x8xf32> to vector<16x8xf32>
    %38 = arith.addf %34, %37 : vector<16x8xf32>
    %c2 = arith.constant 2 : index
    %c0_26 = arith.constant 0 : index
    %c0_27 = arith.constant 0 : index
    %c0_28 = arith.constant 0 : index
    %39 = vector.load %arg3[%c2, %c0_26, %c0_27, %c0_28] : memref<3x4x32x8xf32, #tpu.memory_space<vmem>>, vector<1x1x32x8xf32>
    %40 = vector.shape_cast %39 : vector<1x1x32x8xf32> to vector<32x8xf32>
    %cst_29 = arith.constant dense<0.000000e+00> : vector<16x8xf32>
    %41 = tpu.matmul %24, %40, %cst_29 {dimension_numbers = #tpu.dot_dimension_numbers<[1], [0], [0], [1], [0, 0, 1, 1], [], []>} : vector<16x32xf32>, vector<32x8xf32>, vector<16x8xf32> -> vector<16x8xf32>
    %c2_30 = arith.constant 2 : index
    %c0_31 = arith.constant 0 : index
    %c0_32 = arith.constant 0 : index
    %c0_33 = arith.constant 0 : index
    %42 = vector.load %arg4[%c2_30, %c0_31, %c0_32, %c0_33] : memref<3x4x1x8xf32, #tpu.memory_space<vmem>>, vector<1x1x1x8xf32>
    %43 = vector.shape_cast %42 : vector<1x1x1x8xf32> to vector<1x8xf32>
    %44 = vector.broadcast %43 : vector<1x8xf32> to vector<16x8xf32>
    %45 = arith.addf %41, %44 : vector<16x8xf32>
    %cst_34 = arith.constant 0.176776692 : f32
    %46 = vector.broadcast %cst_34 : f32 to vector<16x8xf32>
    %47 = arith.mulf %31, %46 : vector<16x8xf32>
    %48 = vector.shape_cast %47 : vector<16x8xf32> to vector<2x8x8xf32>
    %49 = vector.shape_cast %38 : vector<16x8xf32> to vector<2x8x8xf32>
    %50 = vector.shape_cast %45 : vector<16x8xf32> to vector<2x8x8xf32>
    %cst_35 = arith.constant dense<0.000000e+00> : vector<2x8x8xf32>
    %51 = tpu.matmul %48, %49, %cst_35 {dimension_numbers = #tpu.dot_dimension_numbers<[2], [2], [1], [1], [0, 0, 0, 1, 1, 1], [0], [0]>} : vector<2x8x8xf32>, vector<2x8x8xf32>, vector<2x8x8xf32> -> vector<2x8x8xf32>
    %cst_36 = arith.constant dense<0xFF800000> : vector<2x8xf32>
    %52 = vector.multi_reduction <maximumf>, %51, %cst_36 [2] : vector<2x8x8xf32> to vector<2x8xf32>
    %53 = vector.shape_cast %52 : vector<2x8xf32> to vector<2x8x1xf32>
    %54 = vector.broadcast %53 : vector<2x8x1xf32> to vector<2x8x8xf32>
    %55 = arith.subf %51, %54 : vector<2x8x8xf32>
    %56 = math.exp %55 : vector<2x8x8xf32>
    %cst_37 = arith.constant dense<0.000000e+00> : vector<2x8xf32>
    %57 = vector.multi_reduction <add>, %56, %cst_37 [2] : vector<2x8x8xf32> to vector<2x8xf32>
    %58 = vector.shape_cast %57 : vector<2x8xf32> to vector<2x8x1xf32>
    %59 = tpu.reciprocal %58 {approx = true} : vector<2x8x1xf32> -> vector<2x8x1xf32>
    %60 = vector.broadcast %59 : vector<2x8x1xf32> to vector<2x8x8xf32>
    %61 = arith.mulf %56, %60 : vector<2x8x8xf32>
    %cst_38 = arith.constant dense<0.000000e+00> : vector<2x8x8xf32>
    %62 = tpu.matmul %61, %50, %cst_38 {dimension_numbers = #tpu.dot_dimension_numbers<[2], [1], [1], [2], [0, 0, 0, 1, 1, 2], [0], [0]>} : vector<2x8x8xf32>, vector<2x8x8xf32>, vector<2x8x8xf32> -> vector<2x8x8xf32>
    %63 = vector.shape_cast %62 : vector<2x8x8xf32> to vector<16x8xf32>
    %c0_39 = arith.constant 0 : index
    %c0_40 = arith.constant 0 : index
    %c0_41 = arith.constant 0 : index
    %64 = vector.load %arg5[%c0_39, %c0_40, %c0_41] : memref<4x8x32xf32, #tpu.memory_space<vmem>>, vector<1x8x32xf32>
    %65 = vector.shape_cast %64 : vector<1x8x32xf32> to vector<8x32xf32>
    %cst_42 = arith.constant dense<0.000000e+00> : vector<16x32xf32>
    %66 = tpu.matmul %63, %65, %cst_42 {dimension_numbers = #tpu.dot_dimension_numbers<[1], [0], [0], [1], [0, 0, 1, 1], [], []>} : vector<16x8xf32>, vector<8x32xf32>, vector<16x32xf32> -> vector<16x32xf32>
    %c0_43 = arith.constant 0 : index
    %c1_44 = arith.constant 1 : index
    %c0_45 = arith.constant 0 : index
    %c0_46 = arith.constant 0 : index
    %67 = vector.load %arg3[%c0_43, %c1_44, %c0_45, %c0_46] : memref<3x4x32x8xf32, #tpu.memory_space<vmem>>, vector<1x1x32x8xf32>
    %68 = vector.shape_cast %67 : vector<1x1x32x8xf32> to vector<32x8xf32>
    %cst_47 = arith.constant dense<0.000000e+00> : vector<16x8xf32>
    %69 = tpu.matmul %24, %68, %cst_47 {dimension_numbers = #tpu.dot_dimension_numbers<[1], [0], [0], [1], [0, 0, 1, 1], [], []>} : vector<16x32xf32>, vector<32x8xf32>, vector<16x8xf32> -> vector<16x8xf32>
    %c0_48 = arith.constant 0 : index
    %c1_49 = arith.constant 1 : index
    %c0_50 = arith.constant 0 : index
    %c0_51 = arith.constant 0 : index
    %70 = vector.load %arg4[%c0_48, %c1_49, %c0_50, %c0_51] : memref<3x4x1x8xf32, #tpu.memory_space<vmem>>, vector<1x1x1x8xf32>
    %71 = vector.shape_cast %70 : vector<1x1x1x8xf32> to vector<1x8xf32>
    %72 = vector.broadcast %71 : vector<1x8xf32> to vector<16x8xf32>
    %73 = arith.addf %69, %72 : vector<16x8xf32>
    %c1_52 = arith.constant 1 : index
    %c1_53 = arith.constant 1 : index
    %c0_54 = arith.constant 0 : index
    %c0_55 = arith.constant 0 : index
    %74 = vector.load %arg3[%c1_52, %c1_53, %c0_54, %c0_55] : memref<3x4x32x8xf32, #tpu.memory_space<vmem>>, vector<1x1x32x8xf32>
    %75 = vector.shape_cast %74 : vector<1x1x32x8xf32> to vector<32x8xf32>
    %cst_56 = arith.constant dense<0.000000e+00> : vector<16x8xf32>
    %76 = tpu.matmul %24, %75, %cst_56 {dimension_numbers = #tpu.dot_dimension_numbers<[1], [0], [0], [1], [0, 0, 1, 1], [], []>} : vector<16x32xf32>, vector<32x8xf32>, vector<16x8xf32> -> vector<16x8xf32>
    %c1_57 = arith.constant 1 : index
    %c1_58 = arith.constant 1 : index
    %c0_59 = arith.constant 0 : index
    %c0_60 = arith.constant 0 : index
    %77 = vector.load %arg4[%c1_57, %c1_58, %c0_59, %c0_60] : memref<3x4x1x8xf32, #tpu.memory_space<vmem>>, vector<1x1x1x8xf32>
    %78 = vector.shape_cast %77 : vector<1x1x1x8xf32> to vector<1x8xf32>
    %79 = vector.broadcast %78 : vector<1x8xf32> to vector<16x8xf32>
    %80 = arith.addf %76, %79 : vector<16x8xf32>
    %c2_61 = arith.constant 2 : index
    %c1_62 = arith.constant 1 : index
    %c0_63 = arith.constant 0 : index
    %c0_64 = arith.constant 0 : index
    %81 = vector.load %arg3[%c2_61, %c1_62, %c0_63, %c0_64] : memref<3x4x32x8xf32, #tpu.memory_space<vmem>>, vector<1x1x32x8xf32>
    %82 = vector.shape_cast %81 : vector<1x1x32x8xf32> to vector<32x8xf32>
    %cst_65 = arith.constant dense<0.000000e+00> : vector<16x8xf32>
    %83 = tpu.matmul %24, %82, %cst_65 {dimension_numbers = #tpu.dot_dimension_numbers<[1], [0], [0], [1], [0, 0, 1, 1], [], []>} : vector<16x32xf32>, vector<32x8xf32>, vector<16x8xf32> -> vector<16x8xf32>
    %c2_66 = arith.constant 2 : index
    %c1_67 = arith.constant 1 : index
    %c0_68 = arith.constant 0 : index
    %c0_69 = arith.constant 0 : index
    %84 = vector.load %arg4[%c2_66, %c1_67, %c0_68, %c0_69] : memref<3x4x1x8xf32, #tpu.memory_space<vmem>>, vector<1x1x1x8xf32>
    %85 = vector.shape_cast %84 : vector<1x1x1x8xf32> to vector<1x8xf32>
    %86 = vector.broadcast %85 : vector<1x8xf32> to vector<16x8xf32>
    %87 = arith.addf %83, %86 : vector<16x8xf32>
    %cst_70 = arith.constant 0.176776692 : f32
    %88 = vector.broadcast %cst_70 : f32 to vector<16x8xf32>
    %89 = arith.mulf %73, %88 : vector<16x8xf32>
    %90 = vector.shape_cast %89 : vector<16x8xf32> to vector<2x8x8xf32>
    %91 = vector.shape_cast %80 : vector<16x8xf32> to vector<2x8x8xf32>
    %92 = vector.shape_cast %87 : vector<16x8xf32> to vector<2x8x8xf32>
    %cst_71 = arith.constant dense<0.000000e+00> : vector<2x8x8xf32>
    %93 = tpu.matmul %90, %91, %cst_71 {dimension_numbers = #tpu.dot_dimension_numbers<[2], [2], [1], [1], [0, 0, 0, 1, 1, 1], [0], [0]>} : vector<2x8x8xf32>, vector<2x8x8xf32>, vector<2x8x8xf32> -> vector<2x8x8xf32>
    %cst_72 = arith.constant dense<0xFF800000> : vector<2x8xf32>
    %94 = vector.multi_reduction <maximumf>, %93, %cst_72 [2] : vector<2x8x8xf32> to vector<2x8xf32>
    %95 = vector.shape_cast %94 : vector<2x8xf32> to vector<2x8x1xf32>
    %96 = vector.broadcast %95 : vector<2x8x1xf32> to vector<2x8x8xf32>
    %97 = arith.subf %93, %96 : vector<2x8x8xf32>
    %98 = math.exp %97 : vector<2x8x8xf32>
    %cst_73 = arith.constant dense<0.000000e+00> : vector<2x8xf32>
    %99 = vector.multi_reduction <add>, %98, %cst_73 [2] : vector<2x8x8xf32> to vector<2x8xf32>
    %100 = vector.shape_cast %99 : vector<2x8xf32> to vector<2x8x1xf32>
    %101 = tpu.reciprocal %100 {approx = true} : vector<2x8x1xf32> -> vector<2x8x1xf32>
    %102 = vector.broadcast %101 : vector<2x8x1xf32> to vector<2x8x8xf32>
    %103 = arith.mulf %98, %102 : vector<2x8x8xf32>
    %cst_74 = arith.constant dense<0.000000e+00> : vector<2x8x8xf32>
    %104 = tpu.matmul %103, %92, %cst_74 {dimension_numbers = #tpu.dot_dimension_numbers<[2], [1], [1], [2], [0, 0, 0, 1, 1, 2], [0], [0]>} : vector<2x8x8xf32>, vector<2x8x8xf32>, vector<2x8x8xf32> -> vector<2x8x8xf32>
    %105 = vector.shape_cast %104 : vector<2x8x8xf32> to vector<16x8xf32>
    %c1_75 = arith.constant 1 : index
    %c0_76 = arith.constant 0 : index
    %c0_77 = arith.constant 0 : index
    %106 = vector.load %arg5[%c1_75, %c0_76, %c0_77] : memref<4x8x32xf32, #tpu.memory_space<vmem>>, vector<1x8x32xf32>
    %107 = vector.shape_cast %106 : vector<1x8x32xf32> to vector<8x32xf32>
    %cst_78 = arith.constant dense<0.000000e+00> : vector<16x32xf32>
    %108 = tpu.matmul %105, %107, %cst_78 {dimension_numbers = #tpu.dot_dimension_numbers<[1], [0], [0], [1], [0, 0, 1, 1], [], []>} : vector<16x8xf32>, vector<8x32xf32>, vector<16x32xf32> -> vector<16x32xf32>
    %109 = arith.addf %66, %108 : vector<16x32xf32>
    %c0_79 = arith.constant 0 : index
    %c2_80 = arith.constant 2 : index
    %c0_81 = arith.constant 0 : index
    %c0_82 = arith.constant 0 : index
    %110 = vector.load %arg3[%c0_79, %c2_80, %c0_81, %c0_82] : memref<3x4x32x8xf32, #tpu.memory_space<vmem>>, vector<1x1x32x8xf32>
    %111 = vector.shape_cast %110 : vector<1x1x32x8xf32> to vector<32x8xf32>
    %cst_83 = arith.constant dense<0.000000e+00> : vector<16x8xf32>
    %112 = tpu.matmul %24, %111, %cst_83 {dimension_numbers = #tpu.dot_dimension_numbers<[1], [0], [0], [1], [0, 0, 1, 1], [], []>} : vector<16x32xf32>, vector<32x8xf32>, vector<16x8xf32> -> vector<16x8xf32>
    %c0_84 = arith.constant 0 : index
    %c2_85 = arith.constant 2 : index
    %c0_86 = arith.constant 0 : index
    %c0_87 = arith.constant 0 : index
    %113 = vector.load %arg4[%c0_84, %c2_85, %c0_86, %c0_87] : memref<3x4x1x8xf32, #tpu.memory_space<vmem>>, vector<1x1x1x8xf32>
    %114 = vector.shape_cast %113 : vector<1x1x1x8xf32> to vector<1x8xf32>
    %115 = vector.broadcast %114 : vector<1x8xf32> to vector<16x8xf32>
    %116 = arith.addf %112, %115 : vector<16x8xf32>
    %c1_88 = arith.constant 1 : index
    %c2_89 = arith.constant 2 : index
    %c0_90 = arith.constant 0 : index
    %c0_91 = arith.constant 0 : index
    %117 = vector.load %arg3[%c1_88, %c2_89, %c0_90, %c0_91] : memref<3x4x32x8xf32, #tpu.memory_space<vmem>>, vector<1x1x32x8xf32>
    %118 = vector.shape_cast %117 : vector<1x1x32x8xf32> to vector<32x8xf32>
    %cst_92 = arith.constant dense<0.000000e+00> : vector<16x8xf32>
    %119 = tpu.matmul %24, %118, %cst_92 {dimension_numbers = #tpu.dot_dimension_numbers<[1], [0], [0], [1], [0, 0, 1, 1], [], []>} : vector<16x32xf32>, vector<32x8xf32>, vector<16x8xf32> -> vector<16x8xf32>
    %c1_93 = arith.constant 1 : index
    %c2_94 = arith.constant 2 : index
    %c0_95 = arith.constant 0 : index
    %c0_96 = arith.constant 0 : index
    %120 = vector.load %arg4[%c1_93, %c2_94, %c0_95, %c0_96] : memref<3x4x1x8xf32, #tpu.memory_space<vmem>>, vector<1x1x1x8xf32>
    %121 = vector.shape_cast %120 : vector<1x1x1x8xf32> to vector<1x8xf32>
    %122 = vector.broadcast %121 : vector<1x8xf32> to vector<16x8xf32>
    %123 = arith.addf %119, %122 : vector<16x8xf32>
    %c2_97 = arith.constant 2 : index
    %c2_98 = arith.constant 2 : index
    %c0_99 = arith.constant 0 : index
    %c0_100 = arith.constant 0 : index
    %124 = vector.load %arg3[%c2_97, %c2_98, %c0_99, %c0_100] : memref<3x4x32x8xf32, #tpu.memory_space<vmem>>, vector<1x1x32x8xf32>
    %125 = vector.shape_cast %124 : vector<1x1x32x8xf32> to vector<32x8xf32>
    %cst_101 = arith.constant dense<0.000000e+00> : vector<16x8xf32>
    %126 = tpu.matmul %24, %125, %cst_101 {dimension_numbers = #tpu.dot_dimension_numbers<[1], [0], [0], [1], [0, 0, 1, 1], [], []>} : vector<16x32xf32>, vector<32x8xf32>, vector<16x8xf32> -> vector<16x8xf32>
    %c2_102 = arith.constant 2 : index
    %c2_103 = arith.constant 2 : index
    %c0_104 = arith.constant 0 : index
    %c0_105 = arith.constant 0 : index
    %127 = vector.load %arg4[%c2_102, %c2_103, %c0_104, %c0_105] : memref<3x4x1x8xf32, #tpu.memory_space<vmem>>, vector<1x1x1x8xf32>
    %128 = vector.shape_cast %127 : vector<1x1x1x8xf32> to vector<1x8xf32>
    %129 = vector.broadcast %128 : vector<1x8xf32> to vector<16x8xf32>
    %130 = arith.addf %126, %129 : vector<16x8xf32>
    %cst_106 = arith.constant 0.176776692 : f32
    %131 = vector.broadcast %cst_106 : f32 to vector<16x8xf32>
    %132 = arith.mulf %116, %131 : vector<16x8xf32>
    %133 = vector.shape_cast %132 : vector<16x8xf32> to vector<2x8x8xf32>
    %134 = vector.shape_cast %123 : vector<16x8xf32> to vector<2x8x8xf32>
    %135 = vector.shape_cast %130 : vector<16x8xf32> to vector<2x8x8xf32>
    %cst_107 = arith.constant dense<0.000000e+00> : vector<2x8x8xf32>
    %136 = tpu.matmul %133, %134, %cst_107 {dimension_numbers = #tpu.dot_dimension_numbers<[2], [2], [1], [1], [0, 0, 0, 1, 1, 1], [0], [0]>} : vector<2x8x8xf32>, vector<2x8x8xf32>, vector<2x8x8xf32> -> vector<2x8x8xf32>
    %cst_108 = arith.constant dense<0xFF800000> : vector<2x8xf32>
    %137 = vector.multi_reduction <maximumf>, %136, %cst_108 [2] : vector<2x8x8xf32> to vector<2x8xf32>
    %138 = vector.shape_cast %137 : vector<2x8xf32> to vector<2x8x1xf32>
    %139 = vector.broadcast %138 : vector<2x8x1xf32> to vector<2x8x8xf32>
    %140 = arith.subf %136, %139 : vector<2x8x8xf32>
    %141 = math.exp %140 : vector<2x8x8xf32>
    %cst_109 = arith.constant dense<0.000000e+00> : vector<2x8xf32>
    %142 = vector.multi_reduction <add>, %141, %cst_109 [2] : vector<2x8x8xf32> to vector<2x8xf32>
    %143 = vector.shape_cast %142 : vector<2x8xf32> to vector<2x8x1xf32>
    %144 = tpu.reciprocal %143 {approx = true} : vector<2x8x1xf32> -> vector<2x8x1xf32>
    %145 = vector.broadcast %144 : vector<2x8x1xf32> to vector<2x8x8xf32>
    %146 = arith.mulf %141, %145 : vector<2x8x8xf32>
    %cst_110 = arith.constant dense<0.000000e+00> : vector<2x8x8xf32>
    %147 = tpu.matmul %146, %135, %cst_110 {dimension_numbers = #tpu.dot_dimension_numbers<[2], [1], [1], [2], [0, 0, 0, 1, 1, 2], [0], [0]>} : vector<2x8x8xf32>, vector<2x8x8xf32>, vector<2x8x8xf32> -> vector<2x8x8xf32>
    %148 = vector.shape_cast %147 : vector<2x8x8xf32> to vector<16x8xf32>
    %c2_111 = arith.constant 2 : index
    %c0_112 = arith.constant 0 : index
    %c0_113 = arith.constant 0 : index
    %149 = vector.load %arg5[%c2_111, %c0_112, %c0_113] : memref<4x8x32xf32, #tpu.memory_space<vmem>>, vector<1x8x32xf32>
    %150 = vector.shape_cast %149 : vector<1x8x32xf32> to vector<8x32xf32>
    %cst_114 = arith.constant dense<0.000000e+00> : vector<16x32xf32>
    %151 = tpu.matmul %148, %150, %cst_114 {dimension_numbers = #tpu.dot_dimension_numbers<[1], [0], [0], [1], [0, 0, 1, 1], [], []>} : vector<16x8xf32>, vector<8x32xf32>, vector<16x32xf32> -> vector<16x32xf32>
    %152 = arith.addf %109, %151 : vector<16x32xf32>
    %c0_115 = arith.constant 0 : index
    %c3 = arith.constant 3 : index
    %c0_116 = arith.constant 0 : index
    %c0_117 = arith.constant 0 : index
    %153 = vector.load %arg3[%c0_115, %c3, %c0_116, %c0_117] : memref<3x4x32x8xf32, #tpu.memory_space<vmem>>, vector<1x1x32x8xf32>
    %154 = vector.shape_cast %153 : vector<1x1x32x8xf32> to vector<32x8xf32>
    %cst_118 = arith.constant dense<0.000000e+00> : vector<16x8xf32>
    %155 = tpu.matmul %24, %154, %cst_118 {dimension_numbers = #tpu.dot_dimension_numbers<[1], [0], [0], [1], [0, 0, 1, 1], [], []>} : vector<16x32xf32>, vector<32x8xf32>, vector<16x8xf32> -> vector<16x8xf32>
    %c0_119 = arith.constant 0 : index
    %c3_120 = arith.constant 3 : index
    %c0_121 = arith.constant 0 : index
    %c0_122 = arith.constant 0 : index
    %156 = vector.load %arg4[%c0_119, %c3_120, %c0_121, %c0_122] : memref<3x4x1x8xf32, #tpu.memory_space<vmem>>, vector<1x1x1x8xf32>
    %157 = vector.shape_cast %156 : vector<1x1x1x8xf32> to vector<1x8xf32>
    %158 = vector.broadcast %157 : vector<1x8xf32> to vector<16x8xf32>
    %159 = arith.addf %155, %158 : vector<16x8xf32>
    %c1_123 = arith.constant 1 : index
    %c3_124 = arith.constant 3 : index
    %c0_125 = arith.constant 0 : index
    %c0_126 = arith.constant 0 : index
    %160 = vector.load %arg3[%c1_123, %c3_124, %c0_125, %c0_126] : memref<3x4x32x8xf32, #tpu.memory_space<vmem>>, vector<1x1x32x8xf32>
    %161 = vector.shape_cast %160 : vector<1x1x32x8xf32> to vector<32x8xf32>
    %cst_127 = arith.constant dense<0.000000e+00> : vector<16x8xf32>
    %162 = tpu.matmul %24, %161, %cst_127 {dimension_numbers = #tpu.dot_dimension_numbers<[1], [0], [0], [1], [0, 0, 1, 1], [], []>} : vector<16x32xf32>, vector<32x8xf32>, vector<16x8xf32> -> vector<16x8xf32>
    %c1_128 = arith.constant 1 : index
    %c3_129 = arith.constant 3 : index
    %c0_130 = arith.constant 0 : index
    %c0_131 = arith.constant 0 : index
    %163 = vector.load %arg4[%c1_128, %c3_129, %c0_130, %c0_131] : memref<3x4x1x8xf32, #tpu.memory_space<vmem>>, vector<1x1x1x8xf32>
    %164 = vector.shape_cast %163 : vector<1x1x1x8xf32> to vector<1x8xf32>
    %165 = vector.broadcast %164 : vector<1x8xf32> to vector<16x8xf32>
    %166 = arith.addf %162, %165 : vector<16x8xf32>
    %c2_132 = arith.constant 2 : index
    %c3_133 = arith.constant 3 : index
    %c0_134 = arith.constant 0 : index
    %c0_135 = arith.constant 0 : index
    %167 = vector.load %arg3[%c2_132, %c3_133, %c0_134, %c0_135] : memref<3x4x32x8xf32, #tpu.memory_space<vmem>>, vector<1x1x32x8xf32>
    %168 = vector.shape_cast %167 : vector<1x1x32x8xf32> to vector<32x8xf32>
    %cst_136 = arith.constant dense<0.000000e+00> : vector<16x8xf32>
    %169 = tpu.matmul %24, %168, %cst_136 {dimension_numbers = #tpu.dot_dimension_numbers<[1], [0], [0], [1], [0, 0, 1, 1], [], []>} : vector<16x32xf32>, vector<32x8xf32>, vector<16x8xf32> -> vector<16x8xf32>
    %c2_137 = arith.constant 2 : index
    %c3_138 = arith.constant 3 : index
    %c0_139 = arith.constant 0 : index
    %c0_140 = arith.constant 0 : index
    %170 = vector.load %arg4[%c2_137, %c3_138, %c0_139, %c0_140] : memref<3x4x1x8xf32, #tpu.memory_space<vmem>>, vector<1x1x1x8xf32>
    %171 = vector.shape_cast %170 : vector<1x1x1x8xf32> to vector<1x8xf32>
    %172 = vector.broadcast %171 : vector<1x8xf32> to vector<16x8xf32>
    %173 = arith.addf %169, %172 : vector<16x8xf32>
    %cst_141 = arith.constant 0.176776692 : f32
    %174 = vector.broadcast %cst_141 : f32 to vector<16x8xf32>
    %175 = arith.mulf %159, %174 : vector<16x8xf32>
    %176 = vector.shape_cast %175 : vector<16x8xf32> to vector<2x8x8xf32>
    %177 = vector.shape_cast %166 : vector<16x8xf32> to vector<2x8x8xf32>
    %178 = vector.shape_cast %173 : vector<16x8xf32> to vector<2x8x8xf32>
    %cst_142 = arith.constant dense<0.000000e+00> : vector<2x8x8xf32>
    %179 = tpu.matmul %176, %177, %cst_142 {dimension_numbers = #tpu.dot_dimension_numbers<[2], [2], [1], [1], [0, 0, 0, 1, 1, 1], [0], [0]>} : vector<2x8x8xf32>, vector<2x8x8xf32>, vector<2x8x8xf32> -> vector<2x8x8xf32>
    %cst_143 = arith.constant dense<0xFF800000> : vector<2x8xf32>
    %180 = vector.multi_reduction <maximumf>, %179, %cst_143 [2] : vector<2x8x8xf32> to vector<2x8xf32>
    %181 = vector.shape_cast %180 : vector<2x8xf32> to vector<2x8x1xf32>
    %182 = vector.broadcast %181 : vector<2x8x1xf32> to vector<2x8x8xf32>
    %183 = arith.subf %179, %182 : vector<2x8x8xf32>
    %184 = math.exp %183 : vector<2x8x8xf32>
    %cst_144 = arith.constant dense<0.000000e+00> : vector<2x8xf32>
    %185 = vector.multi_reduction <add>, %184, %cst_144 [2] : vector<2x8x8xf32> to vector<2x8xf32>
    %186 = vector.shape_cast %185 : vector<2x8xf32> to vector<2x8x1xf32>
    %187 = tpu.reciprocal %186 {approx = true} : vector<2x8x1xf32> -> vector<2x8x1xf32>
    %188 = vector.broadcast %187 : vector<2x8x1xf32> to vector<2x8x8xf32>
    %189 = arith.mulf %184, %188 : vector<2x8x8xf32>
    %cst_145 = arith.constant dense<0.000000e+00> : vector<2x8x8xf32>
    %190 = tpu.matmul %189, %178, %cst_145 {dimension_numbers = #tpu.dot_dimension_numbers<[2], [1], [1], [2], [0, 0, 0, 1, 1, 2], [0], [0]>} : vector<2x8x8xf32>, vector<2x8x8xf32>, vector<2x8x8xf32> -> vector<2x8x8xf32>
    %191 = vector.shape_cast %190 : vector<2x8x8xf32> to vector<16x8xf32>
    %c3_146 = arith.constant 3 : index
    %c0_147 = arith.constant 0 : index
    %c0_148 = arith.constant 0 : index
    %192 = vector.load %arg5[%c3_146, %c0_147, %c0_148] : memref<4x8x32xf32, #tpu.memory_space<vmem>>, vector<1x8x32xf32>
    %193 = vector.shape_cast %192 : vector<1x8x32xf32> to vector<8x32xf32>
    %cst_149 = arith.constant dense<0.000000e+00> : vector<16x32xf32>
    %194 = tpu.matmul %191, %193, %cst_149 {dimension_numbers = #tpu.dot_dimension_numbers<[1], [0], [0], [1], [0, 0, 1, 1], [], []>} : vector<16x8xf32>, vector<8x32xf32>, vector<16x32xf32> -> vector<16x32xf32>
    %195 = arith.addf %152, %194 : vector<16x32xf32>
    %c0_150 = arith.constant 0 : index
    %c0_151 = arith.constant 0 : index
    %196 = vector.load %arg6[%c0_150, %c0_151] : memref<1x32xf32, #tpu.memory_space<vmem>>, vector<1x32xf32>
    %197 = vector.broadcast %196 : vector<1x32xf32> to vector<16x32xf32>
    %198 = arith.addf %195, %197 : vector<16x32xf32>
    %199 = arith.addf %0, %198 : vector<16x32xf32>
    %c0_152 = arith.constant 0 : index
    %c0_153 = arith.constant 0 : index
    %200 = vector.load %arg7[%c0_152, %c0_153] : memref<1x32xf32, #tpu.memory_space<vmem>>, vector<1x32xf32>
    %c0_154 = arith.constant 0 : index
    %c0_155 = arith.constant 0 : index
    %201 = vector.load %arg8[%c0_154, %c0_155] : memref<1x32xf32, #tpu.memory_space<vmem>>, vector<1x32xf32>
    %cst_156 = arith.constant dense<0.000000e+00> : vector<16xf32>
    %202 = vector.multi_reduction <add>, %199, %cst_156 [1] : vector<16x32xf32> to vector<16xf32>
    %203 = vector.shape_cast %202 : vector<16xf32> to vector<16x1xf32>
    %cst_157 = arith.constant 3.200000e+01 : f32
    %204 = vector.broadcast %cst_157 : f32 to vector<16x1xf32>
    %205 = arith.divf %203, %204 : vector<16x1xf32>
    %206 = vector.broadcast %205 : vector<16x1xf32> to vector<16x32xf32>
    %207 = arith.subf %199, %206 : vector<16x32xf32>
    %208 = arith.mulf %207, %207 : vector<16x32xf32>
    %cst_158 = arith.constant dense<0.000000e+00> : vector<16xf32>
    %209 = vector.multi_reduction <add>, %208, %cst_158 [1] : vector<16x32xf32> to vector<16xf32>
    %210 = vector.shape_cast %209 : vector<16xf32> to vector<16x1xf32>
    %cst_159 = arith.constant 3.200000e+01 : f32
    %211 = vector.broadcast %cst_159 : f32 to vector<16x1xf32>
    %212 = arith.divf %210, %211 : vector<16x1xf32>
    %213 = vector.broadcast %205 : vector<16x1xf32> to vector<16x32xf32>
    %214 = arith.subf %199, %213 : vector<16x32xf32>
    %cst_160 = arith.constant 9.99999974E-6 : f32
    %215 = vector.broadcast %cst_160 : f32 to vector<16x1xf32>
    %216 = arith.addf %212, %215 : vector<16x1xf32>
    %217 = math.rsqrt %216 : vector<16x1xf32>
    %218 = vector.broadcast %217 : vector<16x1xf32> to vector<16x32xf32>
    %219 = arith.mulf %214, %218 : vector<16x32xf32>
    %220 = vector.broadcast %200 : vector<1x32xf32> to vector<16x32xf32>
    %221 = arith.mulf %219, %220 : vector<16x32xf32>
    %222 = vector.broadcast %201 : vector<1x32xf32> to vector<16x32xf32>
    %223 = arith.addf %221, %222 : vector<16x32xf32>
    %c0_161 = arith.constant 0 : index
    %c0_162 = arith.constant 0 : index
    %224 = vector.load %arg9[%c0_161, %c0_162] : memref<32x64xf32, #tpu.memory_space<vmem>>, vector<32x64xf32>
    %c0_163 = arith.constant 0 : index
    %c0_164 = arith.constant 0 : index
    %225 = vector.load %arg10[%c0_163, %c0_164] : memref<1x64xf32, #tpu.memory_space<vmem>>, vector<1x64xf32>
    %c0_165 = arith.constant 0 : index
    %c0_166 = arith.constant 0 : index
    %226 = vector.load %arg11[%c0_165, %c0_166] : memref<64x32xf32, #tpu.memory_space<vmem>>, vector<64x32xf32>
    %c0_167 = arith.constant 0 : index
    %c0_168 = arith.constant 0 : index
    %227 = vector.load %arg12[%c0_167, %c0_168] : memref<1x32xf32, #tpu.memory_space<vmem>>, vector<1x32xf32>
    %cst_169 = arith.constant dense<0.000000e+00> : vector<16x64xf32>
    %228 = tpu.matmul %223, %224, %cst_169 {dimension_numbers = #tpu.dot_dimension_numbers<[1], [0], [0], [1], [0, 0, 1, 1], [], []>} : vector<16x32xf32>, vector<32x64xf32>, vector<16x64xf32> -> vector<16x64xf32>
    %229 = vector.broadcast %225 : vector<1x64xf32> to vector<16x64xf32>
    %230 = arith.addf %228, %229 : vector<16x64xf32>
    %cst_170 = arith.constant 0.000000e+00 : f32
    %231 = vector.broadcast %cst_170 : f32 to vector<16x64xf32>
    %232 = arith.maximumf %230, %231 : vector<16x64xf32>
    %cst_171 = arith.constant dense<0.000000e+00> : vector<16x32xf32>
    %233 = tpu.matmul %232, %226, %cst_171 {dimension_numbers = #tpu.dot_dimension_numbers<[1], [0], [0], [1], [0, 0, 1, 1], [], []>} : vector<16x64xf32>, vector<64x32xf32>, vector<16x32xf32> -> vector<16x32xf32>
    %234 = vector.broadcast %227 : vector<1x32xf32> to vector<16x32xf32>
    %235 = arith.addf %233, %234 : vector<16x32xf32>
    %236 = arith.addf %199, %235 : vector<16x32xf32>
    %c0_172 = arith.constant 0 : index
    %c0_173 = arith.constant 0 : index
    %237 = vector.load %arg13[%c0_172, %c0_173] : memref<16x32xf32, #tpu.memory_space<vmem>>, vector<16x32xf32>
    tpu.vector_store %arg13[%c0_172, %c0_173], %236 {strides = array<i32>} : memref<16x32xf32, #tpu.memory_space<vmem>>, vector<16x32xf32>,
    return
  }
}

module attributes {stable_mosaic.version = 11 : i64} {
  func.func @_final_head_kernel(%arg0: memref<16x32xf32, #tpu.memory_space<vmem>>, %arg1: memref<1x32xf32, #tpu.memory_space<vmem>>, %arg2: memref<1x32xf32, #tpu.memory_space<vmem>>, %arg3: memref<32x32xf32, #tpu.memory_space<vmem>>, %arg4: memref<1x32xf32, #tpu.memory_space<vmem>>, %arg5: memref<64x32xf32, #tpu.memory_space<vmem>>, %arg6: memref<1x64xf32, #tpu.memory_space<vmem>>, %arg7: memref<16x64xf32, #tpu.memory_space<vmem>>) attributes {dimension_semantics = [], scalar_prefetch = 0 : i64, scratch_operands = 0 : i64, tpu.core_type = #tpu.core_type<tc>} {
    %c0 = arith.constant 0 : index
    %c0_0 = arith.constant 0 : index
    %0 = vector.load %arg0[%c0, %c0_0] : memref<16x32xf32, #tpu.memory_space<vmem>>, vector<16x32xf32>
    %c0_1 = arith.constant 0 : index
    %c0_2 = arith.constant 0 : index
    %1 = vector.load %arg1[%c0_1, %c0_2] : memref<1x32xf32, #tpu.memory_space<vmem>>, vector<1x32xf32>
    %c0_3 = arith.constant 0 : index
    %c0_4 = arith.constant 0 : index
    %2 = vector.load %arg2[%c0_3, %c0_4] : memref<1x32xf32, #tpu.memory_space<vmem>>, vector<1x32xf32>
    %cst = arith.constant dense<0.000000e+00> : vector<16xf32>
    %3 = vector.multi_reduction <add>, %0, %cst [1] : vector<16x32xf32> to vector<16xf32>
    %4 = vector.shape_cast %3 : vector<16xf32> to vector<16x1xf32>
    %cst_5 = arith.constant 3.200000e+01 : f32
    %5 = vector.broadcast %cst_5 : f32 to vector<16x1xf32>
    %6 = arith.divf %4, %5 : vector<16x1xf32>
    %7 = vector.broadcast %6 : vector<16x1xf32> to vector<16x32xf32>
    %8 = arith.subf %0, %7 : vector<16x32xf32>
    %9 = arith.mulf %8, %8 : vector<16x32xf32>
    %cst_6 = arith.constant dense<0.000000e+00> : vector<16xf32>
    %10 = vector.multi_reduction <add>, %9, %cst_6 [1] : vector<16x32xf32> to vector<16xf32>
    %11 = vector.shape_cast %10 : vector<16xf32> to vector<16x1xf32>
    %cst_7 = arith.constant 3.200000e+01 : f32
    %12 = vector.broadcast %cst_7 : f32 to vector<16x1xf32>
    %13 = arith.divf %11, %12 : vector<16x1xf32>
    %14 = vector.broadcast %6 : vector<16x1xf32> to vector<16x32xf32>
    %15 = arith.subf %0, %14 : vector<16x32xf32>
    %cst_8 = arith.constant 9.99999974E-6 : f32
    %16 = vector.broadcast %cst_8 : f32 to vector<16x1xf32>
    %17 = arith.addf %13, %16 : vector<16x1xf32>
    %18 = math.rsqrt %17 : vector<16x1xf32>
    %19 = vector.broadcast %18 : vector<16x1xf32> to vector<16x32xf32>
    %20 = arith.mulf %15, %19 : vector<16x32xf32>
    %21 = vector.broadcast %1 : vector<1x32xf32> to vector<16x32xf32>
    %22 = arith.mulf %20, %21 : vector<16x32xf32>
    %23 = vector.broadcast %2 : vector<1x32xf32> to vector<16x32xf32>
    %24 = arith.addf %22, %23 : vector<16x32xf32>
    %c0_9 = arith.constant 0 : index
    %c0_10 = arith.constant 0 : index
    %25 = vector.load %arg3[%c0_9, %c0_10] : memref<32x32xf32, #tpu.memory_space<vmem>>, vector<32x32xf32>
    %cst_11 = arith.constant dense<0.000000e+00> : vector<16x32xf32>
    %26 = tpu.matmul %24, %25, %cst_11 {dimension_numbers = #tpu.dot_dimension_numbers<[1], [0], [0], [1], [0, 0, 1, 1], [], []>} : vector<16x32xf32>, vector<32x32xf32>, vector<16x32xf32> -> vector<16x32xf32>
    %c0_12 = arith.constant 0 : index
    %c0_13 = arith.constant 0 : index
    %27 = vector.load %arg4[%c0_12, %c0_13] : memref<1x32xf32, #tpu.memory_space<vmem>>, vector<1x32xf32>
    %28 = vector.broadcast %27 : vector<1x32xf32> to vector<16x32xf32>
    %29 = arith.addf %26, %28 : vector<16x32xf32>
    %c0_14 = arith.constant 0 : index
    %c0_15 = arith.constant 0 : index
    %30 = vector.load %arg5[%c0_14, %c0_15] : memref<64x32xf32, #tpu.memory_space<vmem>>, vector<64x32xf32>
    %cst_16 = arith.constant dense<0.000000e+00> : vector<16x64xf32>
    %31 = tpu.matmul %29, %30, %cst_16 {dimension_numbers = #tpu.dot_dimension_numbers<[1], [1], [0], [0], [0, 0, 1, 0], [], []>} : vector<16x32xf32>, vector<64x32xf32>, vector<16x64xf32> -> vector<16x64xf32>
    %c0_17 = arith.constant 0 : index
    %c0_18 = arith.constant 0 : index
    %32 = vector.load %arg6[%c0_17, %c0_18] : memref<1x64xf32, #tpu.memory_space<vmem>>, vector<1x64xf32>
    %33 = vector.broadcast %32 : vector<1x64xf32> to vector<16x64xf32>
    %34 = arith.addf %31, %33 : vector<16x64xf32>
    %cst_19 = arith.constant dense<0xFF800000> : vector<16xf32>
    %35 = vector.multi_reduction <maximumf>, %34, %cst_19 [1] : vector<16x64xf32> to vector<16xf32>
    %36 = vector.shape_cast %35 : vector<16xf32> to vector<16x1xf32>
    %37 = vector.broadcast %36 : vector<16x1xf32> to vector<16x64xf32>
    %38 = arith.subf %34, %37 : vector<16x64xf32>
    %39 = math.exp %38 : vector<16x64xf32>
    %cst_20 = arith.constant dense<0.000000e+00> : vector<16xf32>
    %40 = vector.multi_reduction <add>, %39, %cst_20 [1] : vector<16x64xf32> to vector<16xf32>
    %41 = vector.shape_cast %40 : vector<16xf32> to vector<16x1xf32>
    %42 = math.log %41 : vector<16x1xf32>
    %43 = vector.broadcast %42 : vector<16x1xf32> to vector<16x64xf32>
    %44 = arith.subf %38, %43 : vector<16x64xf32>
    %c0_21 = arith.constant 0 : index
    %c0_22 = arith.constant 0 : index
    %45 = vector.load %arg7[%c0_21, %c0_22] : memref<16x64xf32, #tpu.memory_space<vmem>>, vector<16x64xf32>
    tpu.vector_store %arg7[%c0_21, %c0_22], %44 {strides = array<i32>} : memref<16x64xf32, #tpu.memory_space<vmem>>, vector<16x64xf32>,
    return
  }
}

module attributes {stable_mosaic.version = 11 : i64} {
  func.func @_decoder_layer_kernel(%arg0: memref<16x32xf32, #tpu.memory_space<vmem>>, %arg1: memref<16x32xf32, #tpu.memory_space<vmem>>, %arg2: memref<1x32xf32, #tpu.memory_space<vmem>>, %arg3: memref<1x32xf32, #tpu.memory_space<vmem>>, %arg4: memref<3x4x32x8xf32, #tpu.memory_space<vmem>>, %arg5: memref<3x4x1x8xf32, #tpu.memory_space<vmem>>, %arg6: memref<4x8x32xf32, #tpu.memory_space<vmem>>, %arg7: memref<1x32xf32, #tpu.memory_space<vmem>>, %arg8: memref<1x32xf32, #tpu.memory_space<vmem>>, %arg9: memref<1x32xf32, #tpu.memory_space<vmem>>, %arg10: memref<3x4x32x8xf32, #tpu.memory_space<vmem>>, %arg11: memref<3x4x1x8xf32, #tpu.memory_space<vmem>>, %arg12: memref<4x8x32xf32, #tpu.memory_space<vmem>>, %arg13: memref<1x32xf32, #tpu.memory_space<vmem>>, %arg14: memref<1x32xf32, #tpu.memory_space<vmem>>, %arg15: memref<1x32xf32, #tpu.memory_space<vmem>>, %arg16: memref<32x64xf32, #tpu.memory_space<vmem>>, %arg17: memref<1x64xf32, #tpu.memory_space<vmem>>, %arg18: memref<64x32xf32, #tpu.memory_space<vmem>>, %arg19: memref<1x32xf32, #tpu.memory_space<vmem>>, %arg20: memref<16x32xf32, #tpu.memory_space<vmem>>) attributes {dimension_semantics = [], scalar_prefetch = 0 : i64, scratch_operands = 0 : i64, tpu.core_type = #tpu.core_type<tc>} {
    %c0 = arith.constant 0 : index
    %c0_0 = arith.constant 0 : index
    %0 = vector.load %arg0[%c0, %c0_0] : memref<16x32xf32, #tpu.memory_space<vmem>>, vector<16x32xf32>
    %c0_1 = arith.constant 0 : index
    %c0_2 = arith.constant 0 : index
    %1 = vector.load %arg1[%c0_1, %c0_2] : memref<16x32xf32, #tpu.memory_space<vmem>>, vector<16x32xf32>
    %c0_3 = arith.constant 0 : index
    %c0_4 = arith.constant 0 : index
    %2 = vector.load %arg2[%c0_3, %c0_4] : memref<1x32xf32, #tpu.memory_space<vmem>>, vector<1x32xf32>
    %c0_5 = arith.constant 0 : index
    %c0_6 = arith.constant 0 : index
    %3 = vector.load %arg3[%c0_5, %c0_6] : memref<1x32xf32, #tpu.memory_space<vmem>>, vector<1x32xf32>
    %cst = arith.constant dense<0.000000e+00> : vector<16xf32>
    %4 = vector.multi_reduction <add>, %0, %cst [1] : vector<16x32xf32> to vector<16xf32>
    %5 = vector.shape_cast %4 : vector<16xf32> to vector<16x1xf32>
    %cst_7 = arith.constant 3.200000e+01 : f32
    %6 = vector.broadcast %cst_7 : f32 to vector<16x1xf32>
    %7 = arith.divf %5, %6 : vector<16x1xf32>
    %8 = vector.broadcast %7 : vector<16x1xf32> to vector<16x32xf32>
    %9 = arith.subf %0, %8 : vector<16x32xf32>
    %10 = arith.mulf %9, %9 : vector<16x32xf32>
    %cst_8 = arith.constant dense<0.000000e+00> : vector<16xf32>
    %11 = vector.multi_reduction <add>, %10, %cst_8 [1] : vector<16x32xf32> to vector<16xf32>
    %12 = vector.shape_cast %11 : vector<16xf32> to vector<16x1xf32>
    %cst_9 = arith.constant 3.200000e+01 : f32
    %13 = vector.broadcast %cst_9 : f32 to vector<16x1xf32>
    %14 = arith.divf %12, %13 : vector<16x1xf32>
    %15 = vector.broadcast %7 : vector<16x1xf32> to vector<16x32xf32>
    %16 = arith.subf %0, %15 : vector<16x32xf32>
    %cst_10 = arith.constant 9.99999974E-6 : f32
    %17 = vector.broadcast %cst_10 : f32 to vector<16x1xf32>
    %18 = arith.addf %14, %17 : vector<16x1xf32>
    %19 = math.rsqrt %18 : vector<16x1xf32>
    %20 = vector.broadcast %19 : vector<16x1xf32> to vector<16x32xf32>
    %21 = arith.mulf %16, %20 : vector<16x32xf32>
    %22 = vector.broadcast %2 : vector<1x32xf32> to vector<16x32xf32>
    %23 = arith.mulf %21, %22 : vector<16x32xf32>
    %24 = vector.broadcast %3 : vector<1x32xf32> to vector<16x32xf32>
    %25 = arith.addf %23, %24 : vector<16x32xf32>
    %26 = tpu.iota {dimensions = array<i32: 0>} : vector<8x8xi32>
    %27 = tpu.iota {dimensions = array<i32: 1>} : vector<8x8xi32>
    %28 = arith.cmpi sgt, %27, %26 : vector<8x8xi32>
    %29 = vector.shape_cast %28 : vector<8x8xi1> to vector<1x8x8xi1>
    %c0_11 = arith.constant 0 : index
    %c0_12 = arith.constant 0 : index
    %c0_13 = arith.constant 0 : index
    %c0_14 = arith.constant 0 : index
    %30 = vector.load %arg4[%c0_11, %c0_12, %c0_13, %c0_14] : memref<3x4x32x8xf32, #tpu.memory_space<vmem>>, vector<1x1x32x8xf32>
    %31 = vector.shape_cast %30 : vector<1x1x32x8xf32> to vector<32x8xf32>
    %cst_15 = arith.constant dense<0.000000e+00> : vector<16x8xf32>
    %32 = tpu.matmul %25, %31, %cst_15 {dimension_numbers = #tpu.dot_dimension_numbers<[1], [0], [0], [1], [0, 0, 1, 1], [], []>} : vector<16x32xf32>, vector<32x8xf32>, vector<16x8xf32> -> vector<16x8xf32>
    %c0_16 = arith.constant 0 : index
    %c0_17 = arith.constant 0 : index
    %c0_18 = arith.constant 0 : index
    %c0_19 = arith.constant 0 : index
    %33 = vector.load %arg5[%c0_16, %c0_17, %c0_18, %c0_19] : memref<3x4x1x8xf32, #tpu.memory_space<vmem>>, vector<1x1x1x8xf32>
    %34 = vector.shape_cast %33 : vector<1x1x1x8xf32> to vector<1x8xf32>
    %35 = vector.broadcast %34 : vector<1x8xf32> to vector<16x8xf32>
    %36 = arith.addf %32, %35 : vector<16x8xf32>
    %c1 = arith.constant 1 : index
    %c0_20 = arith.constant 0 : index
    %c0_21 = arith.constant 0 : index
    %c0_22 = arith.constant 0 : index
    %37 = vector.load %arg4[%c1, %c0_20, %c0_21, %c0_22] : memref<3x4x32x8xf32, #tpu.memory_space<vmem>>, vector<1x1x32x8xf32>
    %38 = vector.shape_cast %37 : vector<1x1x32x8xf32> to vector<32x8xf32>
    %cst_23 = arith.constant dense<0.000000e+00> : vector<16x8xf32>
    %39 = tpu.matmul %25, %38, %cst_23 {dimension_numbers = #tpu.dot_dimension_numbers<[1], [0], [0], [1], [0, 0, 1, 1], [], []>} : vector<16x32xf32>, vector<32x8xf32>, vector<16x8xf32> -> vector<16x8xf32>
    %c1_24 = arith.constant 1 : index
    %c0_25 = arith.constant 0 : index
    %c0_26 = arith.constant 0 : index
    %c0_27 = arith.constant 0 : index
    %40 = vector.load %arg5[%c1_24, %c0_25, %c0_26, %c0_27] : memref<3x4x1x8xf32, #tpu.memory_space<vmem>>, vector<1x1x1x8xf32>
    %41 = vector.shape_cast %40 : vector<1x1x1x8xf32> to vector<1x8xf32>
    %42 = vector.broadcast %41 : vector<1x8xf32> to vector<16x8xf32>
    %43 = arith.addf %39, %42 : vector<16x8xf32>
    %c2 = arith.constant 2 : index
    %c0_28 = arith.constant 0 : index
    %c0_29 = arith.constant 0 : index
    %c0_30 = arith.constant 0 : index
    %44 = vector.load %arg4[%c2, %c0_28, %c0_29, %c0_30] : memref<3x4x32x8xf32, #tpu.memory_space<vmem>>, vector<1x1x32x8xf32>
    %45 = vector.shape_cast %44 : vector<1x1x32x8xf32> to vector<32x8xf32>
    %cst_31 = arith.constant dense<0.000000e+00> : vector<16x8xf32>
    %46 = tpu.matmul %25, %45, %cst_31 {dimension_numbers = #tpu.dot_dimension_numbers<[1], [0], [0], [1], [0, 0, 1, 1], [], []>} : vector<16x32xf32>, vector<32x8xf32>, vector<16x8xf32> -> vector<16x8xf32>
    %c2_32 = arith.constant 2 : index
    %c0_33 = arith.constant 0 : index
    %c0_34 = arith.constant 0 : index
    %c0_35 = arith.constant 0 : index
    %47 = vector.load %arg5[%c2_32, %c0_33, %c0_34, %c0_35] : memref<3x4x1x8xf32, #tpu.memory_space<vmem>>, vector<1x1x1x8xf32>
    %48 = vector.shape_cast %47 : vector<1x1x1x8xf32> to vector<1x8xf32>
    %49 = vector.broadcast %48 : vector<1x8xf32> to vector<16x8xf32>
    %50 = arith.addf %46, %49 : vector<16x8xf32>
    %cst_36 = arith.constant 0.176776692 : f32
    %51 = vector.broadcast %cst_36 : f32 to vector<16x8xf32>
    %52 = arith.mulf %36, %51 : vector<16x8xf32>
    %53 = vector.shape_cast %52 : vector<16x8xf32> to vector<2x8x8xf32>
    %54 = vector.shape_cast %43 : vector<16x8xf32> to vector<2x8x8xf32>
    %55 = vector.shape_cast %50 : vector<16x8xf32> to vector<2x8x8xf32>
    %cst_37 = arith.constant dense<0.000000e+00> : vector<2x8x8xf32>
    %56 = tpu.matmul %53, %54, %cst_37 {dimension_numbers = #tpu.dot_dimension_numbers<[2], [2], [1], [1], [0, 0, 0, 1, 1, 1], [0], [0]>} : vector<2x8x8xf32>, vector<2x8x8xf32>, vector<2x8x8xf32> -> vector<2x8x8xf32>
    %cst_38 = arith.constant -1.000000e+05 : f32
    %57 = vector.shape_cast %29 : vector<1x8x8xi1> to vector<1x8x8xi1>
    %58 = vector.broadcast %57 : vector<1x8x8xi1> to vector<2x8x8xi1>
    %59 = vector.broadcast %cst_38 : f32 to vector<2x8x8xf32>
    %60 = arith.select %58, %59, %56 : vector<2x8x8xi1>, vector<2x8x8xf32>
    %cst_39 = arith.constant dense<0xFF800000> : vector<2x8xf32>
    %61 = vector.multi_reduction <maximumf>, %60, %cst_39 [2] : vector<2x8x8xf32> to vector<2x8xf32>
    %62 = vector.shape_cast %61 : vector<2x8xf32> to vector<2x8x1xf32>
    %63 = vector.broadcast %62 : vector<2x8x1xf32> to vector<2x8x8xf32>
    %64 = arith.subf %60, %63 : vector<2x8x8xf32>
    %65 = math.exp %64 : vector<2x8x8xf32>
    %cst_40 = arith.constant dense<0.000000e+00> : vector<2x8xf32>
    %66 = vector.multi_reduction <add>, %65, %cst_40 [2] : vector<2x8x8xf32> to vector<2x8xf32>
    %67 = vector.shape_cast %66 : vector<2x8xf32> to vector<2x8x1xf32>
    %68 = tpu.reciprocal %67 {approx = true} : vector<2x8x1xf32> -> vector<2x8x1xf32>
    %69 = vector.broadcast %68 : vector<2x8x1xf32> to vector<2x8x8xf32>
    %70 = arith.mulf %65, %69 : vector<2x8x8xf32>
    %cst_41 = arith.constant dense<0.000000e+00> : vector<2x8x8xf32>
    %71 = tpu.matmul %70, %55, %cst_41 {dimension_numbers = #tpu.dot_dimension_numbers<[2], [1], [1], [2], [0, 0, 0, 1, 1, 2], [0], [0]>} : vector<2x8x8xf32>, vector<2x8x8xf32>, vector<2x8x8xf32> -> vector<2x8x8xf32>
    %72 = vector.shape_cast %71 : vector<2x8x8xf32> to vector<16x8xf32>
    %c0_42 = arith.constant 0 : index
    %c0_43 = arith.constant 0 : index
    %c0_44 = arith.constant 0 : index
    %73 = vector.load %arg6[%c0_42, %c0_43, %c0_44] : memref<4x8x32xf32, #tpu.memory_space<vmem>>, vector<1x8x32xf32>
    %74 = vector.shape_cast %73 : vector<1x8x32xf32> to vector<8x32xf32>
    %cst_45 = arith.constant dense<0.000000e+00> : vector<16x32xf32>
    %75 = tpu.matmul %72, %74, %cst_45 {dimension_numbers = #tpu.dot_dimension_numbers<[1], [0], [0], [1], [0, 0, 1, 1], [], []>} : vector<16x8xf32>, vector<8x32xf32>, vector<16x32xf32> -> vector<16x32xf32>
    %c0_46 = arith.constant 0 : index
    %c1_47 = arith.constant 1 : index
    %c0_48 = arith.constant 0 : index
    %c0_49 = arith.constant 0 : index
    %76 = vector.load %arg4[%c0_46, %c1_47, %c0_48, %c0_49] : memref<3x4x32x8xf32, #tpu.memory_space<vmem>>, vector<1x1x32x8xf32>
    %77 = vector.shape_cast %76 : vector<1x1x32x8xf32> to vector<32x8xf32>
    %cst_50 = arith.constant dense<0.000000e+00> : vector<16x8xf32>
    %78 = tpu.matmul %25, %77, %cst_50 {dimension_numbers = #tpu.dot_dimension_numbers<[1], [0], [0], [1], [0, 0, 1, 1], [], []>} : vector<16x32xf32>, vector<32x8xf32>, vector<16x8xf32> -> vector<16x8xf32>
    %c0_51 = arith.constant 0 : index
    %c1_52 = arith.constant 1 : index
    %c0_53 = arith.constant 0 : index
    %c0_54 = arith.constant 0 : index
    %79 = vector.load %arg5[%c0_51, %c1_52, %c0_53, %c0_54] : memref<3x4x1x8xf32, #tpu.memory_space<vmem>>, vector<1x1x1x8xf32>
    %80 = vector.shape_cast %79 : vector<1x1x1x8xf32> to vector<1x8xf32>
    %81 = vector.broadcast %80 : vector<1x8xf32> to vector<16x8xf32>
    %82 = arith.addf %78, %81 : vector<16x8xf32>
    %c1_55 = arith.constant 1 : index
    %c1_56 = arith.constant 1 : index
    %c0_57 = arith.constant 0 : index
    %c0_58 = arith.constant 0 : index
    %83 = vector.load %arg4[%c1_55, %c1_56, %c0_57, %c0_58] : memref<3x4x32x8xf32, #tpu.memory_space<vmem>>, vector<1x1x32x8xf32>
    %84 = vector.shape_cast %83 : vector<1x1x32x8xf32> to vector<32x8xf32>
    %cst_59 = arith.constant dense<0.000000e+00> : vector<16x8xf32>
    %85 = tpu.matmul %25, %84, %cst_59 {dimension_numbers = #tpu.dot_dimension_numbers<[1], [0], [0], [1], [0, 0, 1, 1], [], []>} : vector<16x32xf32>, vector<32x8xf32>, vector<16x8xf32> -> vector<16x8xf32>
    %c1_60 = arith.constant 1 : index
    %c1_61 = arith.constant 1 : index
    %c0_62 = arith.constant 0 : index
    %c0_63 = arith.constant 0 : index
    %86 = vector.load %arg5[%c1_60, %c1_61, %c0_62, %c0_63] : memref<3x4x1x8xf32, #tpu.memory_space<vmem>>, vector<1x1x1x8xf32>
    %87 = vector.shape_cast %86 : vector<1x1x1x8xf32> to vector<1x8xf32>
    %88 = vector.broadcast %87 : vector<1x8xf32> to vector<16x8xf32>
    %89 = arith.addf %85, %88 : vector<16x8xf32>
    %c2_64 = arith.constant 2 : index
    %c1_65 = arith.constant 1 : index
    %c0_66 = arith.constant 0 : index
    %c0_67 = arith.constant 0 : index
    %90 = vector.load %arg4[%c2_64, %c1_65, %c0_66, %c0_67] : memref<3x4x32x8xf32, #tpu.memory_space<vmem>>, vector<1x1x32x8xf32>
    %91 = vector.shape_cast %90 : vector<1x1x32x8xf32> to vector<32x8xf32>
    %cst_68 = arith.constant dense<0.000000e+00> : vector<16x8xf32>
    %92 = tpu.matmul %25, %91, %cst_68 {dimension_numbers = #tpu.dot_dimension_numbers<[1], [0], [0], [1], [0, 0, 1, 1], [], []>} : vector<16x32xf32>, vector<32x8xf32>, vector<16x8xf32> -> vector<16x8xf32>
    %c2_69 = arith.constant 2 : index
    %c1_70 = arith.constant 1 : index
    %c0_71 = arith.constant 0 : index
    %c0_72 = arith.constant 0 : index
    %93 = vector.load %arg5[%c2_69, %c1_70, %c0_71, %c0_72] : memref<3x4x1x8xf32, #tpu.memory_space<vmem>>, vector<1x1x1x8xf32>
    %94 = vector.shape_cast %93 : vector<1x1x1x8xf32> to vector<1x8xf32>
    %95 = vector.broadcast %94 : vector<1x8xf32> to vector<16x8xf32>
    %96 = arith.addf %92, %95 : vector<16x8xf32>
    %cst_73 = arith.constant 0.176776692 : f32
    %97 = vector.broadcast %cst_73 : f32 to vector<16x8xf32>
    %98 = arith.mulf %82, %97 : vector<16x8xf32>
    %99 = vector.shape_cast %98 : vector<16x8xf32> to vector<2x8x8xf32>
    %100 = vector.shape_cast %89 : vector<16x8xf32> to vector<2x8x8xf32>
    %101 = vector.shape_cast %96 : vector<16x8xf32> to vector<2x8x8xf32>
    %cst_74 = arith.constant dense<0.000000e+00> : vector<2x8x8xf32>
    %102 = tpu.matmul %99, %100, %cst_74 {dimension_numbers = #tpu.dot_dimension_numbers<[2], [2], [1], [1], [0, 0, 0, 1, 1, 1], [0], [0]>} : vector<2x8x8xf32>, vector<2x8x8xf32>, vector<2x8x8xf32> -> vector<2x8x8xf32>
    %cst_75 = arith.constant -1.000000e+05 : f32
    %103 = vector.shape_cast %29 : vector<1x8x8xi1> to vector<1x8x8xi1>
    %104 = vector.broadcast %103 : vector<1x8x8xi1> to vector<2x8x8xi1>
    %105 = vector.broadcast %cst_75 : f32 to vector<2x8x8xf32>
    %106 = arith.select %104, %105, %102 : vector<2x8x8xi1>, vector<2x8x8xf32>
    %cst_76 = arith.constant dense<0xFF800000> : vector<2x8xf32>
    %107 = vector.multi_reduction <maximumf>, %106, %cst_76 [2] : vector<2x8x8xf32> to vector<2x8xf32>
    %108 = vector.shape_cast %107 : vector<2x8xf32> to vector<2x8x1xf32>
    %109 = vector.broadcast %108 : vector<2x8x1xf32> to vector<2x8x8xf32>
    %110 = arith.subf %106, %109 : vector<2x8x8xf32>
    %111 = math.exp %110 : vector<2x8x8xf32>
    %cst_77 = arith.constant dense<0.000000e+00> : vector<2x8xf32>
    %112 = vector.multi_reduction <add>, %111, %cst_77 [2] : vector<2x8x8xf32> to vector<2x8xf32>
    %113 = vector.shape_cast %112 : vector<2x8xf32> to vector<2x8x1xf32>
    %114 = tpu.reciprocal %113 {approx = true} : vector<2x8x1xf32> -> vector<2x8x1xf32>
    %115 = vector.broadcast %114 : vector<2x8x1xf32> to vector<2x8x8xf32>
    %116 = arith.mulf %111, %115 : vector<2x8x8xf32>
    %cst_78 = arith.constant dense<0.000000e+00> : vector<2x8x8xf32>
    %117 = tpu.matmul %116, %101, %cst_78 {dimension_numbers = #tpu.dot_dimension_numbers<[2], [1], [1], [2], [0, 0, 0, 1, 1, 2], [0], [0]>} : vector<2x8x8xf32>, vector<2x8x8xf32>, vector<2x8x8xf32> -> vector<2x8x8xf32>
    %118 = vector.shape_cast %117 : vector<2x8x8xf32> to vector<16x8xf32>
    %c1_79 = arith.constant 1 : index
    %c0_80 = arith.constant 0 : index
    %c0_81 = arith.constant 0 : index
    %119 = vector.load %arg6[%c1_79, %c0_80, %c0_81] : memref<4x8x32xf32, #tpu.memory_space<vmem>>, vector<1x8x32xf32>
    %120 = vector.shape_cast %119 : vector<1x8x32xf32> to vector<8x32xf32>
    %cst_82 = arith.constant dense<0.000000e+00> : vector<16x32xf32>
    %121 = tpu.matmul %118, %120, %cst_82 {dimension_numbers = #tpu.dot_dimension_numbers<[1], [0], [0], [1], [0, 0, 1, 1], [], []>} : vector<16x8xf32>, vector<8x32xf32>, vector<16x32xf32> -> vector<16x32xf32>
    %122 = arith.addf %75, %121 : vector<16x32xf32>
    %c0_83 = arith.constant 0 : index
    %c2_84 = arith.constant 2 : index
    %c0_85 = arith.constant 0 : index
    %c0_86 = arith.constant 0 : index
    %123 = vector.load %arg4[%c0_83, %c2_84, %c0_85, %c0_86] : memref<3x4x32x8xf32, #tpu.memory_space<vmem>>, vector<1x1x32x8xf32>
    %124 = vector.shape_cast %123 : vector<1x1x32x8xf32> to vector<32x8xf32>
    %cst_87 = arith.constant dense<0.000000e+00> : vector<16x8xf32>
    %125 = tpu.matmul %25, %124, %cst_87 {dimension_numbers = #tpu.dot_dimension_numbers<[1], [0], [0], [1], [0, 0, 1, 1], [], []>} : vector<16x32xf32>, vector<32x8xf32>, vector<16x8xf32> -> vector<16x8xf32>
    %c0_88 = arith.constant 0 : index
    %c2_89 = arith.constant 2 : index
    %c0_90 = arith.constant 0 : index
    %c0_91 = arith.constant 0 : index
    %126 = vector.load %arg5[%c0_88, %c2_89, %c0_90, %c0_91] : memref<3x4x1x8xf32, #tpu.memory_space<vmem>>, vector<1x1x1x8xf32>
    %127 = vector.shape_cast %126 : vector<1x1x1x8xf32> to vector<1x8xf32>
    %128 = vector.broadcast %127 : vector<1x8xf32> to vector<16x8xf32>
    %129 = arith.addf %125, %128 : vector<16x8xf32>
    %c1_92 = arith.constant 1 : index
    %c2_93 = arith.constant 2 : index
    %c0_94 = arith.constant 0 : index
    %c0_95 = arith.constant 0 : index
    %130 = vector.load %arg4[%c1_92, %c2_93, %c0_94, %c0_95] : memref<3x4x32x8xf32, #tpu.memory_space<vmem>>, vector<1x1x32x8xf32>
    %131 = vector.shape_cast %130 : vector<1x1x32x8xf32> to vector<32x8xf32>
    %cst_96 = arith.constant dense<0.000000e+00> : vector<16x8xf32>
    %132 = tpu.matmul %25, %131, %cst_96 {dimension_numbers = #tpu.dot_dimension_numbers<[1], [0], [0], [1], [0, 0, 1, 1], [], []>} : vector<16x32xf32>, vector<32x8xf32>, vector<16x8xf32> -> vector<16x8xf32>
    %c1_97 = arith.constant 1 : index
    %c2_98 = arith.constant 2 : index
    %c0_99 = arith.constant 0 : index
    %c0_100 = arith.constant 0 : index
    %133 = vector.load %arg5[%c1_97, %c2_98, %c0_99, %c0_100] : memref<3x4x1x8xf32, #tpu.memory_space<vmem>>, vector<1x1x1x8xf32>
    %134 = vector.shape_cast %133 : vector<1x1x1x8xf32> to vector<1x8xf32>
    %135 = vector.broadcast %134 : vector<1x8xf32> to vector<16x8xf32>
    %136 = arith.addf %132, %135 : vector<16x8xf32>
    %c2_101 = arith.constant 2 : index
    %c2_102 = arith.constant 2 : index
    %c0_103 = arith.constant 0 : index
    %c0_104 = arith.constant 0 : index
    %137 = vector.load %arg4[%c2_101, %c2_102, %c0_103, %c0_104] : memref<3x4x32x8xf32, #tpu.memory_space<vmem>>, vector<1x1x32x8xf32>
    %138 = vector.shape_cast %137 : vector<1x1x32x8xf32> to vector<32x8xf32>
    %cst_105 = arith.constant dense<0.000000e+00> : vector<16x8xf32>
    %139 = tpu.matmul %25, %138, %cst_105 {dimension_numbers = #tpu.dot_dimension_numbers<[1], [0], [0], [1], [0, 0, 1, 1], [], []>} : vector<16x32xf32>, vector<32x8xf32>, vector<16x8xf32> -> vector<16x8xf32>
    %c2_106 = arith.constant 2 : index
    %c2_107 = arith.constant 2 : index
    %c0_108 = arith.constant 0 : index
    %c0_109 = arith.constant 0 : index
    %140 = vector.load %arg5[%c2_106, %c2_107, %c0_108, %c0_109] : memref<3x4x1x8xf32, #tpu.memory_space<vmem>>, vector<1x1x1x8xf32>
    %141 = vector.shape_cast %140 : vector<1x1x1x8xf32> to vector<1x8xf32>
    %142 = vector.broadcast %141 : vector<1x8xf32> to vector<16x8xf32>
    %143 = arith.addf %139, %142 : vector<16x8xf32>
    %cst_110 = arith.constant 0.176776692 : f32
    %144 = vector.broadcast %cst_110 : f32 to vector<16x8xf32>
    %145 = arith.mulf %129, %144 : vector<16x8xf32>
    %146 = vector.shape_cast %145 : vector<16x8xf32> to vector<2x8x8xf32>
    %147 = vector.shape_cast %136 : vector<16x8xf32> to vector<2x8x8xf32>
    %148 = vector.shape_cast %143 : vector<16x8xf32> to vector<2x8x8xf32>
    %cst_111 = arith.constant dense<0.000000e+00> : vector<2x8x8xf32>
    %149 = tpu.matmul %146, %147, %cst_111 {dimension_numbers = #tpu.dot_dimension_numbers<[2], [2], [1], [1], [0, 0, 0, 1, 1, 1], [0], [0]>} : vector<2x8x8xf32>, vector<2x8x8xf32>, vector<2x8x8xf32> -> vector<2x8x8xf32>
    %cst_112 = arith.constant -1.000000e+05 : f32
    %150 = vector.shape_cast %29 : vector<1x8x8xi1> to vector<1x8x8xi1>
    %151 = vector.broadcast %150 : vector<1x8x8xi1> to vector<2x8x8xi1>
    %152 = vector.broadcast %cst_112 : f32 to vector<2x8x8xf32>
    %153 = arith.select %151, %152, %149 : vector<2x8x8xi1>, vector<2x8x8xf32>
    %cst_113 = arith.constant dense<0xFF800000> : vector<2x8xf32>
    %154 = vector.multi_reduction <maximumf>, %153, %cst_113 [2] : vector<2x8x8xf32> to vector<2x8xf32>
    %155 = vector.shape_cast %154 : vector<2x8xf32> to vector<2x8x1xf32>
    %156 = vector.broadcast %155 : vector<2x8x1xf32> to vector<2x8x8xf32>
    %157 = arith.subf %153, %156 : vector<2x8x8xf32>
    %158 = math.exp %157 : vector<2x8x8xf32>
    %cst_114 = arith.constant dense<0.000000e+00> : vector<2x8xf32>
    %159 = vector.multi_reduction <add>, %158, %cst_114 [2] : vector<2x8x8xf32> to vector<2x8xf32>
    %160 = vector.shape_cast %159 : vector<2x8xf32> to vector<2x8x1xf32>
    %161 = tpu.reciprocal %160 {approx = true} : vector<2x8x1xf32> -> vector<2x8x1xf32>
    %162 = vector.broadcast %161 : vector<2x8x1xf32> to vector<2x8x8xf32>
    %163 = arith.mulf %158, %162 : vector<2x8x8xf32>
    %cst_115 = arith.constant dense<0.000000e+00> : vector<2x8x8xf32>
    %164 = tpu.matmul %163, %148, %cst_115 {dimension_numbers = #tpu.dot_dimension_numbers<[2], [1], [1], [2], [0, 0, 0, 1, 1, 2], [0], [0]>} : vector<2x8x8xf32>, vector<2x8x8xf32>, vector<2x8x8xf32> -> vector<2x8x8xf32>
    %165 = vector.shape_cast %164 : vector<2x8x8xf32> to vector<16x8xf32>
    %c2_116 = arith.constant 2 : index
    %c0_117 = arith.constant 0 : index
    %c0_118 = arith.constant 0 : index
    %166 = vector.load %arg6[%c2_116, %c0_117, %c0_118] : memref<4x8x32xf32, #tpu.memory_space<vmem>>, vector<1x8x32xf32>
    %167 = vector.shape_cast %166 : vector<1x8x32xf32> to vector<8x32xf32>
    %cst_119 = arith.constant dense<0.000000e+00> : vector<16x32xf32>
    %168 = tpu.matmul %165, %167, %cst_119 {dimension_numbers = #tpu.dot_dimension_numbers<[1], [0], [0], [1], [0, 0, 1, 1], [], []>} : vector<16x8xf32>, vector<8x32xf32>, vector<16x32xf32> -> vector<16x32xf32>
    %169 = arith.addf %122, %168 : vector<16x32xf32>
    %c0_120 = arith.constant 0 : index
    %c3 = arith.constant 3 : index
    %c0_121 = arith.constant 0 : index
    %c0_122 = arith.constant 0 : index
    %170 = vector.load %arg4[%c0_120, %c3, %c0_121, %c0_122] : memref<3x4x32x8xf32, #tpu.memory_space<vmem>>, vector<1x1x32x8xf32>
    %171 = vector.shape_cast %170 : vector<1x1x32x8xf32> to vector<32x8xf32>
    %cst_123 = arith.constant dense<0.000000e+00> : vector<16x8xf32>
    %172 = tpu.matmul %25, %171, %cst_123 {dimension_numbers = #tpu.dot_dimension_numbers<[1], [0], [0], [1], [0, 0, 1, 1], [], []>} : vector<16x32xf32>, vector<32x8xf32>, vector<16x8xf32> -> vector<16x8xf32>
    %c0_124 = arith.constant 0 : index
    %c3_125 = arith.constant 3 : index
    %c0_126 = arith.constant 0 : index
    %c0_127 = arith.constant 0 : index
    %173 = vector.load %arg5[%c0_124, %c3_125, %c0_126, %c0_127] : memref<3x4x1x8xf32, #tpu.memory_space<vmem>>, vector<1x1x1x8xf32>
    %174 = vector.shape_cast %173 : vector<1x1x1x8xf32> to vector<1x8xf32>
    %175 = vector.broadcast %174 : vector<1x8xf32> to vector<16x8xf32>
    %176 = arith.addf %172, %175 : vector<16x8xf32>
    %c1_128 = arith.constant 1 : index
    %c3_129 = arith.constant 3 : index
    %c0_130 = arith.constant 0 : index
    %c0_131 = arith.constant 0 : index
    %177 = vector.load %arg4[%c1_128, %c3_129, %c0_130, %c0_131] : memref<3x4x32x8xf32, #tpu.memory_space<vmem>>, vector<1x1x32x8xf32>
    %178 = vector.shape_cast %177 : vector<1x1x32x8xf32> to vector<32x8xf32>
    %cst_132 = arith.constant dense<0.000000e+00> : vector<16x8xf32>
    %179 = tpu.matmul %25, %178, %cst_132 {dimension_numbers = #tpu.dot_dimension_numbers<[1], [0], [0], [1], [0, 0, 1, 1], [], []>} : vector<16x32xf32>, vector<32x8xf32>, vector<16x8xf32> -> vector<16x8xf32>
    %c1_133 = arith.constant 1 : index
    %c3_134 = arith.constant 3 : index
    %c0_135 = arith.constant 0 : index
    %c0_136 = arith.constant 0 : index
    %180 = vector.load %arg5[%c1_133, %c3_134, %c0_135, %c0_136] : memref<3x4x1x8xf32, #tpu.memory_space<vmem>>, vector<1x1x1x8xf32>
    %181 = vector.shape_cast %180 : vector<1x1x1x8xf32> to vector<1x8xf32>
    %182 = vector.broadcast %181 : vector<1x8xf32> to vector<16x8xf32>
    %183 = arith.addf %179, %182 : vector<16x8xf32>
    %c2_137 = arith.constant 2 : index
    %c3_138 = arith.constant 3 : index
    %c0_139 = arith.constant 0 : index
    %c0_140 = arith.constant 0 : index
    %184 = vector.load %arg4[%c2_137, %c3_138, %c0_139, %c0_140] : memref<3x4x32x8xf32, #tpu.memory_space<vmem>>, vector<1x1x32x8xf32>
    %185 = vector.shape_cast %184 : vector<1x1x32x8xf32> to vector<32x8xf32>
    %cst_141 = arith.constant dense<0.000000e+00> : vector<16x8xf32>
    %186 = tpu.matmul %25, %185, %cst_141 {dimension_numbers = #tpu.dot_dimension_numbers<[1], [0], [0], [1], [0, 0, 1, 1], [], []>} : vector<16x32xf32>, vector<32x8xf32>, vector<16x8xf32> -> vector<16x8xf32>
    %c2_142 = arith.constant 2 : index
    %c3_143 = arith.constant 3 : index
    %c0_144 = arith.constant 0 : index
    %c0_145 = arith.constant 0 : index
    %187 = vector.load %arg5[%c2_142, %c3_143, %c0_144, %c0_145] : memref<3x4x1x8xf32, #tpu.memory_space<vmem>>, vector<1x1x1x8xf32>
    %188 = vector.shape_cast %187 : vector<1x1x1x8xf32> to vector<1x8xf32>
    %189 = vector.broadcast %188 : vector<1x8xf32> to vector<16x8xf32>
    %190 = arith.addf %186, %189 : vector<16x8xf32>
    %cst_146 = arith.constant 0.176776692 : f32
    %191 = vector.broadcast %cst_146 : f32 to vector<16x8xf32>
    %192 = arith.mulf %176, %191 : vector<16x8xf32>
    %193 = vector.shape_cast %192 : vector<16x8xf32> to vector<2x8x8xf32>
    %194 = vector.shape_cast %183 : vector<16x8xf32> to vector<2x8x8xf32>
    %195 = vector.shape_cast %190 : vector<16x8xf32> to vector<2x8x8xf32>
    %cst_147 = arith.constant dense<0.000000e+00> : vector<2x8x8xf32>
    %196 = tpu.matmul %193, %194, %cst_147 {dimension_numbers = #tpu.dot_dimension_numbers<[2], [2], [1], [1], [0, 0, 0, 1, 1, 1], [0], [0]>} : vector<2x8x8xf32>, vector<2x8x8xf32>, vector<2x8x8xf32> -> vector<2x8x8xf32>
    %cst_148 = arith.constant -1.000000e+05 : f32
    %197 = vector.shape_cast %29 : vector<1x8x8xi1> to vector<1x8x8xi1>
    %198 = vector.broadcast %197 : vector<1x8x8xi1> to vector<2x8x8xi1>
    %199 = vector.broadcast %cst_148 : f32 to vector<2x8x8xf32>
    %200 = arith.select %198, %199, %196 : vector<2x8x8xi1>, vector<2x8x8xf32>
    %cst_149 = arith.constant dense<0xFF800000> : vector<2x8xf32>
    %201 = vector.multi_reduction <maximumf>, %200, %cst_149 [2] : vector<2x8x8xf32> to vector<2x8xf32>
    %202 = vector.shape_cast %201 : vector<2x8xf32> to vector<2x8x1xf32>
    %203 = vector.broadcast %202 : vector<2x8x1xf32> to vector<2x8x8xf32>
    %204 = arith.subf %200, %203 : vector<2x8x8xf32>
    %205 = math.exp %204 : vector<2x8x8xf32>
    %cst_150 = arith.constant dense<0.000000e+00> : vector<2x8xf32>
    %206 = vector.multi_reduction <add>, %205, %cst_150 [2] : vector<2x8x8xf32> to vector<2x8xf32>
    %207 = vector.shape_cast %206 : vector<2x8xf32> to vector<2x8x1xf32>
    %208 = tpu.reciprocal %207 {approx = true} : vector<2x8x1xf32> -> vector<2x8x1xf32>
    %209 = vector.broadcast %208 : vector<2x8x1xf32> to vector<2x8x8xf32>
    %210 = arith.mulf %205, %209 : vector<2x8x8xf32>
    %cst_151 = arith.constant dense<0.000000e+00> : vector<2x8x8xf32>
    %211 = tpu.matmul %210, %195, %cst_151 {dimension_numbers = #tpu.dot_dimension_numbers<[2], [1], [1], [2], [0, 0, 0, 1, 1, 2], [0], [0]>} : vector<2x8x8xf32>, vector<2x8x8xf32>, vector<2x8x8xf32> -> vector<2x8x8xf32>
    %212 = vector.shape_cast %211 : vector<2x8x8xf32> to vector<16x8xf32>
    %c3_152 = arith.constant 3 : index
    %c0_153 = arith.constant 0 : index
    %c0_154 = arith.constant 0 : index
    %213 = vector.load %arg6[%c3_152, %c0_153, %c0_154] : memref<4x8x32xf32, #tpu.memory_space<vmem>>, vector<1x8x32xf32>
    %214 = vector.shape_cast %213 : vector<1x8x32xf32> to vector<8x32xf32>
    %cst_155 = arith.constant dense<0.000000e+00> : vector<16x32xf32>
    %215 = tpu.matmul %212, %214, %cst_155 {dimension_numbers = #tpu.dot_dimension_numbers<[1], [0], [0], [1], [0, 0, 1, 1], [], []>} : vector<16x8xf32>, vector<8x32xf32>, vector<16x32xf32> -> vector<16x32xf32>
    %216 = arith.addf %169, %215 : vector<16x32xf32>
    %c0_156 = arith.constant 0 : index
    %c0_157 = arith.constant 0 : index
    %217 = vector.load %arg7[%c0_156, %c0_157] : memref<1x32xf32, #tpu.memory_space<vmem>>, vector<1x32xf32>
    %218 = vector.broadcast %217 : vector<1x32xf32> to vector<16x32xf32>
    %219 = arith.addf %216, %218 : vector<16x32xf32>
    %220 = arith.addf %0, %219 : vector<16x32xf32>
    %c0_158 = arith.constant 0 : index
    %c0_159 = arith.constant 0 : index
    %221 = vector.load %arg8[%c0_158, %c0_159] : memref<1x32xf32, #tpu.memory_space<vmem>>, vector<1x32xf32>
    %c0_160 = arith.constant 0 : index
    %c0_161 = arith.constant 0 : index
    %222 = vector.load %arg9[%c0_160, %c0_161] : memref<1x32xf32, #tpu.memory_space<vmem>>, vector<1x32xf32>
    %cst_162 = arith.constant dense<0.000000e+00> : vector<16xf32>
    %223 = vector.multi_reduction <add>, %220, %cst_162 [1] : vector<16x32xf32> to vector<16xf32>
    %224 = vector.shape_cast %223 : vector<16xf32> to vector<16x1xf32>
    %cst_163 = arith.constant 3.200000e+01 : f32
    %225 = vector.broadcast %cst_163 : f32 to vector<16x1xf32>
    %226 = arith.divf %224, %225 : vector<16x1xf32>
    %227 = vector.broadcast %226 : vector<16x1xf32> to vector<16x32xf32>
    %228 = arith.subf %220, %227 : vector<16x32xf32>
    %229 = arith.mulf %228, %228 : vector<16x32xf32>
    %cst_164 = arith.constant dense<0.000000e+00> : vector<16xf32>
    %230 = vector.multi_reduction <add>, %229, %cst_164 [1] : vector<16x32xf32> to vector<16xf32>
    %231 = vector.shape_cast %230 : vector<16xf32> to vector<16x1xf32>
    %cst_165 = arith.constant 3.200000e+01 : f32
    %232 = vector.broadcast %cst_165 : f32 to vector<16x1xf32>
    %233 = arith.divf %231, %232 : vector<16x1xf32>
    %234 = vector.broadcast %226 : vector<16x1xf32> to vector<16x32xf32>
    %235 = arith.subf %220, %234 : vector<16x32xf32>
    %cst_166 = arith.constant 9.99999974E-6 : f32
    %236 = vector.broadcast %cst_166 : f32 to vector<16x1xf32>
    %237 = arith.addf %233, %236 : vector<16x1xf32>
    %238 = math.rsqrt %237 : vector<16x1xf32>
    %239 = vector.broadcast %238 : vector<16x1xf32> to vector<16x32xf32>
    %240 = arith.mulf %235, %239 : vector<16x32xf32>
    %241 = vector.broadcast %221 : vector<1x32xf32> to vector<16x32xf32>
    %242 = arith.mulf %240, %241 : vector<16x32xf32>
    %243 = vector.broadcast %222 : vector<1x32xf32> to vector<16x32xf32>
    %244 = arith.addf %242, %243 : vector<16x32xf32>
    %c0_167 = arith.constant 0 : index
    %c0_168 = arith.constant 0 : index
    %c0_169 = arith.constant 0 : index
    %c0_170 = arith.constant 0 : index
    %245 = vector.load %arg10[%c0_167, %c0_168, %c0_169, %c0_170] : memref<3x4x32x8xf32, #tpu.memory_space<vmem>>, vector<1x1x32x8xf32>
    %246 = vector.shape_cast %245 : vector<1x1x32x8xf32> to vector<32x8xf32>
    %cst_171 = arith.constant dense<0.000000e+00> : vector<16x8xf32>
    %247 = tpu.matmul %244, %246, %cst_171 {dimension_numbers = #tpu.dot_dimension_numbers<[1], [0], [0], [1], [0, 0, 1, 1], [], []>} : vector<16x32xf32>, vector<32x8xf32>, vector<16x8xf32> -> vector<16x8xf32>
    %c0_172 = arith.constant 0 : index
    %c0_173 = arith.constant 0 : index
    %c0_174 = arith.constant 0 : index
    %c0_175 = arith.constant 0 : index
    %248 = vector.load %arg11[%c0_172, %c0_173, %c0_174, %c0_175] : memref<3x4x1x8xf32, #tpu.memory_space<vmem>>, vector<1x1x1x8xf32>
    %249 = vector.shape_cast %248 : vector<1x1x1x8xf32> to vector<1x8xf32>
    %250 = vector.broadcast %249 : vector<1x8xf32> to vector<16x8xf32>
    %251 = arith.addf %247, %250 : vector<16x8xf32>
    %c1_176 = arith.constant 1 : index
    %c0_177 = arith.constant 0 : index
    %c0_178 = arith.constant 0 : index
    %c0_179 = arith.constant 0 : index
    %252 = vector.load %arg10[%c1_176, %c0_177, %c0_178, %c0_179] : memref<3x4x32x8xf32, #tpu.memory_space<vmem>>, vector<1x1x32x8xf32>
    %253 = vector.shape_cast %252 : vector<1x1x32x8xf32> to vector<32x8xf32>
    %cst_180 = arith.constant dense<0.000000e+00> : vector<16x8xf32>
    %254 = tpu.matmul %1, %253, %cst_180 {dimension_numbers = #tpu.dot_dimension_numbers<[1], [0], [0], [1], [0, 0, 1, 1], [], []>} : vector<16x32xf32>, vector<32x8xf32>, vector<16x8xf32> -> vector<16x8xf32>
    %c1_181 = arith.constant 1 : index
    %c0_182 = arith.constant 0 : index
    %c0_183 = arith.constant 0 : index
    %c0_184 = arith.constant 0 : index
    %255 = vector.load %arg11[%c1_181, %c0_182, %c0_183, %c0_184] : memref<3x4x1x8xf32, #tpu.memory_space<vmem>>, vector<1x1x1x8xf32>
    %256 = vector.shape_cast %255 : vector<1x1x1x8xf32> to vector<1x8xf32>
    %257 = vector.broadcast %256 : vector<1x8xf32> to vector<16x8xf32>
    %258 = arith.addf %254, %257 : vector<16x8xf32>
    %c2_185 = arith.constant 2 : index
    %c0_186 = arith.constant 0 : index
    %c0_187 = arith.constant 0 : index
    %c0_188 = arith.constant 0 : index
    %259 = vector.load %arg10[%c2_185, %c0_186, %c0_187, %c0_188] : memref<3x4x32x8xf32, #tpu.memory_space<vmem>>, vector<1x1x32x8xf32>
    %260 = vector.shape_cast %259 : vector<1x1x32x8xf32> to vector<32x8xf32>
    %cst_189 = arith.constant dense<0.000000e+00> : vector<16x8xf32>
    %261 = tpu.matmul %1, %260, %cst_189 {dimension_numbers = #tpu.dot_dimension_numbers<[1], [0], [0], [1], [0, 0, 1, 1], [], []>} : vector<16x32xf32>, vector<32x8xf32>, vector<16x8xf32> -> vector<16x8xf32>
    %c2_190 = arith.constant 2 : index
    %c0_191 = arith.constant 0 : index
    %c0_192 = arith.constant 0 : index
    %c0_193 = arith.constant 0 : index
    %262 = vector.load %arg11[%c2_190, %c0_191, %c0_192, %c0_193] : memref<3x4x1x8xf32, #tpu.memory_space<vmem>>, vector<1x1x1x8xf32>
    %263 = vector.shape_cast %262 : vector<1x1x1x8xf32> to vector<1x8xf32>
    %264 = vector.broadcast %263 : vector<1x8xf32> to vector<16x8xf32>
    %265 = arith.addf %261, %264 : vector<16x8xf32>
    %cst_194 = arith.constant 0.176776692 : f32
    %266 = vector.broadcast %cst_194 : f32 to vector<16x8xf32>
    %267 = arith.mulf %251, %266 : vector<16x8xf32>
    %268 = vector.shape_cast %267 : vector<16x8xf32> to vector<2x8x8xf32>
    %269 = vector.shape_cast %258 : vector<16x8xf32> to vector<2x8x8xf32>
    %270 = vector.shape_cast %265 : vector<16x8xf32> to vector<2x8x8xf32>
    %cst_195 = arith.constant dense<0.000000e+00> : vector<2x8x8xf32>
    %271 = tpu.matmul %268, %269, %cst_195 {dimension_numbers = #tpu.dot_dimension_numbers<[2], [2], [1], [1], [0, 0, 0, 1, 1, 1], [0], [0]>} : vector<2x8x8xf32>, vector<2x8x8xf32>, vector<2x8x8xf32> -> vector<2x8x8xf32>
    %cst_196 = arith.constant dense<0xFF800000> : vector<2x8xf32>
    %272 = vector.multi_reduction <maximumf>, %271, %cst_196 [2] : vector<2x8x8xf32> to vector<2x8xf32>
    %273 = vector.shape_cast %272 : vector<2x8xf32> to vector<2x8x1xf32>
    %274 = vector.broadcast %273 : vector<2x8x1xf32> to vector<2x8x8xf32>
    %275 = arith.subf %271, %274 : vector<2x8x8xf32>
    %276 = math.exp %275 : vector<2x8x8xf32>
    %cst_197 = arith.constant dense<0.000000e+00> : vector<2x8xf32>
    %277 = vector.multi_reduction <add>, %276, %cst_197 [2] : vector<2x8x8xf32> to vector<2x8xf32>
    %278 = vector.shape_cast %277 : vector<2x8xf32> to vector<2x8x1xf32>
    %279 = tpu.reciprocal %278 {approx = true} : vector<2x8x1xf32> -> vector<2x8x1xf32>
    %280 = vector.broadcast %279 : vector<2x8x1xf32> to vector<2x8x8xf32>
    %281 = arith.mulf %276, %280 : vector<2x8x8xf32>
    %cst_198 = arith.constant dense<0.000000e+00> : vector<2x8x8xf32>
    %282 = tpu.matmul %281, %270, %cst_198 {dimension_numbers = #tpu.dot_dimension_numbers<[2], [1], [1], [2], [0, 0, 0, 1, 1, 2], [0], [0]>} : vector<2x8x8xf32>, vector<2x8x8xf32>, vector<2x8x8xf32> -> vector<2x8x8xf32>
    %283 = vector.shape_cast %282 : vector<2x8x8xf32> to vector<16x8xf32>
    %c0_199 = arith.constant 0 : index
    %c0_200 = arith.constant 0 : index
    %c0_201 = arith.constant 0 : index
    %284 = vector.load %arg12[%c0_199, %c0_200, %c0_201] : memref<4x8x32xf32, #tpu.memory_space<vmem>>, vector<1x8x32xf32>
    %285 = vector.shape_cast %284 : vector<1x8x32xf32> to vector<8x32xf32>
    %cst_202 = arith.constant dense<0.000000e+00> : vector<16x32xf32>
    %286 = tpu.matmul %283, %285, %cst_202 {dimension_numbers = #tpu.dot_dimension_numbers<[1], [0], [0], [1], [0, 0, 1, 1], [], []>} : vector<16x8xf32>, vector<8x32xf32>, vector<16x32xf32> -> vector<16x32xf32>
    %c0_203 = arith.constant 0 : index
    %c1_204 = arith.constant 1 : index
    %c0_205 = arith.constant 0 : index
    %c0_206 = arith.constant 0 : index
    %287 = vector.load %arg10[%c0_203, %c1_204, %c0_205, %c0_206] : memref<3x4x32x8xf32, #tpu.memory_space<vmem>>, vector<1x1x32x8xf32>
    %288 = vector.shape_cast %287 : vector<1x1x32x8xf32> to vector<32x8xf32>
    %cst_207 = arith.constant dense<0.000000e+00> : vector<16x8xf32>
    %289 = tpu.matmul %244, %288, %cst_207 {dimension_numbers = #tpu.dot_dimension_numbers<[1], [0], [0], [1], [0, 0, 1, 1], [], []>} : vector<16x32xf32>, vector<32x8xf32>, vector<16x8xf32> -> vector<16x8xf32>
    %c0_208 = arith.constant 0 : index
    %c1_209 = arith.constant 1 : index
    %c0_210 = arith.constant 0 : index
    %c0_211 = arith.constant 0 : index
    %290 = vector.load %arg11[%c0_208, %c1_209, %c0_210, %c0_211] : memref<3x4x1x8xf32, #tpu.memory_space<vmem>>, vector<1x1x1x8xf32>
    %291 = vector.shape_cast %290 : vector<1x1x1x8xf32> to vector<1x8xf32>
    %292 = vector.broadcast %291 : vector<1x8xf32> to vector<16x8xf32>
    %293 = arith.addf %289, %292 : vector<16x8xf32>
    %c1_212 = arith.constant 1 : index
    %c1_213 = arith.constant 1 : index
    %c0_214 = arith.constant 0 : index
    %c0_215 = arith.constant 0 : index
    %294 = vector.load %arg10[%c1_212, %c1_213, %c0_214, %c0_215] : memref<3x4x32x8xf32, #tpu.memory_space<vmem>>, vector<1x1x32x8xf32>
    %295 = vector.shape_cast %294 : vector<1x1x32x8xf32> to vector<32x8xf32>
    %cst_216 = arith.constant dense<0.000000e+00> : vector<16x8xf32>
    %296 = tpu.matmul %1, %295, %cst_216 {dimension_numbers = #tpu.dot_dimension_numbers<[1], [0], [0], [1], [0, 0, 1, 1], [], []>} : vector<16x32xf32>, vector<32x8xf32>, vector<16x8xf32> -> vector<16x8xf32>
    %c1_217 = arith.constant 1 : index
    %c1_218 = arith.constant 1 : index
    %c0_219 = arith.constant 0 : index
    %c0_220 = arith.constant 0 : index
    %297 = vector.load %arg11[%c1_217, %c1_218, %c0_219, %c0_220] : memref<3x4x1x8xf32, #tpu.memory_space<vmem>>, vector<1x1x1x8xf32>
    %298 = vector.shape_cast %297 : vector<1x1x1x8xf32> to vector<1x8xf32>
    %299 = vector.broadcast %298 : vector<1x8xf32> to vector<16x8xf32>
    %300 = arith.addf %296, %299 : vector<16x8xf32>
    %c2_221 = arith.constant 2 : index
    %c1_222 = arith.constant 1 : index
    %c0_223 = arith.constant 0 : index
    %c0_224 = arith.constant 0 : index
    %301 = vector.load %arg10[%c2_221, %c1_222, %c0_223, %c0_224] : memref<3x4x32x8xf32, #tpu.memory_space<vmem>>, vector<1x1x32x8xf32>
    %302 = vector.shape_cast %301 : vector<1x1x32x8xf32> to vector<32x8xf32>
    %cst_225 = arith.constant dense<0.000000e+00> : vector<16x8xf32>
    %303 = tpu.matmul %1, %302, %cst_225 {dimension_numbers = #tpu.dot_dimension_numbers<[1], [0], [0], [1], [0, 0, 1, 1], [], []>} : vector<16x32xf32>, vector<32x8xf32>, vector<16x8xf32> -> vector<16x8xf32>
    %c2_226 = arith.constant 2 : index
    %c1_227 = arith.constant 1 : index
    %c0_228 = arith.constant 0 : index
    %c0_229 = arith.constant 0 : index
    %304 = vector.load %arg11[%c2_226, %c1_227, %c0_228, %c0_229] : memref<3x4x1x8xf32, #tpu.memory_space<vmem>>, vector<1x1x1x8xf32>
    %305 = vector.shape_cast %304 : vector<1x1x1x8xf32> to vector<1x8xf32>
    %306 = vector.broadcast %305 : vector<1x8xf32> to vector<16x8xf32>
    %307 = arith.addf %303, %306 : vector<16x8xf32>
    %cst_230 = arith.constant 0.176776692 : f32
    %308 = vector.broadcast %cst_230 : f32 to vector<16x8xf32>
    %309 = arith.mulf %293, %308 : vector<16x8xf32>
    %310 = vector.shape_cast %309 : vector<16x8xf32> to vector<2x8x8xf32>
    %311 = vector.shape_cast %300 : vector<16x8xf32> to vector<2x8x8xf32>
    %312 = vector.shape_cast %307 : vector<16x8xf32> to vector<2x8x8xf32>
    %cst_231 = arith.constant dense<0.000000e+00> : vector<2x8x8xf32>
    %313 = tpu.matmul %310, %311, %cst_231 {dimension_numbers = #tpu.dot_dimension_numbers<[2], [2], [1], [1], [0, 0, 0, 1, 1, 1], [0], [0]>} : vector<2x8x8xf32>, vector<2x8x8xf32>, vector<2x8x8xf32> -> vector<2x8x8xf32>
    %cst_232 = arith.constant dense<0xFF800000> : vector<2x8xf32>
    %314 = vector.multi_reduction <maximumf>, %313, %cst_232 [2] : vector<2x8x8xf32> to vector<2x8xf32>
    %315 = vector.shape_cast %314 : vector<2x8xf32> to vector<2x8x1xf32>
    %316 = vector.broadcast %315 : vector<2x8x1xf32> to vector<2x8x8xf32>
    %317 = arith.subf %313, %316 : vector<2x8x8xf32>
    %318 = math.exp %317 : vector<2x8x8xf32>
    %cst_233 = arith.constant dense<0.000000e+00> : vector<2x8xf32>
    %319 = vector.multi_reduction <add>, %318, %cst_233 [2] : vector<2x8x8xf32> to vector<2x8xf32>
    %320 = vector.shape_cast %319 : vector<2x8xf32> to vector<2x8x1xf32>
    %321 = tpu.reciprocal %320 {approx = true} : vector<2x8x1xf32> -> vector<2x8x1xf32>
    %322 = vector.broadcast %321 : vector<2x8x1xf32> to vector<2x8x8xf32>
    %323 = arith.mulf %318, %322 : vector<2x8x8xf32>
    %cst_234 = arith.constant dense<0.000000e+00> : vector<2x8x8xf32>
    %324 = tpu.matmul %323, %312, %cst_234 {dimension_numbers = #tpu.dot_dimension_numbers<[2], [1], [1], [2], [0, 0, 0, 1, 1, 2], [0], [0]>} : vector<2x8x8xf32>, vector<2x8x8xf32>, vector<2x8x8xf32> -> vector<2x8x8xf32>
    %325 = vector.shape_cast %324 : vector<2x8x8xf32> to vector<16x8xf32>
    %c1_235 = arith.constant 1 : index
    %c0_236 = arith.constant 0 : index
    %c0_237 = arith.constant 0 : index
    %326 = vector.load %arg12[%c1_235, %c0_236, %c0_237] : memref<4x8x32xf32, #tpu.memory_space<vmem>>, vector<1x8x32xf32>
    %327 = vector.shape_cast %326 : vector<1x8x32xf32> to vector<8x32xf32>
    %cst_238 = arith.constant dense<0.000000e+00> : vector<16x32xf32>
    %328 = tpu.matmul %325, %327, %cst_238 {dimension_numbers = #tpu.dot_dimension_numbers<[1], [0], [0], [1], [0, 0, 1, 1], [], []>} : vector<16x8xf32>, vector<8x32xf32>, vector<16x32xf32> -> vector<16x32xf32>
    %329 = arith.addf %286, %328 : vector<16x32xf32>
    %c0_239 = arith.constant 0 : index
    %c2_240 = arith.constant 2 : index
    %c0_241 = arith.constant 0 : index
    %c0_242 = arith.constant 0 : index
    %330 = vector.load %arg10[%c0_239, %c2_240, %c0_241, %c0_242] : memref<3x4x32x8xf32, #tpu.memory_space<vmem>>, vector<1x1x32x8xf32>
    %331 = vector.shape_cast %330 : vector<1x1x32x8xf32> to vector<32x8xf32>
    %cst_243 = arith.constant dense<0.000000e+00> : vector<16x8xf32>
    %332 = tpu.matmul %244, %331, %cst_243 {dimension_numbers = #tpu.dot_dimension_numbers<[1], [0], [0], [1], [0, 0, 1, 1], [], []>} : vector<16x32xf32>, vector<32x8xf32>, vector<16x8xf32> -> vector<16x8xf32>
    %c0_244 = arith.constant 0 : index
    %c2_245 = arith.constant 2 : index
    %c0_246 = arith.constant 0 : index
    %c0_247 = arith.constant 0 : index
    %333 = vector.load %arg11[%c0_244, %c2_245, %c0_246, %c0_247] : memref<3x4x1x8xf32, #tpu.memory_space<vmem>>, vector<1x1x1x8xf32>
    %334 = vector.shape_cast %333 : vector<1x1x1x8xf32> to vector<1x8xf32>
    %335 = vector.broadcast %334 : vector<1x8xf32> to vector<16x8xf32>
    %336 = arith.addf %332, %335 : vector<16x8xf32>
    %c1_248 = arith.constant 1 : index
    %c2_249 = arith.constant 2 : index
    %c0_250 = arith.constant 0 : index
    %c0_251 = arith.constant 0 : index
    %337 = vector.load %arg10[%c1_248, %c2_249, %c0_250, %c0_251] : memref<3x4x32x8xf32, #tpu.memory_space<vmem>>, vector<1x1x32x8xf32>
    %338 = vector.shape_cast %337 : vector<1x1x32x8xf32> to vector<32x8xf32>
    %cst_252 = arith.constant dense<0.000000e+00> : vector<16x8xf32>
    %339 = tpu.matmul %1, %338, %cst_252 {dimension_numbers = #tpu.dot_dimension_numbers<[1], [0], [0], [1], [0, 0, 1, 1], [], []>} : vector<16x32xf32>, vector<32x8xf32>, vector<16x8xf32> -> vector<16x8xf32>
    %c1_253 = arith.constant 1 : index
    %c2_254 = arith.constant 2 : index
    %c0_255 = arith.constant 0 : index
    %c0_256 = arith.constant 0 : index
    %340 = vector.load %arg11[%c1_253, %c2_254, %c0_255, %c0_256] : memref<3x4x1x8xf32, #tpu.memory_space<vmem>>, vector<1x1x1x8xf32>
    %341 = vector.shape_cast %340 : vector<1x1x1x8xf32> to vector<1x8xf32>
    %342 = vector.broadcast %341 : vector<1x8xf32> to vector<16x8xf32>
    %343 = arith.addf %339, %342 : vector<16x8xf32>
    %c2_257 = arith.constant 2 : index
    %c2_258 = arith.constant 2 : index
    %c0_259 = arith.constant 0 : index
    %c0_260 = arith.constant 0 : index
    %344 = vector.load %arg10[%c2_257, %c2_258, %c0_259, %c0_260] : memref<3x4x32x8xf32, #tpu.memory_space<vmem>>, vector<1x1x32x8xf32>
    %345 = vector.shape_cast %344 : vector<1x1x32x8xf32> to vector<32x8xf32>
    %cst_261 = arith.constant dense<0.000000e+00> : vector<16x8xf32>
    %346 = tpu.matmul %1, %345, %cst_261 {dimension_numbers = #tpu.dot_dimension_numbers<[1], [0], [0], [1], [0, 0, 1, 1], [], []>} : vector<16x32xf32>, vector<32x8xf32>, vector<16x8xf32> -> vector<16x8xf32>
    %c2_262 = arith.constant 2 : index
    %c2_263 = arith.constant 2 : index
    %c0_264 = arith.constant 0 : index
    %c0_265 = arith.constant 0 : index
    %347 = vector.load %arg11[%c2_262, %c2_263, %c0_264, %c0_265] : memref<3x4x1x8xf32, #tpu.memory_space<vmem>>, vector<1x1x1x8xf32>
    %348 = vector.shape_cast %347 : vector<1x1x1x8xf32> to vector<1x8xf32>
    %349 = vector.broadcast %348 : vector<1x8xf32> to vector<16x8xf32>
    %350 = arith.addf %346, %349 : vector<16x8xf32>
    %cst_266 = arith.constant 0.176776692 : f32
    %351 = vector.broadcast %cst_266 : f32 to vector<16x8xf32>
    %352 = arith.mulf %336, %351 : vector<16x8xf32>
    %353 = vector.shape_cast %352 : vector<16x8xf32> to vector<2x8x8xf32>
    %354 = vector.shape_cast %343 : vector<16x8xf32> to vector<2x8x8xf32>
    %355 = vector.shape_cast %350 : vector<16x8xf32> to vector<2x8x8xf32>
    %cst_267 = arith.constant dense<0.000000e+00> : vector<2x8x8xf32>
    %356 = tpu.matmul %353, %354, %cst_267 {dimension_numbers = #tpu.dot_dimension_numbers<[2], [2], [1], [1], [0, 0, 0, 1, 1, 1], [0], [0]>} : vector<2x8x8xf32>, vector<2x8x8xf32>, vector<2x8x8xf32> -> vector<2x8x8xf32>
    %cst_268 = arith.constant dense<0xFF800000> : vector<2x8xf32>
    %357 = vector.multi_reduction <maximumf>, %356, %cst_268 [2] : vector<2x8x8xf32> to vector<2x8xf32>
    %358 = vector.shape_cast %357 : vector<2x8xf32> to vector<2x8x1xf32>
    %359 = vector.broadcast %358 : vector<2x8x1xf32> to vector<2x8x8xf32>
    %360 = arith.subf %356, %359 : vector<2x8x8xf32>
    %361 = math.exp %360 : vector<2x8x8xf32>
    %cst_269 = arith.constant dense<0.000000e+00> : vector<2x8xf32>
    %362 = vector.multi_reduction <add>, %361, %cst_269 [2] : vector<2x8x8xf32> to vector<2x8xf32>
    %363 = vector.shape_cast %362 : vector<2x8xf32> to vector<2x8x1xf32>
    %364 = tpu.reciprocal %363 {approx = true} : vector<2x8x1xf32> -> vector<2x8x1xf32>
    %365 = vector.broadcast %364 : vector<2x8x1xf32> to vector<2x8x8xf32>
    %366 = arith.mulf %361, %365 : vector<2x8x8xf32>
    %cst_270 = arith.constant dense<0.000000e+00> : vector<2x8x8xf32>
    %367 = tpu.matmul %366, %355, %cst_270 {dimension_numbers = #tpu.dot_dimension_numbers<[2], [1], [1], [2], [0, 0, 0, 1, 1, 2], [0], [0]>} : vector<2x8x8xf32>, vector<2x8x8xf32>, vector<2x8x8xf32> -> vector<2x8x8xf32>
    %368 = vector.shape_cast %367 : vector<2x8x8xf32> to vector<16x8xf32>
    %c2_271 = arith.constant 2 : index
    %c0_272 = arith.constant 0 : index
    %c0_273 = arith.constant 0 : index
    %369 = vector.load %arg12[%c2_271, %c0_272, %c0_273] : memref<4x8x32xf32, #tpu.memory_space<vmem>>, vector<1x8x32xf32>
    %370 = vector.shape_cast %369 : vector<1x8x32xf32> to vector<8x32xf32>
    %cst_274 = arith.constant dense<0.000000e+00> : vector<16x32xf32>
    %371 = tpu.matmul %368, %370, %cst_274 {dimension_numbers = #tpu.dot_dimension_numbers<[1], [0], [0], [1], [0, 0, 1, 1], [], []>} : vector<16x8xf32>, vector<8x32xf32>, vector<16x32xf32> -> vector<16x32xf32>
    %372 = arith.addf %329, %371 : vector<16x32xf32>
    %c0_275 = arith.constant 0 : index
    %c3_276 = arith.constant 3 : index
    %c0_277 = arith.constant 0 : index
    %c0_278 = arith.constant 0 : index
    %373 = vector.load %arg10[%c0_275, %c3_276, %c0_277, %c0_278] : memref<3x4x32x8xf32, #tpu.memory_space<vmem>>, vector<1x1x32x8xf32>
    %374 = vector.shape_cast %373 : vector<1x1x32x8xf32> to vector<32x8xf32>
    %cst_279 = arith.constant dense<0.000000e+00> : vector<16x8xf32>
    %375 = tpu.matmul %244, %374, %cst_279 {dimension_numbers = #tpu.dot_dimension_numbers<[1], [0], [0], [1], [0, 0, 1, 1], [], []>} : vector<16x32xf32>, vector<32x8xf32>, vector<16x8xf32> -> vector<16x8xf32>
    %c0_280 = arith.constant 0 : index
    %c3_281 = arith.constant 3 : index
    %c0_282 = arith.constant 0 : index
    %c0_283 = arith.constant 0 : index
    %376 = vector.load %arg11[%c0_280, %c3_281, %c0_282, %c0_283] : memref<3x4x1x8xf32, #tpu.memory_space<vmem>>, vector<1x1x1x8xf32>
    %377 = vector.shape_cast %376 : vector<1x1x1x8xf32> to vector<1x8xf32>
    %378 = vector.broadcast %377 : vector<1x8xf32> to vector<16x8xf32>
    %379 = arith.addf %375, %378 : vector<16x8xf32>
    %c1_284 = arith.constant 1 : index
    %c3_285 = arith.constant 3 : index
    %c0_286 = arith.constant 0 : index
    %c0_287 = arith.constant 0 : index
    %380 = vector.load %arg10[%c1_284, %c3_285, %c0_286, %c0_287] : memref<3x4x32x8xf32, #tpu.memory_space<vmem>>, vector<1x1x32x8xf32>
    %381 = vector.shape_cast %380 : vector<1x1x32x8xf32> to vector<32x8xf32>
    %cst_288 = arith.constant dense<0.000000e+00> : vector<16x8xf32>
    %382 = tpu.matmul %1, %381, %cst_288 {dimension_numbers = #tpu.dot_dimension_numbers<[1], [0], [0], [1], [0, 0, 1, 1], [], []>} : vector<16x32xf32>, vector<32x8xf32>, vector<16x8xf32> -> vector<16x8xf32>
    %c1_289 = arith.constant 1 : index
    %c3_290 = arith.constant 3 : index
    %c0_291 = arith.constant 0 : index
    %c0_292 = arith.constant 0 : index
    %383 = vector.load %arg11[%c1_289, %c3_290, %c0_291, %c0_292] : memref<3x4x1x8xf32, #tpu.memory_space<vmem>>, vector<1x1x1x8xf32>
    %384 = vector.shape_cast %383 : vector<1x1x1x8xf32> to vector<1x8xf32>
    %385 = vector.broadcast %384 : vector<1x8xf32> to vector<16x8xf32>
    %386 = arith.addf %382, %385 : vector<16x8xf32>
    %c2_293 = arith.constant 2 : index
    %c3_294 = arith.constant 3 : index
    %c0_295 = arith.constant 0 : index
    %c0_296 = arith.constant 0 : index
    %387 = vector.load %arg10[%c2_293, %c3_294, %c0_295, %c0_296] : memref<3x4x32x8xf32, #tpu.memory_space<vmem>>, vector<1x1x32x8xf32>
    %388 = vector.shape_cast %387 : vector<1x1x32x8xf32> to vector<32x8xf32>
    %cst_297 = arith.constant dense<0.000000e+00> : vector<16x8xf32>
    %389 = tpu.matmul %1, %388, %cst_297 {dimension_numbers = #tpu.dot_dimension_numbers<[1], [0], [0], [1], [0, 0, 1, 1], [], []>} : vector<16x32xf32>, vector<32x8xf32>, vector<16x8xf32> -> vector<16x8xf32>
    %c2_298 = arith.constant 2 : index
    %c3_299 = arith.constant 3 : index
    %c0_300 = arith.constant 0 : index
    %c0_301 = arith.constant 0 : index
    %390 = vector.load %arg11[%c2_298, %c3_299, %c0_300, %c0_301] : memref<3x4x1x8xf32, #tpu.memory_space<vmem>>, vector<1x1x1x8xf32>
    %391 = vector.shape_cast %390 : vector<1x1x1x8xf32> to vector<1x8xf32>
    %392 = vector.broadcast %391 : vector<1x8xf32> to vector<16x8xf32>
    %393 = arith.addf %389, %392 : vector<16x8xf32>
    %cst_302 = arith.constant 0.176776692 : f32
    %394 = vector.broadcast %cst_302 : f32 to vector<16x8xf32>
    %395 = arith.mulf %379, %394 : vector<16x8xf32>
    %396 = vector.shape_cast %395 : vector<16x8xf32> to vector<2x8x8xf32>
    %397 = vector.shape_cast %386 : vector<16x8xf32> to vector<2x8x8xf32>
    %398 = vector.shape_cast %393 : vector<16x8xf32> to vector<2x8x8xf32>
    %cst_303 = arith.constant dense<0.000000e+00> : vector<2x8x8xf32>
    %399 = tpu.matmul %396, %397, %cst_303 {dimension_numbers = #tpu.dot_dimension_numbers<[2], [2], [1], [1], [0, 0, 0, 1, 1, 1], [0], [0]>} : vector<2x8x8xf32>, vector<2x8x8xf32>, vector<2x8x8xf32> -> vector<2x8x8xf32>
    %cst_304 = arith.constant dense<0xFF800000> : vector<2x8xf32>
    %400 = vector.multi_reduction <maximumf>, %399, %cst_304 [2] : vector<2x8x8xf32> to vector<2x8xf32>
    %401 = vector.shape_cast %400 : vector<2x8xf32> to vector<2x8x1xf32>
    %402 = vector.broadcast %401 : vector<2x8x1xf32> to vector<2x8x8xf32>
    %403 = arith.subf %399, %402 : vector<2x8x8xf32>
    %404 = math.exp %403 : vector<2x8x8xf32>
    %cst_305 = arith.constant dense<0.000000e+00> : vector<2x8xf32>
    %405 = vector.multi_reduction <add>, %404, %cst_305 [2] : vector<2x8x8xf32> to vector<2x8xf32>
    %406 = vector.shape_cast %405 : vector<2x8xf32> to vector<2x8x1xf32>
    %407 = tpu.reciprocal %406 {approx = true} : vector<2x8x1xf32> -> vector<2x8x1xf32>
    %408 = vector.broadcast %407 : vector<2x8x1xf32> to vector<2x8x8xf32>
    %409 = arith.mulf %404, %408 : vector<2x8x8xf32>
    %cst_306 = arith.constant dense<0.000000e+00> : vector<2x8x8xf32>
    %410 = tpu.matmul %409, %398, %cst_306 {dimension_numbers = #tpu.dot_dimension_numbers<[2], [1], [1], [2], [0, 0, 0, 1, 1, 2], [0], [0]>} : vector<2x8x8xf32>, vector<2x8x8xf32>, vector<2x8x8xf32> -> vector<2x8x8xf32>
    %411 = vector.shape_cast %410 : vector<2x8x8xf32> to vector<16x8xf32>
    %c3_307 = arith.constant 3 : index
    %c0_308 = arith.constant 0 : index
    %c0_309 = arith.constant 0 : index
    %412 = vector.load %arg12[%c3_307, %c0_308, %c0_309] : memref<4x8x32xf32, #tpu.memory_space<vmem>>, vector<1x8x32xf32>
    %413 = vector.shape_cast %412 : vector<1x8x32xf32> to vector<8x32xf32>
    %cst_310 = arith.constant dense<0.000000e+00> : vector<16x32xf32>
    %414 = tpu.matmul %411, %413, %cst_310 {dimension_numbers = #tpu.dot_dimension_numbers<[1], [0], [0], [1], [0, 0, 1, 1], [], []>} : vector<16x8xf32>, vector<8x32xf32>, vector<16x32xf32> -> vector<16x32xf32>
    %415 = arith.addf %372, %414 : vector<16x32xf32>
    %c0_311 = arith.constant 0 : index
    %c0_312 = arith.constant 0 : index
    %416 = vector.load %arg13[%c0_311, %c0_312] : memref<1x32xf32, #tpu.memory_space<vmem>>, vector<1x32xf32>
    %417 = vector.broadcast %416 : vector<1x32xf32> to vector<16x32xf32>
    %418 = arith.addf %415, %417 : vector<16x32xf32>
    %419 = arith.addf %220, %418 : vector<16x32xf32>
    %c0_313 = arith.constant 0 : index
    %c0_314 = arith.constant 0 : index
    %420 = vector.load %arg14[%c0_313, %c0_314] : memref<1x32xf32, #tpu.memory_space<vmem>>, vector<1x32xf32>
    %c0_315 = arith.constant 0 : index
    %c0_316 = arith.constant 0 : index
    %421 = vector.load %arg15[%c0_315, %c0_316] : memref<1x32xf32, #tpu.memory_space<vmem>>, vector<1x32xf32>
    %cst_317 = arith.constant dense<0.000000e+00> : vector<16xf32>
    %422 = vector.multi_reduction <add>, %419, %cst_317 [1] : vector<16x32xf32> to vector<16xf32>
    %423 = vector.shape_cast %422 : vector<16xf32> to vector<16x1xf32>
    %cst_318 = arith.constant 3.200000e+01 : f32
    %424 = vector.broadcast %cst_318 : f32 to vector<16x1xf32>
    %425 = arith.divf %423, %424 : vector<16x1xf32>
    %426 = vector.broadcast %425 : vector<16x1xf32> to vector<16x32xf32>
    %427 = arith.subf %419, %426 : vector<16x32xf32>
    %428 = arith.mulf %427, %427 : vector<16x32xf32>
    %cst_319 = arith.constant dense<0.000000e+00> : vector<16xf32>
    %429 = vector.multi_reduction <add>, %428, %cst_319 [1] : vector<16x32xf32> to vector<16xf32>
    %430 = vector.shape_cast %429 : vector<16xf32> to vector<16x1xf32>
    %cst_320 = arith.constant 3.200000e+01 : f32
    %431 = vector.broadcast %cst_320 : f32 to vector<16x1xf32>
    %432 = arith.divf %430, %431 : vector<16x1xf32>
    %433 = vector.broadcast %425 : vector<16x1xf32> to vector<16x32xf32>
    %434 = arith.subf %419, %433 : vector<16x32xf32>
    %cst_321 = arith.constant 9.99999974E-6 : f32
    %435 = vector.broadcast %cst_321 : f32 to vector<16x1xf32>
    %436 = arith.addf %432, %435 : vector<16x1xf32>
    %437 = math.rsqrt %436 : vector<16x1xf32>
    %438 = vector.broadcast %437 : vector<16x1xf32> to vector<16x32xf32>
    %439 = arith.mulf %434, %438 : vector<16x32xf32>
    %440 = vector.broadcast %420 : vector<1x32xf32> to vector<16x32xf32>
    %441 = arith.mulf %439, %440 : vector<16x32xf32>
    %442 = vector.broadcast %421 : vector<1x32xf32> to vector<16x32xf32>
    %443 = arith.addf %441, %442 : vector<16x32xf32>
    %c0_322 = arith.constant 0 : index
    %c0_323 = arith.constant 0 : index
    %444 = vector.load %arg16[%c0_322, %c0_323] : memref<32x64xf32, #tpu.memory_space<vmem>>, vector<32x64xf32>
    %c0_324 = arith.constant 0 : index
    %c0_325 = arith.constant 0 : index
    %445 = vector.load %arg17[%c0_324, %c0_325] : memref<1x64xf32, #tpu.memory_space<vmem>>, vector<1x64xf32>
    %c0_326 = arith.constant 0 : index
    %c0_327 = arith.constant 0 : index
    %446 = vector.load %arg18[%c0_326, %c0_327] : memref<64x32xf32, #tpu.memory_space<vmem>>, vector<64x32xf32>
    %c0_328 = arith.constant 0 : index
    %c0_329 = arith.constant 0 : index
    %447 = vector.load %arg19[%c0_328, %c0_329] : memref<1x32xf32, #tpu.memory_space<vmem>>, vector<1x32xf32>
    %cst_330 = arith.constant dense<0.000000e+00> : vector<16x64xf32>
    %448 = tpu.matmul %443, %444, %cst_330 {dimension_numbers = #tpu.dot_dimension_numbers<[1], [0], [0], [1], [0, 0, 1, 1], [], []>} : vector<16x32xf32>, vector<32x64xf32>, vector<16x64xf32> -> vector<16x64xf32>
    %449 = vector.broadcast %445 : vector<1x64xf32> to vector<16x64xf32>
    %450 = arith.addf %448, %449 : vector<16x64xf32>
    %cst_331 = arith.constant 0.000000e+00 : f32
    %451 = vector.broadcast %cst_331 : f32 to vector<16x64xf32>
    %452 = arith.maximumf %450, %451 : vector<16x64xf32>
    %cst_332 = arith.constant dense<0.000000e+00> : vector<16x32xf32>
    %453 = tpu.matmul %452, %446, %cst_332 {dimension_numbers = #tpu.dot_dimension_numbers<[1], [0], [0], [1], [0, 0, 1, 1], [], []>} : vector<16x64xf32>, vector<64x32xf32>, vector<16x32xf32> -> vector<16x32xf32>
    %454 = vector.broadcast %447 : vector<1x32xf32> to vector<16x32xf32>
    %455 = arith.addf %453, %454 : vector<16x32xf32>
    %456 = arith.addf %419, %455 : vector<16x32xf32>
    %c0_333 = arith.constant 0 : index
    %c0_334 = arith.constant 0 : index
    %457 = vector.load %arg20[%c0_333, %c0_334] : memref<16x32xf32, #tpu.memory_space<vmem>>, vector<16x32xf32>
    tpu.vector_store %arg20[%c0_333, %c0_334], %456 {strides = array<i32>} : memref<16x32xf32, #tpu.memory_space<vmem>>, vector<16x32xf32>,
    return
  }
}

</mosaic_0001>

<bundles_post_ra>
// kernel: transformer_forward.8
= control target key start
LH: loop header
LB: loop body
LE: loop exit
PB: predicated region body
PF: predicated region fallthrough
CT: control target
= control target key end

     0   :  { %vm18_vm0 = vcmask 261120   ;;  %s118_s0 = inlined_call_operand.vmem [shape: f32[16,32], index: 0, kind: input, shape index: {}]   ;;  %s119_s1 = inlined_call_operand.vmem [shape: f32[1,32], index: 1, kind: input, shape index: {}]   ;;  %s120_s2 = inlined_call_operand.vmem [shape: f32[1,32], index: 2, kind: input, shape index: {}]   ;;  %s121_s3 = inlined_call_operand.vmem [shape: f32[16,32], index: 3, kind: output, shape index: {}]  }
   0x1   :  { %v14_v0 = vld [vmem:[%s118_s0] sm:$0xff]  ;;  %v15_v1 = vld [vmem:[%s118_s0 + $0x8] sm:$0xff] }
   0x2   :  { %v19_v2 = vsel %vm18_vm0, %v14_v0, 0.0  ;;  %v22_v3 = vsel %vm18_vm0, %v15_v1, 0.0  ;;  %v68_v21 = vld [vmem:[%s119_s1] ss:$0 sm:$0xff] }
   0x3   :  { %20 = vadd.xlane.f32.xlu0 %v19_v2  ;;  %v69_v23 = vld [vmem:[%s120_s2] ss:$0 sm:$0xff] }
   0x7   :  { %23 = vadd.xlane.f32.xlu0 %v22_v3 }
  0x90   :  { %v21_v4 = vpop.xlane.xlu0 %20 }
  0x91   :  { %v26_v5 = vmul.f32 0.03125, %v21_v4 }
  0x93   :  { %v28_v6 = vsub.f32 %v14_v0, %v26_v5 }
  0x94   :  { %v24_v7 = vpop.xlane.xlu0 %23 }
  0x95   :  { %v27_v8 = vmul.f32 0.03125, %v24_v7  ;;  %v30_v9 = vmul.f32 %v28_v6, %v28_v6 }
  0x97   :  { %v29_v10 = vsub.f32 %v15_v1, %v27_v8  ;;  %v32_v11 = vsel %vm18_vm0, %v30_v9, 0.0 }
  0x98   :  { %33 = vadd.xlane.f32.xlu1 %v32_v11 }
  0x99   :  { %v31_v12 = vmul.f32 %v29_v10, %v29_v10 }
  0x9b   :  { %v35_v13 = vsel %vm18_vm0, %v31_v12, 0.0 }
  0x9c   :  { %36 = vadd.xlane.f32.xlu1 %v35_v13 }
 0x125   :  { %v34_v14 = vpop.xlane.xlu1 %33 }
 0x126   :  { %v38_v15 = vmul.f32 0.03125, %v34_v14 }
 0x128   :  { %v40_v16 = vadd.f32 1e-05, %v38_v15 }
 0x129   :  { %v37_v17 = vpop.xlane.xlu1 %36 }
 0x12a   :  { %70 = vrsqrt.f32 %v40_v16  ;;  %v39_v18 = vmul.f32 0.03125, %v37_v17 }
 0x12c   :  { %v41_v19 = vadd.f32 1e-05, %v39_v18 }
 0x12e   :  { %72 = vrsqrt.f32 %v41_v19 }
 0x134   :  { %v71_v20 = vpop.eup %70 }
 0x135   :  { %v44_v22 = vmul.f32 %v71_v20, %v28_v6 }
 0x137   :  { %v52_v24 = vmul.f32 %v68_v21, %v44_v22 }
 0x138   :  { %v73_v25 = vpop.eup %72 }
 0x139   :  { %v60_v26 = vadd.f32 %v69_v23, %v52_v24  ;;  %v45_v27 = vmul.f32 %v73_v25, %v29_v10 }
 0x13b   :  { %62 = vst.msk [vmem:[%s121_s3] sm:$0xff] %vm18_vm0, %v60_v26  ;;  %v53_v28 = vmul.f32 %v68_v21, %v45_v27 }
 0x13d   :  { %v61_v29 = vadd.f32 %v69_v23, %v53_v28 }
 0x13f   :  { %63 = vst.msk [vmem:[%s121_s3 + $0x8] sm:$0xff] %vm18_vm0, %v61_v29 }

// kernel: transformer_forward.11
= control target key start
LH: loop header
LB: loop body
LE: loop exit
PB: predicated region body
PF: predicated region fallthrough
CT: control target
= control target key end

     0   :  { %vm30_vm0 = vcmask 261120   ;;  %vm286_vm2 = vcmask 523264   ;;  %s559_s0 = inlined_call_operand.vmem [shape: f32[16,32], index: 0, kind: input, shape index: {}]   ;;  %s560_s3 = inlined_call_operand.vmem [shape: f32[32,32], index: 3, kind: input, shape index: {}]   ;;  %s561_s5 = inlined_call_operand.vmem [shape: f32[64,32], index: 5, kind: input, shape index: {}]   ;;  %s562_s1 = inlined_call_operand.vmem [shape: f32[1,32], index: 1, kind: input, shape index: {}]   ;;  %s563_s2 = inlined_call_operand.vmem [shape: f32[1,32], index: 2, kind: input, shape index: {}]   ;;  %s564_s4 = inlined_call_operand.vmem [shape: f32[1,32], index: 4, kind: input, shape index: {}]   ;;  %s565_s6 = inlined_call_operand.vmem [shape: f32[1,64], index: 6, kind: input, shape index: {}]   ;;  %s566_s7 = inlined_call_operand.vmem [shape: f32[16,64], index: 7, kind: output, shape index: {}]  }
   0x1   :  { %v26_v0 = vld [vmem:[%s559_s0] sm:$0xff]  ;;  %v27_v1 = vld [vmem:[%s559_s0 + $0x8] sm:$0xff]  ;;  %v76_v16 = vld [vmem:[%s560_s3 + $0x10] sm:$0xff] }
   0x2   :  { %v31_v2 = vsel %vm30_vm0, %v26_v0, 0.0  ;;  %v34_v3 = vsel %vm30_vm0, %v27_v1, 0.0  ;;  %v74_v14 = vld [vmem:[%s560_s3] sm:$0xff]  ;;  %v75_v15 = vld [vmem:[%s560_s3 + $0x8] sm:$0xff]  ;;  %v77_v18 = vld [vmem:[%s560_s3 + $0x18] sm:$0xff] }
   0x3   :  { %32 = vadd.xlane.f32.xlu0 %v31_v2  ;;  %v379_v17 = vpack.c.bf16 %v75_v15, %v74_v14  ;;  %v383_v19 = vpack.c.bf16 %v77_v18, %v76_v16  ;;  %vm487_vm1 = vmpackc.low %vm30_vm0, %vm30_vm0  ;;  %v166_v21 = vld [vmem:[%s561_s5] sm:$0xff]  ;;  %v167_v22 = vld [vmem:[%s561_s5 + $0x8] sm:$0xff] }
   0x4   :  { %v168_v23 = vld [vmem:[%s561_s5 + $0x10] sm:$0xff]  ;;  %v387_v24 = vpack.c.bf16 %v167_v22, %v166_v21  ;;  %v169_v25 = vld [vmem:[%s561_s5 + $0x18] sm:$0xff]  ;;  %v170_v27 = vld [vmem:[%s561_s5 + $0x20] sm:$0xff] }
   0x5   :  { %380 = vmatprep.subr.bf16.mxu0 %v379_v17  ;;  %v393_v26 = vpack.c.bf16 %v169_v25, %v168_v23  ;;  %v171_v28 = vld [vmem:[%s561_s5 + $0x28] sm:$0xff]  ;;  %v172_v30 = vld [vmem:[%s561_s5 + $0x30] sm:$0xff]  ;;  %v173_v31 = vld [vmem:[%s561_s5 + $0x38] sm:$0xff] }
   0x6   :  { %382 = vmatpush3.bf16.msra.mxu0 %v379_v17  ;;  %389 = vmatprep.subr.msk.bf16.mxu1 %vm487_vm1, %v387_v24  ;;  %v399_v29 = vpack.c.bf16 %v171_v28, %v170_v27  ;;  %v405_v32 = vpack.c.bf16 %v173_v31, %v172_v30  ;;  %v317_v40 = vld [vmem:[%s562_s1] ss:$0 sm:$0xff] }
   0x7   :  { %35 = vadd.xlane.f32.xlu0 %v34_v3  ;;  %384 = vmatprep.subr.bf16.mxu0 %v383_v19  ;;  %v318_v42 = vld [vmem:[%s563_s2] ss:$0 sm:$0xff] }
   0x8   :  { %392 = vmatpush3.bf16.xpose.msk.msra.mxu1 %vm487_vm1, %v387_v24  ;;  %v319_v49 = vld [vmem:[%s564_s4] ss:$0 sm:$0xff] }
   0x9   :  { %395 = vmatprep.subr.msk.bf16.mxu1 %vm487_vm1, %v393_v26  ;;  %v322_v54 = vld [vmem:[%s565_s6] ss:$0 sm:$0xff] }
   0xa   :  { %386 = vmatpush3.bf16.msra.mxu0 %v383_v19 }
  0x10   :  { %398 = vmatpush3.bf16.xpose.msk.msra.mxu1 %vm487_vm1, %v393_v26 }
  0x11   :  { %401 = vmatprep.subr.msk.bf16.mxu1 %vm487_vm1, %v399_v29 }
  0x18   :  { %404 = vmatpush3.bf16.xpose.msk.msra.mxu1 %vm487_vm1, %v399_v29 }
  0x19   :  { %407 = vmatprep.subr.msk.bf16.mxu1 %vm487_vm1, %v405_v32 }
  0x20   :  { %410 = vmatpush3.bf16.xpose.msk.msra.mxu1 %vm487_vm1, %v405_v32 }
  0x90   :  { %v33_v4 = vpop.xlane.xlu0 %32 }
  0x91   :  { %v38_v5 = vmul.f32 0.03125, %v33_v4 }
  0x93   :  { %v40_v6 = vsub.f32 %v26_v0, %v38_v5 }
  0x94   :  { %v36_v7 = vpop.xlane.xlu0 %35 }
  0x95   :  { %v39_v8 = vmul.f32 0.03125, %v36_v7  ;;  %v42_v9 = vmul.f32 %v40_v6, %v40_v6 }
  0x97   :  { %v41_v10 = vsub.f32 %v27_v1, %v39_v8  ;;  %v44_v11 = vsel %vm30_vm0, %v42_v9, 0.0 }
  0x98   :  { %45 = vadd.xlane.f32.xlu1 %v44_v11 }
  0x99   :  { %v43_v12 = vmul.f32 %v41_v10, %v41_v10 }
  0x9b   :  { %v47_v13 = vsel %vm30_vm0, %v43_v12, 0.0 }
  0x9c   :  { %48 = vadd.xlane.f32.xlu1 %v47_v13 }
 0x125   :  { %v46_v33 = vpop.xlane.xlu1 %45 }
 0x126   :  { %v50_v34 = vmul.f32 0.03125, %v46_v33 }
 0x128   :  { %v52_v35 = vadd.f32 1e-05, %v50_v34 }
 0x129   :  { %v49_v36 = vpop.xlane.xlu1 %48 }
 0x12a   :  { %411 = vrsqrt.f32 %v52_v35  ;;  %v51_v37 = vmul.f32 0.03125, %v49_v36 }
 0x12c   :  { %v53_v38 = vadd.f32 1e-05, %v51_v37 }
 0x12e   :  { %413 = vrsqrt.f32 %v53_v38 }
 0x134   :  { %v412_v39 = vpop.eup %411 }
 0x135   :  { %v56_v41 = vmul.f32 %v412_v39, %v40_v6 }
 0x137   :  { %v64_v43 = vmul.f32 %v317_v40, %v56_v41 }
 0x138   :  { %v414_v44 = vpop.eup %413 }
 0x139   :  { %v57_v45 = vmul.f32 %v414_v44, %v41_v10  ;;  %v72_v46 = vadd.f32 %v318_v42, %v64_v43 }
 0x13b   :  { %v65_v47 = vmul.f32 %v317_v40, %v57_v45  ;;  %357 = vmatprep.mubr.msk.f32.mxu0 %vm30_vm0, %v72_v46 }
 0x13d   :  { %v73_v48 = vadd.f32 %v318_v42, %v65_v47 }
 0x13f   :  { %358 = vmatmul.mubr.msk.f32.vlgmr.msra.gmra.mrb[0].mxu0 %vm30_vm0, %v73_v48 }
 0x212   :  { %v359_v50 = vpop.f32.mrb[0].mxu0 }
 0x213   :  { %v157_v51 = vpop.f32.mrb[1].mxu0  ;;  %v163_v53 = vadd.f32 %v359_v50, %v319_v49 }
 0x214   :  { %v158_v52 = vadd.f32 %v319_v49, %v157_v51 }
 0x216   :  { %376 = vmatprep.mubr.msk.f32.mxu1 %vm30_vm0, %v158_v52 }
 0x217   :  { %377 = vmatmul.mubr.msk.f32.vlgmr.msra.gmra.mrb[0].mxu1 %vm30_vm0, %v163_v53 }
 0x2ea   :  { %v378_v55 = vpop.f32.mrb[0].mxu1 }
 0x2eb   :  { %v283_v56 = vadd.f32 %v378_v55, %v322_v54  ;;  %v277_v57 = vpop.f32.mrb[1].mxu1 }
 0x2ec   :  { %v278_v58 = vadd.f32 %v322_v54, %v277_v57 }
 0x2ed   :  { %v290_v59 = vsel %vm286_vm2, %v283_v56, -inf }
 0x2ee   :  { %291 = vmax.xlane.f32.xlu1 %v290_v59  ;;  %v287_v60 = vsel %vm286_vm2, %v278_v58, -inf }
 0x2ef   :  { %288 = vmax.xlane.f32.xlu0 %v287_v60 }
 0x37b   :  { %v292_v61 = vpop.xlane.xlu1 %291 }
 0x37c   :  { %v294_v62 = vsub.f32 %v283_v56, %v292_v61  ;;  %v289_v63 = vpop.xlane.xlu0 %288 }
 0x37d   :  { %v293_v0 = vsub.f32 %v278_v58, %v289_v63 }
 0x37e   :  { %v297_v1 = vmul.f32 1.442695, %v294_v62 }
 0x37f   :  { %v295_v2 = vmul.f32 1.442695, %v293_v0 }
 0x380   :  { %415 = vpow2.f32 %v297_v1 }
 0x381   :  { %417 = vpow2.f32 %v295_v2 }
 0x38a   :  { %v416_v3 = vpop.eup %415 }
 0x38b   :  { %v418_v4 = vpop.eup %417  ;;  %v302_v5 = vsel %vm286_vm2, %v416_v3, 0.0 }
 0x38c   :  { %303 = vadd.xlane.f32.xlu1 %v302_v5  ;;  %v299_v6 = vsel %vm286_vm2, %v418_v4, 0.0 }
 0x38d   :  { %300 = vadd.xlane.f32.xlu0 %v299_v6 }
 0x419   :  { %v304_v7 = vpop.xlane.xlu1 %303 }
 0x41a   :  { %419 = vlog2.f32 %v304_v7  ;;  %v301_v8 = vpop.xlane.xlu0 %300 }
 0x41b   :  { %421 = vlog2.f32 %v301_v8 }
 0x424   :  { %v420_v9 = vpop.eup %419 }
 0x425   :  { %v422_v10 = vpop.eup %421  ;;  %v308_v11 = vmul.f32 0.6931472, %v420_v9 }
 0x426   :  { %v306_v12 = vmul.f32 0.6931472, %v422_v10 }
 0x427   :  { %v310_v13 = vsub.f32 %v294_v62, %v308_v11 }
 0x428   :  { %v309_v14 = vsub.f32 %v293_v0, %v306_v12 }
 0x429   :  { %312 = vst.msk [vmem:[%s566_s7 + $0x8] sm:$0xff] %vm286_vm2, %v310_v13 }
 0x42a   :  { %311 = vst.msk [vmem:[%s566_s7] sm:$0xff] %vm286_vm2, %v309_v14 }

// kernel: transformer_forward.6
= control target key start
LH: loop header
LB: loop body
LE: loop exit
PB: predicated region body
PF: predicated region fallthrough
CT: control target
= control target key end

     0   :  { %vm48_vm0 = vcmask 261120   ;;  %v3729_v48 = vmov 0.0   ;;  %vm3730_vm1 = vmmov 0   ;;  %vm362_vm2 = vcmask 64512   ;;  %s4248_s0 = inlined_call_operand.vmem [shape: f32[16,32], index: 0, kind: input, shape index: {}]   ;;  %s4249_s3 = inlined_call_operand.vmem [shape: f32[3,4,32,8], index: 3, kind: input, shape index: {}]   ;;  %s4250_s1 = inlined_call_operand.vmem [shape: f32[1,32], index: 1, kind: input, shape index: {}]   ;;  %s4251_s2 = inlined_call_operand.vmem [shape: f32[1,32], index: 2, kind: input, shape index: {}]   ;;  %s4252_s4 = inlined_call_operand.vmem [shape: f32[3,4,1,8], index: 4, kind: input, shape index: {}]   ;;  %s4253_s5 = inlined_call_operand.vmem [shape: f32[4,8,32], index: 5, kind: input, shape index: {}]   ;;  %s4254_s6 = inlined_call_operand.vmem [shape: f32[1,32], index: 6, kind: input, shape index: {}]   ;;  %s4255_s9 = inlined_call_operand.vmem [shape: f32[32,64], index: 9, kind: input, shape index: {}]   ;;  %s4256_s11 = inlined_call_operand.vmem [shape: f32[64,32], index: 11, kind: input, shape index: {}]   ;;  %s4257_s7 = inlined_call_operand.vmem [shape: f32[1,32], index: 7, kind: input, shape index: {}]   ;;  %s4258_s8 = inlined_call_operand.vmem [shape: f32[1,32], index: 8, kind: input, shape index: {}]   ;;  %s4259_s10 = inlined_call_operand.vmem [shape: f32[1,64], index: 10, kind: input, shape index: {}]   ;;  %s4260_s12 = inlined_call_operand.vmem [shape: f32[1,32], index: 12, kind: input, shape index: {}]   ;;  %s4261_s13 = inlined_call_operand.vmem [shape: f32[16,32], index: 13, kind: output, shape index: {}]  }
   0x1   :  { %v3804_v0 = vld [vmem:[%s4248_s0] sm:$0xff]  ;;  %v3809_v1 = vld [vmem:[%s4248_s0 + $0x8] sm:$0xff]  ;;  %v94_v20 = vld [vmem:[%s4249_s3 + $0x10] sm:$0xff]  ;;  %vm2940_vm3 = vcmask 523264  }
   0x2   :  { %v49_v2 = vsel %vm48_vm0, %v3804_v0, 0.0  ;;  %v52_v3 = vsel %vm48_vm0, %v3809_v1, 0.0  ;;  %v92_v14 = vld [vmem:[%s4249_s3] sm:$0xff]  ;;  %v93_v15 = vld [vmem:[%s4249_s3 + $0x8] sm:$0xff]  ;;  %v95_v21 = vld [vmem:[%s4249_s3 + $0x18] sm:$0xff] }
   0x3   :  { %50 = vadd.xlane.f32.xlu0 %v49_v2  ;;  %v3561_v16 = vpack.c.bf16 %v93_v15, %v92_v14  ;;  %v3043_v17 = vld [vmem:[%s4249_s3 + $0x100] sm:$0xff]  ;;  %v3044_v18 = vld [vmem:[%s4249_s3 + $0x108] sm:$0xff]  ;;  %v3565_v22 = vpack.c.bf16 %v95_v21, %v94_v20  ;;  %v3045_v23 = vld [vmem:[%s4249_s3 + $0x110] sm:$0xff] }
   0x4   :  { %v3577_v19 = vpack.c.bf16 %v3044_v18, %v3043_v17  ;;  %v3046_v24 = vld [vmem:[%s4249_s3 + $0x118] sm:$0xff]  ;;  %v3035_v26 = vld [vmem:[%s4249_s3 + $0x80] sm:$0xff]  ;;  %v3036_v27 = vld [vmem:[%s4249_s3 + $0x88] sm:$0xff] }
   0x5   :  { %3562 = vmatprep.subr.bf16.mxu1 %v3561_v16  ;;  %v3581_v25 = vpack.c.bf16 %v3046_v24, %v3045_v23  ;;  %v3569_v28 = vpack.c.bf16 %v3036_v27, %v3035_v26  ;;  %v3030_v36 = vld [vmem:[%s4250_s1] ss:$0 sm:$0xff]  ;;  %v3037_v43 = vld [vmem:[%s4249_s3 + $0x90] sm:$0xff]  ;;  %v3038_v44 = vld [vmem:[%s4249_s3 + $0x98] sm:$0xff] }
   0x6   :  { %3564 = vmatpush3.bf16.msra.mxu1 %v3561_v16  ;;  %3578 = vmatprep.subr.bf16.mxu0 %v3577_v19  ;;  %v3031_v38 = vld [vmem:[%s4251_s2] ss:$0 sm:$0xff]  ;;  %v3573_v47 = vpack.c.bf16 %v3038_v44, %v3037_v43  ;;  %v3048_v49 = vld [vmem:[%s4252_s4 + $0x8] ss:$0 sm:$0xff]  ;;  %v3040_v56 = vld [vmem:[%s4252_s4 + $0x4] ss:$0 sm:$0xff] }
   0x7   :  { %53 = vadd.xlane.f32.xlu0 %v52_v3  ;;  %3580 = vmatpush3.bf16.msra.mxu0 %v3577_v19  ;;  %v3032_v55 = vld [vmem:[%s4252_s4] ss:$0 sm:$0xff]  ;;  %v3058_v21 = vld [vmem:[%s4249_s3 + $0x28] sm:$0xff]  ;;  %v3076_v43 = vld [vmem:[%s4249_s3 + $0x138] sm:$0xff] }
   0x8   :  { %3566 = vmatprep.subr.bf16.mxu1 %v3565_v22  ;;  %3582 = vmatprep.subr.bf16.mxu0 %v3581_v25  ;;  %v3057_v20 = vld [vmem:[%s4249_s3 + $0x20] sm:$0xff]  ;;  %v3066_v24 = vld [vmem:[%s4249_s3 + $0xa8] sm:$0xff] }
   0x9   :  { %v3065_v23 = vld [vmem:[%s4249_s3 + $0xa0] sm:$0xff] }
   0xa   :  { %3568 = vmatpush3.bf16.msra.mxu1 %v3565_v22  ;;  %v3585_v22 = vpack.c.bf16 %v3058_v21, %v3057_v20 }
   0xb   :  { %3584 = vmatpush3.bf16.msra.mxu0 %v3581_v25  ;;  %3570 = vmatprep.subr.bf16.mxu1 %v3569_v28  ;;  %v3593_v25 = vpack.c.bf16 %v3066_v24, %v3065_v23  ;;  %v3093_v23 = vld [vmem:[%s4249_s3 + $0x48] sm:$0xff] }
   0xc   :  { %3342 = vmatprep.subr.mxu0 %v3729_v48 }
  0x90   :  { %v51_v4 = vpop.xlane.xlu0 %50 }
  0x91   :  { %v56_v5 = vmul.f32 0.03125, %v51_v4 }
  0x93   :  { %v58_v6 = vsub.f32 %v3804_v0, %v56_v5 }
  0x94   :  { %v54_v7 = vpop.xlane.xlu0 %53 }
  0x95   :  { %v57_v8 = vmul.f32 0.03125, %v54_v7  ;;  %v60_v9 = vmul.f32 %v58_v6, %v58_v6 }
  0x97   :  { %v59_v10 = vsub.f32 %v3809_v1, %v57_v8  ;;  %v62_v11 = vsel %vm48_vm0, %v60_v9, 0.0 }
  0x98   :  { %63 = vadd.xlane.f32.xlu1 %v62_v11 }
  0x99   :  { %v61_v12 = vmul.f32 %v59_v10, %v59_v10 }
  0x9b   :  { %v65_v13 = vsel %vm48_vm0, %v61_v12, 0.0 }
  0x9c   :  { %66 = vadd.xlane.f32.xlu1 %v65_v13 }
 0x125   :  { %v64_v29 = vpop.xlane.xlu1 %63 }
 0x126   :  { %v68_v30 = vmul.f32 0.03125, %v64_v29  ;;  %v3060_v29 = vld [vmem:[%s4249_s3 + $0x38] sm:$0xff] }
 0x128   :  { %v70_v31 = vadd.f32 1e-05, %v68_v30 }
 0x129   :  { %v67_v32 = vpop.xlane.xlu1 %66 }
 0x12a   :  { %3689 = vrsqrt.f32 %v70_v31  ;;  %v69_v33 = vmul.f32 0.03125, %v67_v32 }
 0x12c   :  { %v71_v34 = vadd.f32 1e-05, %v69_v33  ;;  %v3067_v33 = vld [vmem:[%s4249_s3 + $0xb0] sm:$0xff] }
 0x12e   :  { %3691 = vrsqrt.f32 %v71_v34  ;;  %v3068_v34 = vld [vmem:[%s4249_s3 + $0xb8] sm:$0xff] }
 0x134   :  { %v3690_v35 = vpop.eup %3689 }
 0x135   :  { %v74_v37 = vmul.f32 %v3690_v35, %v58_v6  ;;  %v3073_v35 = vld [vmem:[%s4249_s3 + $0x120] sm:$0xff] }
 0x137   :  { %v82_v39 = vmul.f32 %v3030_v36, %v74_v37 }
 0x138   :  { %v3692_v40 = vpop.eup %3691 }
 0x139   :  { %v3855_v41 = vadd.f32 %v3031_v38, %v82_v39  ;;  %v75_v42 = vmul.f32 %v3692_v40, %v59_v10  ;;  %v3597_v39 = vpack.c.bf16 %v3068_v34, %v3067_v33  ;;  %v3108_v34 = vld [vmem:[%s4249_s3 + $0x140] sm:$0xff] }
 0x13b   :  { %v83_v45 = vmul.f32 %v3030_v36, %v75_v42  ;;  %3307 = vmatprep.mubr.msk.f32.mxu1 %vm48_vm0, %v3855_v41  ;;  %3329 = vmatprep.mubr.msk.f32.mxu0 %vm48_vm0, %v3855_v41  ;;  %v3074_v36 = vld [vmem:[%s4249_s3 + $0x128] sm:$0xff]  ;;  %v3075_v42 = vld [vmem:[%s4249_s3 + $0x130] sm:$0xff] }
 0x13c   :  { %v3601_v40 = vpack.c.bf16 %v3074_v36, %v3073_v35  ;;  %v3605_v44 = vpack.c.bf16 %v3076_v43, %v3075_v42  ;;  %v3109_v35 = vld [vmem:[%s4249_s3 + $0x148] sm:$0xff]  ;;  %v683_v42 = vld [vmem:[%s4253_s5] sm:$0xff] }
 0x13d   :  { %v3867_v46 = vadd.f32 %v3031_v38, %v83_v45  ;;  %v3625_v36 = vpack.c.bf16 %v3109_v35, %v3108_v34 }
 0x13f   :  { %3308 = vmatmul.mubr.msk.f32.vlgmr.msra.gmra.mrb[0].mxu1 %vm48_vm0, %v3867_v46  ;;  %3330 = vmatmul.mubr.msk.f32.vlgmr.msra.gmra.mrb[0].mxu0 %vm48_vm0, %v3867_v46 }
 0x140   :  { %3572 = vmatpush3.bf16.msra.mxu1 %v3569_v28  ;;  %3318 = vmatprep.mubr.msk.f32.mxu1 %vm48_vm0, %v3855_v41  ;;  %v3059_v28 = vld [vmem:[%s4249_s3 + $0x30] sm:$0xff] }
 0x141   :  { %3574 = vmatprep.subr.bf16.mxu1 %v3573_v47  ;;  %3344 = vmatprep.mubr.msk.f32.mxu0 %vm3730_vm1, %v3729_v48  ;;  %v3589_v32 = vpack.c.bf16 %v3060_v29, %v3059_v28  ;;  %v3094_v29 = vld [vmem:[%s4249_s3 + $0x50] sm:$0xff] }
 0x144   :  { %3576 = vmatpush3.bf16.msra.mxu1 %v3573_v47 }
 0x145   :  { %3332 = vmatprep.subr.mxu1 %v3729_v48 }
 0x147   :  { %3319 = vmatmul.mubr.msk.f32.vlgmr.msra.gmra.mrb[2].mxu1 %vm48_vm0, %v3867_v46 }
 0x148   :  { %3334 = vmatprep.mubr.msk.f32.mxu1 %vm3730_vm1, %v3729_v48 }
 0x212   :  { %v3309_v50 = vpop.f32.mrb[0].mxu1  ;;  %v3331_v51 = vpop.f32.mrb[0].mxu0 }
 0x213   :  { %v175_v52 = vpop.f32.mrb[1].mxu1  ;;  %v351_v53 = vpop.f32.mrb[1].mxu0  ;;  %v181_v61 = vadd.f32 %v3309_v50, %v3032_v55  ;;  %v357_v3 = vadd.f32 %v3331_v51, %v3048_v49 }
 0x214   :  { %v352_v54 = vadd.f32 %v3048_v49, %v351_v53  ;;  %v176_v58 = vadd.f32 %v3032_v55, %v175_v52  ;;  %v3062_v53 = vld [vmem:[%s4252_s4 + $0x1] ss:$0 sm:$0xff] }
 0x215   :  { %v361_v2 = vmul.f32 0.17677669, %v181_v61 }
 0x216   :  { %3343 = vmatpush3.msra.mxu0 %v352_v54  ;;  %v360_v62 = vmul.f32 0.17677669, %v176_v58  ;;  %v3070_v54 = vld [vmem:[%s4252_s4 + $0x5] ss:$0 sm:$0xff] }
 0x217   :  { %3586 = vmatprep.subr.bf16.mxu0 %v3585_v22 }
 0x21a   :  { %v3320_v57 = vpop.f32.mrb[2].mxu1 }
 0x21b   :  { %v263_v59 = vpop.f32.mrb[3].mxu1  ;;  %v269_v63 = vadd.f32 %v3320_v57, %v3040_v56 }
 0x21c   :  { %v264_v60 = vadd.f32 %v3040_v56, %v263_v59  ;;  %v3078_v59 = vld [vmem:[%s4252_s4 + $0x9] ss:$0 sm:$0xff] }
 0x21e   :  { %3333 = vmatpush3.xpose.msk.msra.mxu1 %vm362_vm2, %v264_v60 }
 0x21f   :  { %3337 = vmatprep.subr.mxu1 %v3729_v48 }
 0x221   :  { %3335 = vmatmul.mubr.msk.f32.vlgmr.msra.gmra.mrb[4].mxu1 %vm362_vm2, %v360_v62 }
 0x222   :  { %3338 = vmatpush3.xpose.msk.msra.mxu1 %vm362_vm2, %v269_v63  ;;  %3339 = vmatprep.mubr.msk.f32.mxu1 %vm3730_vm1, %v3729_v48 }
 0x223   :  { %3347 = vmatprep.subr.mxu1 %v3729_v48 }
 0x225   :  { %3340 = vmatmul.mubr.msk.f32.vlgmr.msra.gmra.mrb[6].mxu1 %vm362_vm2, %v361_v2 }
 0x226   :  { %3348 = vmatpush3.msra.mxu1 %v357_v3  ;;  %3349 = vmatprep.mubr.msk.f32.mxu1 %vm3730_vm1, %v3729_v48 }
 0x227   :  { %3594 = vmatprep.subr.bf16.mxu1 %v3593_v25 }
 0x2f4   :  { %v435_v4 = vpop.f32.mrb[4].mxu1 }
 0x2f5   :  { %v3336_v5 = vpop.f32.mrb[5].mxu1  ;;  %v515_v6 = vsel %vm362_vm2, %v435_v4, -inf }
 0x2f6   :  { %516 = vmax.xlane.f32.xlu1 %v515_v6 }
 0x2f8   :  { %v511_v7 = vpop.f32.mrb[6].mxu1 }
 0x2f9   :  { %v3341_v8 = vpop.f32.mrb[7].mxu1  ;;  %v518_v9 = vsel %vm362_vm2, %v511_v7, -inf }
 0x2fa   :  { %519 = vmax.xlane.f32.xlu0 %v518_v9 }
 0x383   :  { %v517_v10 = vpop.xlane.xlu1 %516 }
 0x384   :  { %v521_v11 = vsub.f32 %v435_v4, %v517_v10 }
 0x386   :  { %v523_v12 = vmul.f32 1.442695, %v521_v11 }
 0x387   :  { %v520_v13 = vpop.xlane.xlu0 %519 }
 0x388   :  { %3693 = vpow2.f32 %v523_v12  ;;  %v522_v14 = vsub.f32 %v511_v7, %v520_v13 }
 0x38a   :  { %v525_v15 = vmul.f32 1.442695, %v522_v14 }
 0x38c   :  { %3695 = vpow2.f32 %v525_v15 }
 0x392   :  { %v3694_v16 = vpop.eup %3693 }
 0x393   :  { %v527_v17 = vsel %vm362_vm2, %v3694_v16, 0.0 }
 0x394   :  { %528 = vadd.xlane.f32.xlu1 %v527_v17 }
 0x396   :  { %v3696_v18 = vpop.eup %3695 }
 0x397   :  { %v530_v19 = vsel %vm362_vm2, %v3696_v18, 0.0 }
 0x398   :  { %531 = vadd.xlane.f32.xlu0 %v530_v19 }
 0x421   :  { %v529_v26 = vpop.xlane.xlu1 %528 }
 0x422   :  { %3697 = vrcp.f32 %v529_v26 }
 0x425   :  { %v532_v27 = vpop.xlane.xlu0 %531 }
 0x426   :  { %3699 = vrcp.f32 %v532_v27 }
 0x42c   :  { %v3698_v30 = vpop.eup %3697 }
 0x42d   :  { %v535_v31 = vmul.f32 %v3698_v30, %v3694_v16  ;;  %v3095_v30 = vld [vmem:[%s4249_s3 + $0x58] sm:$0xff] }
 0x42e   :  { %v3613_v33 = vpack.c.bf16 %v3095_v30, %v3094_v29  ;;  %v3122_v29 = vld [vmem:[%s4253_s5 + $0x10] sm:$0xff] }
 0x42f   :  { %3345 = vmatmul.mubr.msk.f32.vlgmr.msra.gmra.mrb[2].mxu0 %vm362_vm2, %v535_v31 }
 0x430   :  { %v3700_v37 = vpop.eup %3699  ;;  %3588 = vmatpush3.bf16.msra.mxu0 %v3585_v22  ;;  %3360 = vmatprep.mubr.msk.f32.mxu0 %vm48_vm0, %v3855_v41  ;;  %v3092_v22 = vld [vmem:[%s4249_s3 + $0x40] sm:$0xff] }
 0x431   :  { %v536_v38 = vmul.f32 %v3700_v37, %v3696_v18  ;;  %3590 = vmatprep.subr.bf16.mxu0 %v3589_v32  ;;  %v3609_v24 = vpack.c.bf16 %v3093_v23, %v3092_v22  ;;  %v3110_v37 = vld [vmem:[%s4249_s3 + $0x150] sm:$0xff] }
 0x433   :  { %3350 = vmatmul.mubr.msk.f32.vlgmr.msra.gmra.mrb[8].mxu1 %vm362_vm2, %v536_v38  ;;  %v3111_v38 = vld [vmem:[%s4249_s3 + $0x158] sm:$0xff] }
 0x434   :  { %3592 = vmatpush3.bf16.msra.mxu0 %v3589_v32  ;;  %3596 = vmatpush3.bf16.msra.mxu1 %v3593_v25 }
 0x435   :  { %3371 = vmatprep.mubr.msk.f32.mxu1 %vm48_vm0, %v3855_v41  ;;  %3598 = vmatprep.subr.bf16.mxu1 %v3597_v39 }
 0x436   :  { %3602 = vmatprep.subr.bf16.mxu0 %v3601_v40 }
 0x437   :  { %3361 = vmatmul.mubr.msk.f32.vlgmr.msra.gmra.mrb[4].mxu0 %vm48_vm0, %v3867_v46 }
 0x438   :  { %3600 = vmatpush3.bf16.msra.mxu1 %v3597_v39  ;;  %3604 = vmatpush3.bf16.msra.mxu0 %v3601_v40  ;;  %v3629_v39 = vpack.c.bf16 %v3111_v38, %v3110_v37  ;;  %v3087_v40 = vld [vmem:[%s4253_s5 + $0x8] sm:$0xff] }
 0x439   :  { %3382 = vmatprep.mubr.msk.f32.mxu0 %vm48_vm0, %v3855_v41  ;;  %3606 = vmatprep.subr.bf16.mxu0 %v3605_v44 }
 0x43a   :  { %3385 = vmatprep.subr.mxu1 %v3729_v48 }
 0x43b   :  { %3372 = vmatmul.mubr.msk.f32.vlgmr.msra.gmra.mrb[10].mxu1 %vm48_vm0, %v3867_v46 }
 0x43c   :  { %3608 = vmatpush3.bf16.msra.mxu0 %v3605_v44  ;;  %3387 = vmatprep.mubr.msk.f32.mxu1 %vm3730_vm1, %v3729_v48  ;;  %v3100_v44 = vld [vmem:[%s4249_s3 + $0xc0] sm:$0xff] }
 0x43d   :  { %3395 = vmatprep.subr.mxu0 %v3729_v48 }
 0x43f   :  { %3383 = vmatmul.mubr.msk.f32.vlgmr.msra.gmra.mrb[6].mxu0 %vm48_vm0, %v3867_v46 }
 0x440   :  { %3397 = vmatprep.mubr.msk.f32.mxu0 %vm3730_vm1, %v3729_v48 }
 0x502   :  { %v3962_v45 = vpop.f32.mrb[2].mxu0 }
 0x503   :  { %v3346_v47 = vpop.f32.mrb[3].mxu0 }
 0x504   :  { %v3101_v47 = vld [vmem:[%s4249_s3 + $0xc8] sm:$0xff] }
 0x506   :  { %v3964_v49 = vpop.f32.mrb[8].mxu1 }
 0x507   :  { %v3351_v50 = vpop.f32.mrb[9].mxu1 }
 0x50a   :  { %v3362_v51 = vpop.f32.mrb[4].mxu0 }
 0x50b   :  { %v763_v52 = vpop.f32.mrb[5].mxu0  ;;  %v769_v61 = vadd.f32 %v3362_v51, %v3062_v53  ;;  %v3617_v51 = vpack.c.bf16 %v3101_v47, %v3100_v44  ;;  %v3144_v44 = vld [vmem:[%s4249_s3 + $0x178] sm:$0xff] }
 0x50c   :  { %v764_v56 = vadd.f32 %v3062_v53, %v763_v52 }
 0x50d   :  { %v949_v4 = vmul.f32 0.17677669, %v769_v61 }
 0x50e   :  { %v3373_v55 = vpop.f32.mrb[10].mxu1  ;;  %v948_v62 = vmul.f32 0.17677669, %v764_v56 }
 0x50f   :  { %v851_v57 = vpop.f32.mrb[11].mxu1  ;;  %v857_v2 = vadd.f32 %v3373_v55, %v3070_v54  ;;  %v3103_v55 = vld [vmem:[%s4249_s3 + $0xd8] sm:$0xff] }
 0x510   :  { %v852_v58 = vadd.f32 %v3070_v54, %v851_v57  ;;  %v3102_v54 = vld [vmem:[%s4249_s3 + $0xd0] sm:$0xff] }
 0x511   :  { %v3621_v56 = vpack.c.bf16 %v3103_v55, %v3102_v54  ;;  %v3136_v54 = vld [vmem:[%s4249_s3 + $0xf8] sm:$0xff] }
 0x512   :  { %v3384_v60 = vpop.f32.mrb[6].mxu0  ;;  %3386 = vmatpush3.xpose.msk.msra.mxu1 %vm362_vm2, %v852_v58 }
 0x513   :  { %v939_v63 = vpop.f32.mrb[7].mxu0  ;;  %3390 = vmatprep.subr.mxu1 %v3729_v48  ;;  %v945_v5 = vadd.f32 %v3384_v60, %v3078_v59  ;;  %v3105_v60 = vld [vmem:[%s4252_s4 + $0x6] ss:$0 sm:$0xff] }
 0x514   :  { %v940_v3 = vadd.f32 %v3078_v59, %v939_v63 }
 0x515   :  { %3388 = vmatmul.mubr.msk.f32.vlgmr.msra.gmra.mrb[12].mxu1 %vm362_vm2, %v948_v62 }
 0x516   :  { %3391 = vmatpush3.xpose.msk.msra.mxu1 %vm362_vm2, %v857_v2  ;;  %3396 = vmatpush3.msra.mxu0 %v940_v3 }
 0x517   :  { %3392 = vmatprep.mubr.msk.f32.mxu1 %vm3730_vm1, %v3729_v48  ;;  %3400 = vmatprep.subr.mxu1 %v3729_v48 }
 0x518   :  { %3405 = vmatprep.subr.mxu0 %v3087_v40 }
 0x519   :  { %3393 = vmatmul.mubr.msk.f32.vlgmr.msra.gmra.mrb[14].mxu1 %vm362_vm2, %v949_v4  ;;  %v3113_v4 = vld [vmem:[%s4252_s4 + $0xa] ss:$0 sm:$0xff] }
 0x51a   :  { %3401 = vmatpush3.msra.mxu1 %v945_v5  ;;  %3402 = vmatprep.mubr.msk.f32.mxu1 %vm3730_vm1, %v3729_v48 }
 0x51b   :  { %3610 = vmatprep.subr.bf16.mxu1 %v3609_v24 }
 0x5e8   :  { %v1022_v6 = vpop.f32.mrb[12].mxu1 }
 0x5e9   :  { %v3389_v7 = vpop.f32.mrb[13].mxu1  ;;  %v1102_v8 = vsel %vm362_vm2, %v1022_v6, -inf }
 0x5ea   :  { %1103 = vmax.xlane.f32.xlu0 %v1102_v8 }
 0x5ec   :  { %v1098_v9 = vpop.f32.mrb[14].mxu1 }
 0x5ed   :  { %v3394_v10 = vpop.f32.mrb[15].mxu1  ;;  %v1105_v11 = vsel %vm362_vm2, %v1098_v9, -inf }
 0x5ee   :  { %1106 = vmax.xlane.f32.xlu1 %v1105_v11 }
 0x677   :  { %v1104_v12 = vpop.xlane.xlu0 %1103 }
 0x678   :  { %v1108_v13 = vsub.f32 %v1022_v6, %v1104_v12 }
 0x67a   :  { %v1110_v14 = vmul.f32 1.442695, %v1108_v13 }
 0x67b   :  { %v1107_v15 = vpop.xlane.xlu1 %1106 }
 0x67c   :  { %3701 = vpow2.f32 %v1110_v14  ;;  %v1109_v16 = vsub.f32 %v1098_v9, %v1107_v15 }
 0x67e   :  { %v1112_v17 = vmul.f32 1.442695, %v1109_v16 }
 0x680   :  { %3703 = vpow2.f32 %v1112_v17 }
 0x686   :  { %v3702_v18 = vpop.eup %3701 }
 0x687   :  { %v1114_v19 = vsel %vm362_vm2, %v3702_v18, 0.0 }
 0x688   :  { %1115 = vadd.xlane.f32.xlu0 %v1114_v19 }
 0x68a   :  { %v3704_v20 = vpop.eup %3703 }
 0x68b   :  { %v1117_v21 = vsel %vm362_vm2, %v3704_v20, 0.0 }
 0x68c   :  { %1118 = vadd.xlane.f32.xlu1 %v1117_v21 }
 0x715   :  { %v1116_v25 = vpop.xlane.xlu0 %1115 }
 0x716   :  { %3705 = vrcp.f32 %v1116_v25 }
 0x719   :  { %v1119_v26 = vpop.xlane.xlu1 %1118 }
 0x71a   :  { %3707 = vrcp.f32 %v1119_v26  ;;  %v3125_v26 = vld [vmem:[%s4249_s3 + $0x60] sm:$0xff] }
 0x720   :  { %v3706_v27 = vpop.eup %3705 }
 0x721   :  { %v1122_v28 = vmul.f32 %v3706_v27, %v3702_v18  ;;  %v3126_v27 = vld [vmem:[%s4249_s3 + $0x68] sm:$0xff] }
 0x723   :  { %3398 = vmatmul.mubr.msk.f32.vlgmr.msra.gmra.mrb[8].mxu0 %vm362_vm2, %v1122_v28  ;;  %v3633_v28 = vpack.c.bf16 %v3126_v27, %v3125_v26 }
 0x724   :  { %v3708_v31 = vpop.eup %3707  ;;  %3406 = vmatpush3.msra.mxu0 %v3087_v40  ;;  %v3142_v40 = vld [vmem:[%s4249_s3 + $0x168] sm:$0xff] }
 0x725   :  { %v1123_v32 = vmul.f32 %v3708_v31, %v3704_v20  ;;  %3410 = vmatprep.subr.mxu0 %v683_v42 }
 0x727   :  { %3403 = vmatmul.mubr.msk.f32.vlgmr.msra.gmra.mrb[16].mxu1 %vm362_vm2, %v1123_v32  ;;  %v3127_v32 = vld [vmem:[%s4249_s3 + $0x70] sm:$0xff] }
 0x728   :  { %3612 = vmatpush3.bf16.msra.mxu1 %v3609_v24  ;;  %3423 = vmatprep.mubr.msk.f32.mxu1 %vm48_vm0, %v3855_v41 }
 0x729   :  { %3614 = vmatprep.subr.bf16.mxu1 %v3613_v33 }
 0x72c   :  { %3616 = vmatpush3.bf16.msra.mxu1 %v3613_v33  ;;  %v3128_v33 = vld [vmem:[%s4249_s3 + $0x78] sm:$0xff] }
 0x72d   :  { %3626 = vmatprep.subr.bf16.mxu1 %v3625_v36  ;;  %v3637_v37 = vpack.c.bf16 %v3128_v33, %v3127_v32  ;;  %v3155_v32 = vld [vmem:[%s4253_s5 + $0x18] sm:$0xff] }
 0x72f   :  { %3424 = vmatmul.mubr.msk.f32.vlgmr.msra.gmra.mrb[18].mxu1 %vm48_vm0, %v3867_v46 }
 0x730   :  { %3628 = vmatpush3.bf16.msra.mxu1 %v3625_v36  ;;  %3445 = vmatprep.mubr.msk.f32.mxu1 %vm48_vm0, %v3855_v41 }
 0x731   :  { %3630 = vmatprep.subr.bf16.mxu1 %v3629_v39 }
 0x734   :  { %3632 = vmatpush3.bf16.msra.mxu1 %v3629_v39  ;;  %v3141_v39 = vld [vmem:[%s4249_s3 + $0x160] sm:$0xff] }
 0x735   :  { %3453 = vmatprep.subr.mxu1 %v3729_v48 }
 0x737   :  { %3446 = vmatmul.mubr.msk.f32.vlgmr.msra.gmra.mrb[20].mxu1 %vm48_vm0, %v3867_v46 }
 0x738   :  { %3455 = vmatprep.mubr.msk.f32.mxu1 %vm3730_vm1, %v3729_v48 }
 0x7f6   :  { %v1193_v43 = vpop.f32.mrb[8].mxu0 }
 0x7f7   :  { %v3399_v50 = vpop.f32.mrb[9].mxu0  ;;  %3407 = vmatprep.mubr.msk.f32.mxu0 %vm362_vm2, %v1193_v43  ;;  %v3143_v43 = vld [vmem:[%s4249_s3 + $0x170] sm:$0xff] }
 0x7f8   :  { %v3653_v47 = vpack.c.bf16 %v3144_v44, %v3143_v43  ;;  %v3133_v50 = vld [vmem:[%s4249_s3 + $0xe0] sm:$0xff] }
 0x7fa   :  { %v1266_v52 = vpop.f32.mrb[16].mxu1 }
 0x7fb   :  { %v3404_v53 = vpop.f32.mrb[17].mxu1  ;;  %3408 = vmatmul.mubr.msk.f32.vlgmr.msra.gmra.mrb[10].mxu0 %vm362_vm2, %v1266_v52 }
 0x7fc   :  { %3411 = vmatpush3.msra.mxu0 %v683_v42  ;;  %3412 = vmatprep.mubr.msk.f32.mxu0 %vm362_vm2, %v3962_v45  ;;  %v3649_v42 = vpack.c.bf16 %v3142_v40, %v3141_v39  ;;  %v3135_v53 = vld [vmem:[%s4249_s3 + $0xf0] sm:$0xff] }
 0x7fd   :  { %3618 = vmatprep.subr.bf16.mxu0 %v3617_v51 }
 0x802   :  { %v3425_v57 = vpop.f32.mrb[18].mxu1 }
 0x803   :  { %v1513_v58 = vpop.f32.mrb[19].mxu1  ;;  %3413 = vmatmul.mubr.msk.f32.vlgmr.msra.gmra.mrb[10].mxu0 %vm362_vm2, %v3964_v49  ;;  %v3097_v49 = vld [vmem:[%s4252_s4 + $0x2] ss:$0 sm:$0xff] }
 0x804   :  { %3620 = vmatpush3.bf16.msra.mxu0 %v3617_v51  ;;  %3434 = vmatprep.mubr.msk.f32.mxu0 %vm48_vm0, %v3855_v41  ;;  %v1519_v61 = vadd.f32 %v3425_v57, %v3097_v49  ;;  %v1514_v63 = vadd.f32 %v3097_v49, %v1513_v58  ;;  %v3134_v51 = vld [vmem:[%s4249_s3 + $0xe8] sm:$0xff]  ;;  %v3645_v58 = vpack.c.bf16 %v3136_v54, %v3135_v53 }
 0x805   :  { %3622 = vmatprep.subr.bf16.mxu0 %v3621_v56  ;;  %v3641_v52 = vpack.c.bf16 %v3134_v51, %v3133_v50 }
 0x806   :  { %v1699_v6 = vmul.f32 0.17677669, %v1519_v61  ;;  %v1698_v7 = vmul.f32 0.17677669, %v1514_v63 }
 0x808   :  { %3624 = vmatpush3.bf16.msra.mxu0 %v3621_v56 }
 0x809   :  { %3448 = vmatprep.subr.mxu0 %v3729_v48 }
 0x80a   :  { %v3447_v45 = vpop.f32.mrb[20].mxu1 }
 0x80b   :  { %3435 = vmatmul.mubr.msk.f32.vlgmr.msra.gmra.mrb[12].mxu0 %vm48_vm0, %v3867_v46  ;;  %v1689_v59 = vpop.f32.mrb[21].mxu1  ;;  %v1695_v8 = vadd.f32 %v3447_v45, %v3113_v4 }
 0x80c   :  { %3450 = vmatprep.mubr.msk.f32.mxu0 %vm3730_vm1, %v3729_v48  ;;  %v1690_v9 = vadd.f32 %v3113_v4, %v1689_v59 }
 0x8de   :  { %v3436_v62 = vpop.f32.mrb[12].mxu0 }
 0x8df   :  { %v1607_v2 = vadd.f32 %v3436_v62, %v3105_v60  ;;  %v1601_v3 = vpop.f32.mrb[13].mxu0 }
 0x8e0   :  { %v1602_v5 = vadd.f32 %v3105_v60, %v1601_v3  ;;  %v3146_v60 = vld [vmem:[%s4252_s4 + $0xb] ss:$0 sm:$0xff] }
 0x8e1   :  { %3454 = vmatpush3.xpose.msk.msra.mxu1 %vm362_vm2, %v1607_v2  ;;  %v3130_v2 = vld [vmem:[%s4252_s4 + $0x3] ss:$0 sm:$0xff] }
 0x8e2   :  { %3449 = vmatpush3.xpose.msk.msra.mxu0 %vm362_vm2, %v1602_v5  ;;  %3463 = vmatprep.subr.mxu1 %v3729_v48 }
 0x8e3   :  { %3458 = vmatprep.subr.mxu0 %v3729_v48 }
 0x8e4   :  { %3456 = vmatmul.mubr.msk.f32.vlgmr.msra.gmra.mrb[22].mxu1 %vm362_vm2, %v1699_v6 }
 0x8e5   :  { %3451 = vmatmul.mubr.msk.f32.vlgmr.msra.gmra.mrb[14].mxu0 %vm362_vm2, %v1698_v7  ;;  %3464 = vmatpush3.msra.mxu1 %v1695_v8 }
 0x8e6   :  { %3459 = vmatpush3.msra.mxu0 %v1690_v9  ;;  %3465 = vmatprep.mubr.msk.f32.mxu1 %vm3730_vm1, %v3729_v48 }
 0x8e7   :  { %3460 = vmatprep.mubr.msk.f32.mxu0 %vm3730_vm1, %v3729_v48  ;;  %3634 = vmatprep.subr.bf16.mxu1 %v3633_v28 }
 0x8e8   :  { %3468 = vmatprep.subr.mxu0 %v3122_v29 }
 0x9b7   :  { %v1848_v10 = vpop.f32.mrb[22].mxu1 }
 0x9b8   :  { %v1772_v11 = vpop.f32.mrb[14].mxu0  ;;  %v3457_v12 = vpop.f32.mrb[23].mxu1  ;;  %v1855_v13 = vsel %vm362_vm2, %v1848_v10, -inf }
 0x9b9   :  { %1856 = vmax.xlane.f32.xlu1 %v1855_v13  ;;  %v3452_v14 = vpop.f32.mrb[15].mxu0  ;;  %v1852_v15 = vsel %vm362_vm2, %v1772_v11, -inf }
 0x9ba   :  { %1853 = vmax.xlane.f32.xlu0 %v1852_v15 }
 0xa46   :  { %v1857_v16 = vpop.xlane.xlu1 %1856 }
 0xa47   :  { %v1859_v17 = vsub.f32 %v1848_v10, %v1857_v16  ;;  %v1854_v18 = vpop.xlane.xlu0 %1853 }
 0xa48   :  { %v1858_v19 = vsub.f32 %v1772_v11, %v1854_v18 }
 0xa49   :  { %v1862_v20 = vmul.f32 1.442695, %v1859_v17 }
 0xa4a   :  { %v1860_v21 = vmul.f32 1.442695, %v1858_v19 }
 0xa4b   :  { %3709 = vpow2.f32 %v1862_v20 }
 0xa4c   :  { %3711 = vpow2.f32 %v1860_v21 }
 0xa55   :  { %v3710_v22 = vpop.eup %3709 }
 0xa56   :  { %v3712_v23 = vpop.eup %3711  ;;  %v1867_v24 = vsel %vm362_vm2, %v3710_v22, 0.0 }
 0xa57   :  { %1868 = vadd.xlane.f32.xlu1 %v1867_v24  ;;  %v1864_v25 = vsel %vm362_vm2, %v3712_v23, 0.0 }
 0xa58   :  { %1865 = vadd.xlane.f32.xlu0 %v1864_v25 }
 0xae4   :  { %v1869_v30 = vpop.xlane.xlu1 %1868 }
 0xae5   :  { %3713 = vrcp.f32 %v1869_v30  ;;  %v1866_v31 = vpop.xlane.xlu0 %1865 }
 0xae6   :  { %3715 = vrcp.f32 %v1866_v31 }
 0xaef   :  { %v3714_v34 = vpop.eup %3713 }
 0xaf0   :  { %v3716_v35 = vpop.eup %3715  ;;  %v1873_v36 = vmul.f32 %v3714_v34, %v3710_v22 }
 0xaf1   :  { %v1872_v38 = vmul.f32 %v3716_v35, %v3712_v23 }
 0xaf2   :  { %3466 = vmatmul.mubr.msk.f32.vlgmr.msra.gmra.mrb[24].mxu1 %vm362_vm2, %v1873_v36 }
 0xaf3   :  { %3636 = vmatpush3.bf16.msra.mxu1 %v3633_v28  ;;  %3461 = vmatmul.mubr.msk.f32.vlgmr.msra.gmra.mrb[16].mxu0 %vm362_vm2, %v1872_v38 }
 0xaf4   :  { %3481 = vmatprep.mubr.msk.f32.mxu1 %vm48_vm0, %v3855_v41  ;;  %3638 = vmatprep.subr.bf16.mxu1 %v3637_v37 }
 0xaf5   :  { %3469 = vmatpush3.msra.mxu0 %v3122_v29 }
 0xaf6   :  { %3642 = vmatprep.subr.bf16.mxu0 %v3641_v52 }
 0xaf7   :  { %3640 = vmatpush3.bf16.msra.mxu1 %v3637_v37  ;;  %v3158_v37 = vld [vmem:[%s4254_s6] ss:$0 sm:$0xff] }
 0xaf8   :  { %3650 = vmatprep.subr.bf16.mxu1 %v3649_v42 }
 0xafa   :  { %3482 = vmatmul.mubr.msk.f32.vlgmr.msra.gmra.mrb[26].mxu1 %vm48_vm0, %v3867_v46 }
 0xafb   :  { %3652 = vmatpush3.bf16.msra.mxu1 %v3649_v42  ;;  %3503 = vmatprep.mubr.msk.f32.mxu1 %vm48_vm0, %v3855_v41 }
 0xafc   :  { %3654 = vmatprep.subr.bf16.mxu1 %v3653_v47 }
 0xaff   :  { %3656 = vmatpush3.bf16.msra.mxu1 %v3653_v47 }
 0xb00   :  { %3516 = vmatprep.subr.mxu1 %v3729_v48 }
 0xb02   :  { %3504 = vmatmul.mubr.msk.f32.vlgmr.msra.gmra.mrb[28].mxu1 %vm48_vm0, %v3867_v46 }
 0xb03   :  { %3518 = vmatprep.mubr.msk.f32.mxu1 %vm3730_vm1, %v3729_v48 }
 0xbc5   :  { %v2016_v55 = vpop.f32.mrb[24].mxu1 }
 0xbc6   :  { %v1943_v56 = vpop.f32.mrb[16].mxu0  ;;  %v3467_v57 = vpop.f32.mrb[25].mxu1 }
 0xbc7   :  { %v3462_v45 = vpop.f32.mrb[17].mxu0  ;;  %3470 = vmatprep.mubr.msk.f32.mxu0 %vm362_vm2, %v1943_v56 }
 0xbc8   :  { %3471 = vmatmul.mubr.msk.f32.vlgmr.msra.gmra.mrb[10].mxu0 %vm362_vm2, %v2016_v55  ;;  %v2831_v45 = vld [vmem:[%s4255_s9] sm:$0xff] }
 0xbc9   :  { %3644 = vmatpush3.bf16.msra.mxu0 %v3641_v52  ;;  %3492 = vmatprep.mubr.msk.f32.mxu0 %vm48_vm0, %v3855_v41 }
 0xbca   :  { %3646 = vmatprep.subr.bf16.mxu0 %v3645_v58 }
 0xbcd   :  { %v3483_v59 = vpop.f32.mrb[26].mxu1  ;;  %3648 = vmatpush3.bf16.msra.mxu0 %v3645_v58 }
 0xbce   :  { %v2184_v49 = vpop.f32.mrb[27].mxu1  ;;  %3506 = vmatprep.subr.mxu0 %v3729_v48  ;;  %v2190_v7 = vadd.f32 %v3483_v59, %v3130_v2  ;;  %v2832_v59 = vld [vmem:[%s4255_s9 + $0x8] sm:$0xff] }
 0xbcf   :  { %v2185_v4 = vadd.f32 %v3130_v2, %v2184_v49  ;;  %v3657_v49 = vpack.c.bf16 %v2832_v59, %v2831_v45  ;;  %v2838_v2 = vld [vmem:[%s4256_s11 + $0x10] sm:$0xff] }
 0xbd0   :  { %3493 = vmatmul.mubr.msk.f32.vlgmr.msra.gmra.mrb[18].mxu0 %vm48_vm0, %v3867_v46  ;;  %v3138_v46 = vld [vmem:[%s4252_s4 + $0x7] ss:$0 sm:$0xff]  ;;  %v2370_v10 = vmul.f32 0.17677669, %v2190_v7 }
 0xbd1   :  { %3508 = vmatprep.mubr.msk.f32.mxu0 %vm3730_vm1, %v3729_v48  ;;  %v2369_v8 = vmul.f32 0.17677669, %v2185_v4 }
 0xbd5   :  { %v3505_v61 = vpop.f32.mrb[28].mxu1 }
 0xbd6   :  { %v2366_v62 = vadd.f32 %v3505_v61, %v3146_v60  ;;  %v2360_v63 = vpop.f32.mrb[29].mxu1  ;;  %v2834_v61 = vld [vmem:[%s4255_s9 + $0x18] sm:$0xff] }
 0xbd7   :  { %v2361_v41 = vadd.f32 %v3146_v60, %v2360_v63  ;;  %v2833_v60 = vld [vmem:[%s4255_s9 + $0x10] sm:$0xff]  ;;  %v2836_v63 = vld [vmem:[%s4256_s11] sm:$0xff] }
 0xbd9   :  { %3517 = vmatpush3.msra.mxu1 %v2361_v41  ;;  %v2837_v41 = vld [vmem:[%s4256_s11 + $0x8] sm:$0xff] }
 0xbda   :  { %3658 = vmatprep.subr.bf16.mxu1 %v3657_v49 }
 0xca3   :  { %v3494_v3 = vpop.f32.mrb[18].mxu0 }
 0xca4   :  { %v2272_v5 = vpop.f32.mrb[19].mxu0  ;;  %v2278_v9 = vadd.f32 %v3494_v3, %v3138_v46  ;;  %v2839_v3 = vld [vmem:[%s4256_s11 + $0x18] sm:$0xff] }
 0xca5   :  { %v2273_v6 = vadd.f32 %v3138_v46, %v2272_v5  ;;  %v3665_v46 = vpack.c.bf16 %v2837_v41, %v2836_v63  ;;  %v3669_v4 = vpack.c.bf16 %v2839_v3, %v2838_v2  ;;  %v2840_v5 = vld [vmem:[%s4256_s11 + $0x20] sm:$0xff] }
 0xca7   :  { %3507 = vmatpush3.xpose.msk.msra.mxu0 %vm362_vm2, %v2273_v6  ;;  %v2841_v6 = vld [vmem:[%s4256_s11 + $0x28] sm:$0xff] }
 0xca8   :  { %3511 = vmatprep.subr.mxu0 %v3729_v48  ;;  %v3673_v7 = vpack.c.bf16 %v2841_v6, %v2840_v5 }
 0xcaa   :  { %3509 = vmatmul.mubr.msk.f32.vlgmr.msra.gmra.mrb[20].mxu0 %vm362_vm2, %v2369_v8 }
 0xcab   :  { %3512 = vmatpush3.xpose.msk.msra.mxu0 %vm362_vm2, %v2278_v9  ;;  %3513 = vmatprep.mubr.msk.f32.mxu0 %vm3730_vm1, %v3729_v48 }
 0xcac   :  { %3521 = vmatprep.subr.mxu0 %v3729_v48 }
 0xcae   :  { %3514 = vmatmul.mubr.msk.f32.vlgmr.msra.gmra.mrb[22].mxu0 %vm362_vm2, %v2370_v10 }
 0xcaf   :  { %3522 = vmatpush3.msra.mxu0 %v2366_v62  ;;  %3523 = vmatprep.mubr.msk.f32.mxu0 %vm3730_vm1, %v3729_v48  ;;  %v3661_v62 = vpack.c.bf16 %v2834_v61, %v2833_v60 }
 0xcb0   :  { %3526 = vmatprep.subr.mxu0 %v3155_v32 }
 0xd7d   :  { %v2443_v11 = vpop.f32.mrb[20].mxu0 }
 0xd7e   :  { %v3510_v12 = vpop.f32.mrb[21].mxu0  ;;  %v2523_v13 = vsel %vm362_vm2, %v2443_v11, -inf }
 0xd7f   :  { %2524 = vmax.xlane.f32.xlu0 %v2523_v13 }
 0xd81   :  { %v2519_v14 = vpop.f32.mrb[22].mxu0 }
 0xd82   :  { %v3515_v15 = vpop.f32.mrb[23].mxu0  ;;  %v2526_v16 = vsel %vm362_vm2, %v2519_v14, -inf }
 0xd83   :  { %2527 = vmax.xlane.f32.xlu1 %v2526_v16  ;;  %v3159_v15 = vld [vmem:[%s4257_s7] ss:$0 sm:$0xff] }
 0xe0c   :  { %v2525_v17 = vpop.xlane.xlu0 %2524 }
 0xe0d   :  { %v2529_v18 = vsub.f32 %v2443_v11, %v2525_v17 }
 0xe0f   :  { %v2531_v19 = vmul.f32 1.442695, %v2529_v18 }
 0xe10   :  { %v2528_v20 = vpop.xlane.xlu1 %2527 }
 0xe11   :  { %3717 = vpow2.f32 %v2531_v19  ;;  %v2530_v21 = vsub.f32 %v2519_v14, %v2528_v20  ;;  %v3160_v19 = vld [vmem:[%s4258_s8] ss:$0 sm:$0xff] }
 0xe13   :  { %v2533_v22 = vmul.f32 1.442695, %v2530_v21 }
 0xe15   :  { %3719 = vpow2.f32 %v2533_v22 }
 0xe1b   :  { %v3718_v23 = vpop.eup %3717 }
 0xe1c   :  { %v2535_v48 = vsel %vm362_vm2, %v3718_v23, 0.0 }
 0xe1d   :  { %2536 = vadd.xlane.f32.xlu0 %v2535_v48  ;;  %v2842_v48 = vld [vmem:[%s4256_s11 + $0x30] sm:$0xff] }
 0xe1f   :  { %v3720_v24 = vpop.eup %3719 }
 0xe20   :  { %v2538_v25 = vsel %vm362_vm2, %v3720_v24, 0.0 }
 0xe21   :  { %2539 = vadd.xlane.f32.xlu1 %v2538_v25 }
 0xeaa   :  { %v2537_v26 = vpop.xlane.xlu0 %2536 }
 0xeab   :  { %3721 = vrcp.f32 %v2537_v26  ;;  %v3161_v26 = vld [vmem:[%s4259_s10] ss:$0 sm:$0xff] }
 0xeae   :  { %v2540_v27 = vpop.xlane.xlu1 %2539 }
 0xeaf   :  { %3723 = vrcp.f32 %v2540_v27 }
 0xeb5   :  { %v3722_v28 = vpop.eup %3721 }
 0xeb6   :  { %v2543_v29 = vmul.f32 %v3722_v28, %v3718_v23 }
 0xeb8   :  { %3519 = vmatmul.mubr.msk.f32.vlgmr.msra.gmra.mrb[30].mxu1 %vm362_vm2, %v2543_v29 }
 0xeb9   :  { %v3724_v30 = vpop.eup %3723  ;;  %3660 = vmatpush3.bf16.msra.mxu1 %v3657_v49 }
 0xeba   :  { %v2544_v31 = vmul.f32 %v3724_v30, %v3720_v24  ;;  %3662 = vmatprep.subr.bf16.mxu1 %v3661_v62  ;;  %v2843_v24 = vld [vmem:[%s4256_s11 + $0x38] sm:$0xff] }
 0xebb   :  { %v3677_v25 = vpack.c.bf16 %v2843_v24, %v2842_v48 }
 0xebc   :  { %3524 = vmatmul.mubr.msk.f32.vlgmr.msra.gmra.mrb[24].mxu0 %vm362_vm2, %v2544_v31 }
 0xebd   :  { %3527 = vmatpush3.msra.mxu0 %v3155_v32  ;;  %3664 = vmatpush3.bf16.msra.mxu1 %v3661_v62 }
 0xebe   :  { %3666 = vmatprep.subr.bf16.mxu0 %v3665_v46 }
 0xf8b   :  { %v2614_v33 = vpop.f32.mrb[30].mxu1 }
 0xf8c   :  { %v3520_v34 = vpop.f32.mrb[31].mxu1  ;;  %3528 = vmatprep.mubr.msk.f32.mxu0 %vm362_vm2, %v2614_v33  ;;  %v3164_v33 = vld [vmem:[%s4260_s12] ss:$0 sm:$0xff] }
 0xf8f   :  { %v2687_v35 = vpop.f32.mrb[24].mxu0 }
 0xf90   :  { %v3525_v36 = vpop.f32.mrb[25].mxu0  ;;  %3529 = vmatmul.mubr.msk.f32.vlgmr.msra.gmra.mrb[10].mxu0 %vm362_vm2, %v2687_v35 }
 0xf91   :  { %3668 = vmatpush3.bf16.msra.mxu0 %v3665_v46 }
 0xf92   :  { %3670 = vmatprep.subr.bf16.mxu0 %v3669_v4 }
 0xf95   :  { %3672 = vmatpush3.bf16.msra.mxu0 %v3669_v4 }
 0xf96   :  { %3674 = vmatprep.subr.bf16.mxu0 %v3673_v7 }
 0xf99   :  { %3676 = vmatpush3.bf16.msra.mxu0 %v3673_v7 }
 0xf9a   :  { %3678 = vmatprep.subr.bf16.mxu0 %v3677_v25 }
 0xf9d   :  { %3680 = vmatpush3.bf16.msra.mxu0 %v3677_v25 }
0x1063   :  { %v3530_v38 = vpop.f32.mrb[10].mxu0 }
0x1064   :  { %v2784_v39 = vadd.f32 %v3530_v38, %v3158_v37  ;;  %v2765_v40 = vpop.f32.mrb[11].mxu0 }
0x1065   :  { %v2783_v42 = vadd.f32 %v3158_v37, %v2765_v40 }
0x1066   :  { %v4175_v43 = vadd.f32 %v2784_v39, %v3809_v1 }
0x1067   :  { %v4178_v44 = vadd.f32 %v2783_v42, %v3804_v0 }
0x1068   :  { %v2792_v47 = vsel %vm48_vm0, %v4175_v43, 0.0 }
0x1069   :  { %2793 = vadd.xlane.f32.xlu1 %v2792_v47  ;;  %v2789_v50 = vsel %vm48_vm0, %v4178_v44, 0.0 }
0x106a   :  { %2790 = vadd.xlane.f32.xlu0 %v2789_v50 }
0x10f6   :  { %v2794_v51 = vpop.xlane.xlu1 %2793 }
0x10f7   :  { %v2796_v52 = vmul.f32 0.03125, %v2794_v51  ;;  %v2791_v53 = vpop.xlane.xlu0 %2790 }
0x10f8   :  { %v2795_v54 = vmul.f32 0.03125, %v2791_v53 }
0x10f9   :  { %v2798_v55 = vsub.f32 %v4175_v43, %v2796_v52 }
0x10fa   :  { %v2797_v1 = vsub.f32 %v4178_v44, %v2795_v54 }
0x10fb   :  { %v2800_v56 = vmul.f32 %v2798_v55, %v2798_v55 }
0x10fc   :  { %v2799_v57 = vmul.f32 %v2797_v1, %v2797_v1 }
0x10fd   :  { %v2804_v0 = vsel %vm48_vm0, %v2800_v56, 0.0 }
0x10fe   :  { %2805 = vadd.xlane.f32.xlu1 %v2804_v0  ;;  %v2801_v58 = vsel %vm48_vm0, %v2799_v57, 0.0 }
0x10ff   :  { %2802 = vadd.xlane.f32.xlu0 %v2801_v58 }
0x118b   :  { %v2806_v8 = vpop.xlane.xlu1 %2805 }
0x118c   :  { %v2808_v9 = vmul.f32 0.03125, %v2806_v8  ;;  %v2803_v10 = vpop.xlane.xlu0 %2802 }
0x118d   :  { %v2807_v11 = vmul.f32 0.03125, %v2803_v10 }
0x118e   :  { %v2810_v12 = vadd.f32 1e-05, %v2808_v9 }
0x118f   :  { %v2809_v13 = vadd.f32 1e-05, %v2807_v11 }
0x1190   :  { %3725 = vrsqrt.f32 %v2810_v12 }
0x1191   :  { %3727 = vrsqrt.f32 %v2809_v13 }
0x119a   :  { %v3726_v14 = vpop.eup %3725 }
0x119b   :  { %v3728_v16 = vpop.eup %3727  ;;  %v2814_v17 = vmul.f32 %v3726_v14, %v2798_v55 }
0x119c   :  { %v2813_v18 = vmul.f32 %v3728_v16, %v2797_v1 }
0x119d   :  { %v2822_v20 = vmul.f32 %v3159_v15, %v2814_v17 }
0x119e   :  { %v2821_v21 = vmul.f32 %v3159_v15, %v2813_v18 }
0x119f   :  { %v2830_v23 = vadd.f32 %v3160_v19, %v2822_v20 }
0x11a0   :  { %v2829_v22 = vadd.f32 %v3160_v19, %v2821_v21 }
0x11a2   :  { %3539 = vmatprep.mubr.msk.f32.mxu1 %vm48_vm0, %v2829_v22 }
0x11a3   :  { %3540 = vmatmul.mubr.msk.f32.vlgmr.msra.gmra.mrb[32].mxu1 %vm48_vm0, %v2830_v23 }
0x1276   :  { %v3541_v27 = vpop.f32.mrb[32].mxu1 }
0x1277   :  { %v2929_v28 = vadd.f32 %v3541_v27, %v3161_v26  ;;  %v2923_v29 = vpop.f32.mrb[33].mxu1 }
0x1278   :  { %v2924_v30 = vadd.f32 %v3161_v26, %v2923_v29 }
0x1279   :  { %v2933_v32 = vmax.f32 %v2929_v28, 0.0 }
0x127a   :  { %v2932_v31 = vmax.f32 %v2924_v30, 0.0 }
0x127c   :  { %3558 = vmatprep.mubr.msk.f32.mxu0 %vm2940_vm3, %v2932_v31 }
0x127d   :  { %3559 = vmatmul.mubr.msk.f32.vlgmr.msra.gmra.mrb[26].mxu0 %vm2940_vm3, %v2933_v32 }
0x1350   :  { %v3560_v34 = vpop.f32.mrb[26].mxu0 }
0x1351   :  { %v3019_v35 = vadd.f32 %v3560_v34, %v3164_v33  ;;  %v3013_v36 = vpop.f32.mrb[27].mxu0 }
0x1352   :  { %v3014_v37 = vadd.f32 %v3164_v33, %v3013_v36 }
0x1353   :  { %v3023_v38 = vadd.f32 %v3019_v35, %v4175_v43 }
0x1354   :  { %v3022_v39 = vadd.f32 %v3014_v37, %v4178_v44 }
0x1355   :  { %3025 = vst.msk [vmem:[%s4261_s13 + $0x8] sm:$0xff] %vm48_vm0, %v3023_v38 }
0x1356   :  { %3024 = vst.msk [vmem:[%s4261_s13] sm:$0xff] %vm48_vm0, %v3022_v39 }

// kernel: transformer_forward.9
= control target key start
LH: loop header
LB: loop body
LE: loop exit
PB: predicated region body
PF: predicated region fallthrough
CT: control target
= control target key end

     0   :  { %vm71_vm0 = vcmask 261120   ;;  %v7126_v48 = vmov 0.0   ;;  %vm7127_vm1 = vmmov 0   ;;  %vm390_vm2 = vcmask 64512   ;;  %s8079_s0 = inlined_call_operand.vmem [shape: f32[16,32], index: 0, kind: input, shape index: {}]   ;;  %s8080_s4 = inlined_call_operand.vmem [shape: f32[3,4,32,8], index: 4, kind: input, shape index: {}]   ;;  %s8081_s2 = inlined_call_operand.vmem [shape: f32[1,32], index: 2, kind: input, shape index: {}]   ;;  %s8082_s3 = inlined_call_operand.vmem [shape: f32[1,32], index: 3, kind: input, shape index: {}]   ;;  %s8083_s5 = inlined_call_operand.vmem [shape: f32[3,4,1,8], index: 5, kind: input, shape index: {}]   ;;  %s8084_s6 = inlined_call_operand.vmem [shape: f32[4,8,32], index: 6, kind: input, shape index: {}]   ;;  %s8085_s7 = inlined_call_operand.vmem [shape: f32[1,32], index: 7, kind: input, shape index: {}]   ;;  %s8086_s10 = inlined_call_operand.vmem [shape: f32[3,4,32,8], index: 10, kind: input, shape index: {}]   ;;  %s8087_s1 = inlined_call_operand.vmem [shape: f32[16,32], index: 1, kind: input, shape index: {}]   ;;  %s8088_s8 = inlined_call_operand.vmem [shape: f32[1,32], index: 8, kind: input, shape index: {}]   ;;  %s8089_s9 = inlined_call_operand.vmem [shape: f32[1,32], index: 9, kind: input, shape index: {}]   ;;  %s8090_s11 = inlined_call_operand.vmem [shape: f32[3,4,1,8], index: 11, kind: input, shape index: {}]   ;;  %s8091_s12 = inlined_call_operand.vmem [shape: f32[4,8,32], index: 12, kind: input, shape index: {}]   ;;  %s8092_s13 = inlined_call_operand.vmem [shape: f32[1,32], index: 13, kind: input, shape index: {}]   ;;  %s8093_s16 = inlined_call_operand.vmem [shape: f32[32,64], index: 16, kind: input, shape index: {}]   ;;  %s8094_s18 = inlined_call_operand.vmem [shape: f32[64,32], index: 18, kind: input, shape index: {}]   ;;  %s8095_s14 = inlined_call_operand.vmem [shape: f32[1,32], index: 14, kind: input, shape index: {}]   ;;  %s8096_s15 = inlined_call_operand.vmem [shape: f32[1,32], index: 15, kind: input, shape index: {}]   ;;  %s8097_s17 = inlined_call_operand.vmem [shape: f32[1,64], index: 17, kind: input, shape index: {}]   ;;  %s8098_s19 = inlined_call_operand.vmem [shape: f32[1,32], index: 19, kind: input, shape index: {}]   ;;  %s8099_s20 = inlined_call_operand.vmem [shape: f32[16,32], index: 20, kind: output, shape index: {}]  }
   0x1   :  { %8103 = sst [smem:[#allocation2_spill]] %s8079_s0  ;;  %vm5722_vm4 = vcmask 523264  }
   0x2   :  { %8104 = sst [smem:[#allocation3_spill]] %s8080_s4  ;;  %s8108_s23 = sld [smem:[#allocation2_spill]] }
   0x3   :  { %8105 = sst [smem:[#allocation4_spill]] %s8081_s2  ;;  %s8109_s26 = sld [smem:[#allocation3_spill]] }
   0x4   :  { %8106 = sst [smem:[#allocation5_spill]] %s8082_s3  ;;  %s8110_s21 = sld [smem:[#allocation4_spill]] }
   0x5   :  { %8107 = sst [smem:[#allocation6_spill]] %s8083_s5 }
   0x6   :  { %s8112_s5 = sld [smem:[#allocation6_spill]] }
   0x8   :  { %v7236_v0 = vld [vmem:[%s8108_s23] sm:$0xff]  ;;  %v7241_v1 = vld [vmem:[%s8108_s23 + $0x8] sm:$0xff]  ;;  %s8111_s23 = sld [smem:[#allocation5_spill]] }
   0x9   :  { %v72_v2 = vsel %vm71_vm0, %v7236_v0, 0.0  ;;  %v75_v3 = vsel %vm71_vm0, %v7241_v1, 0.0  ;;  %v120_v14 = vld [vmem:[%s8109_s26] sm:$0xff]  ;;  %v121_v15 = vld [vmem:[%s8109_s26 + $0x8] sm:$0xff]  ;;  %v122_v20 = vld [vmem:[%s8109_s26 + $0x10] sm:$0xff] }
   0xa   :  { %73 = vadd.xlane.f32.xlu0 %v72_v2  ;;  %v6820_v16 = vpack.c.bf16 %v121_v15, %v120_v14  ;;  %v5825_v17 = vld [vmem:[%s8109_s26 + $0x100] sm:$0xff]  ;;  %v5826_v18 = vld [vmem:[%s8109_s26 + $0x108] sm:$0xff]  ;;  %v123_v21 = vld [vmem:[%s8109_s26 + $0x18] sm:$0xff] }
   0xb   :  { %v6836_v19 = vpack.c.bf16 %v5826_v18, %v5825_v17  ;;  %v6824_v22 = vpack.c.bf16 %v123_v21, %v122_v20  ;;  %v5827_v23 = vld [vmem:[%s8109_s26 + $0x110] sm:$0xff]  ;;  %v5828_v24 = vld [vmem:[%s8109_s26 + $0x118] sm:$0xff]  ;;  %v5817_v26 = vld [vmem:[%s8109_s26 + $0x80] sm:$0xff] }
   0xc   :  { %6821 = vmatprep.subr.bf16.mxu1 %v6820_v16  ;;  %v6840_v25 = vpack.c.bf16 %v5828_v24, %v5827_v23  ;;  %v5818_v27 = vld [vmem:[%s8109_s26 + $0x88] sm:$0xff]  ;;  %v5812_v36 = vld [vmem:[%s8110_s21] ss:$0 sm:$0xff]  ;;  %v5819_v43 = vld [vmem:[%s8109_s26 + $0x90] sm:$0xff] }
   0xd   :  { %6823 = vmatpush3.bf16.msra.mxu1 %v6820_v16  ;;  %6837 = vmatprep.subr.bf16.mxu0 %v6836_v19  ;;  %v6828_v28 = vpack.c.bf16 %v5818_v27, %v5817_v26  ;;  %v5820_v44 = vld [vmem:[%s8109_s26 + $0x98] sm:$0xff]  ;;  %v5830_v49 = vld [vmem:[%s8112_s5 + $0x8] ss:$0 sm:$0xff]  ;;  %v5814_v55 = vld [vmem:[%s8112_s5] ss:$0 sm:$0xff] }
   0xe   :  { %76 = vadd.xlane.f32.xlu0 %v75_v3  ;;  %6839 = vmatpush3.bf16.msra.mxu0 %v6836_v19  ;;  %v5813_v38 = vld [vmem:[%s8111_s23] ss:$0 sm:$0xff]  ;;  %v6832_v47 = vpack.c.bf16 %v5820_v44, %v5819_v43  ;;  %v5822_v56 = vld [vmem:[%s8112_s5 + $0x4] ss:$0 sm:$0xff]  ;;  %v5840_v27 = vld [vmem:[%s8109_s26 + $0x28] sm:$0xff] }
   0xf   :  { %6825 = vmatprep.subr.bf16.mxu1 %v6824_v22  ;;  %6841 = vmatprep.subr.bf16.mxu0 %v6840_v25  ;;  %v5839_v26 = vld [vmem:[%s8109_s26 + $0x20] sm:$0xff]  ;;  %v5856_v43 = vld [vmem:[%s8109_s26 + $0x128] sm:$0xff] }
  0x11   :  { %6827 = vmatpush3.bf16.msra.mxu1 %v6824_v22 }
  0x12   :  { %6843 = vmatpush3.bf16.msra.mxu0 %v6840_v25  ;;  %6829 = vmatprep.subr.bf16.mxu1 %v6828_v28 }
  0x13   :  { %6369 = vmatprep.subr.mxu0 %v7126_v48 }
  0x97   :  { %v74_v4 = vpop.xlane.xlu0 %73 }
  0x98   :  { %v79_v5 = vmul.f32 0.03125, %v74_v4  ;;  %v115_v4 = vlaneseq }
  0x9a   :  { %v81_v6 = vsub.f32 %v7236_v0, %v79_v5  ;;  %v116_v5 = vshrl.u32 %v115_v4, 7 }
  0x9b   :  { %v77_v7 = vpop.xlane.xlu0 %76 }
  0x9c   :  { %v80_v8 = vmul.f32 0.03125, %v77_v7  ;;  %v83_v9 = vmul.f32 %v81_v6, %v81_v6 }
  0x9e   :  { %v82_v10 = vsub.f32 %v7241_v1, %v80_v8  ;;  %v85_v11 = vsel %vm71_vm0, %v83_v9, 0.0 }
  0x9f   :  { %86 = vadd.xlane.f32.xlu1 %v85_v11 }
  0xa0   :  { %v84_v12 = vmul.f32 %v82_v10, %v82_v10 }
  0xa2   :  { %v88_v13 = vsel %vm71_vm0, %v84_v12, 0.0 }
  0xa3   :  { %89 = vadd.xlane.f32.xlu1 %v88_v13 }
 0x12c   :  { %v87_v29 = vpop.xlane.xlu1 %86 }
 0x12d   :  { %v91_v30 = vmul.f32 0.03125, %v87_v29  ;;  %v5847_v29 = vld [vmem:[%s8109_s26 + $0xa0] sm:$0xff] }
 0x12f   :  { %v93_v31 = vadd.f32 1e-05, %v91_v30  ;;  %v5848_v30 = vld [vmem:[%s8109_s26 + $0xa8] sm:$0xff] }
 0x130   :  { %v90_v32 = vpop.xlane.xlu1 %89 }
 0x131   :  { %7050 = vrsqrt.f32 %v93_v31  ;;  %v92_v33 = vmul.f32 0.03125, %v90_v32  ;;  %v6852_v31 = vpack.c.bf16 %v5848_v30, %v5847_v29 }
 0x133   :  { %v94_v34 = vadd.f32 1e-05, %v92_v33 }
 0x135   :  { %7052 = vrsqrt.f32 %v94_v34  ;;  %v5841_v34 = vld [vmem:[%s8109_s26 + $0x30] sm:$0xff] }
 0x13b   :  { %v7051_v35 = vpop.eup %7050 }
 0x13c   :  { %v97_v37 = vmul.f32 %v7051_v35, %v81_v6  ;;  %v118_v6 = vand.u32 127, %v115_v4  ;;  %v5842_v35 = vld [vmem:[%s8109_s26 + $0x38] sm:$0xff] }
 0x13e   :  { %v105_v39 = vmul.f32 %v5812_v36, %v97_v37  ;;  %vm7334_vm3 = vcmp.gt.s32.totalorder %v118_v6, %v116_v5 }
 0x13f   :  { %v7053_v40 = vpop.eup %7052 }
 0x140   :  { %v7287_v41 = vadd.f32 %v5813_v38, %v105_v39  ;;  %v98_v42 = vmul.f32 %v7053_v40, %v82_v10  ;;  %v5849_v39 = vld [vmem:[%s8109_s26 + $0xb0] sm:$0xff]  ;;  %v5850_v40 = vld [vmem:[%s8109_s26 + $0xb8] sm:$0xff] }
 0x142   :  { %v106_v45 = vmul.f32 %v5812_v36, %v98_v42  ;;  %6334 = vmatprep.mubr.msk.f32.mxu1 %vm71_vm0, %v7287_v41  ;;  %6356 = vmatprep.mubr.msk.f32.mxu0 %vm71_vm0, %v7287_v41  ;;  %v5855_v42 = vld [vmem:[%s8109_s26 + $0x120] sm:$0xff] }
 0x144   :  { %v7299_v46 = vadd.f32 %v5813_v38, %v106_v45  ;;  %v6848_v38 = vpack.c.bf16 %v5842_v35, %v5841_v34 }
 0x146   :  { %6335 = vmatmul.mubr.msk.f32.vlgmr.msra.gmra.mrb[0].mxu1 %vm71_vm0, %v7299_v46  ;;  %6357 = vmatmul.mubr.msk.f32.vlgmr.msra.gmra.mrb[0].mxu0 %vm71_vm0, %v7299_v46 }
 0x147   :  { %6831 = vmatpush3.bf16.msra.mxu1 %v6828_v28  ;;  %6345 = vmatprep.mubr.msk.f32.mxu1 %vm71_vm0, %v7287_v41  ;;  %v6844_v28 = vpack.c.bf16 %v5840_v27, %v5839_v26 }
 0x148   :  { %6833 = vmatprep.subr.bf16.mxu1 %v6832_v47  ;;  %6371 = vmatprep.mubr.msk.f32.mxu0 %vm7127_vm1, %v7126_v48 }
 0x14b   :  { %6835 = vmatpush3.bf16.msra.mxu1 %v6832_v47  ;;  %v6856_v47 = vpack.c.bf16 %v5850_v40, %v5849_v39  ;;  %v5877_v39 = vld [vmem:[%s8109_s26 + $0x58] sm:$0xff] }
 0x14c   :  { %6359 = vmatprep.subr.mxu1 %v7126_v48 }
 0x14e   :  { %6346 = vmatmul.mubr.msk.f32.vlgmr.msra.gmra.mrb[2].mxu1 %vm71_vm0, %v7299_v46 }
 0x14f   :  { %6361 = vmatprep.mubr.msk.f32.mxu1 %vm7127_vm1, %v7126_v48 }
 0x219   :  { %v6336_v50 = vpop.f32.mrb[0].mxu1  ;;  %v6358_v51 = vpop.f32.mrb[0].mxu0 }
 0x21a   :  { %v203_v52 = vpop.f32.mrb[1].mxu1  ;;  %v379_v53 = vpop.f32.mrb[1].mxu0  ;;  %v209_v61 = vadd.f32 %v6336_v50, %v5814_v55  ;;  %v385_v3 = vadd.f32 %v6358_v51, %v5830_v49  ;;  %v5857_v50 = vld [vmem:[%s8109_s26 + $0x130] sm:$0xff]  ;;  %v5858_v51 = vld [vmem:[%s8109_s26 + $0x138] sm:$0xff] }
 0x21b   :  { %v380_v54 = vadd.f32 %v5830_v49, %v379_v53  ;;  %v204_v58 = vadd.f32 %v5814_v55, %v203_v52  ;;  %v6860_v49 = vpack.c.bf16 %v5856_v43, %v5855_v42  ;;  %v6864_v52 = vpack.c.bf16 %v5858_v51, %v5857_v50  ;;  %v5893_v50 = vld [vmem:[%s8109_s26 + $0x158] sm:$0xff] }
 0x21c   :  { %v389_v2 = vmul.f32 0.17677669, %v209_v61 }
 0x21d   :  { %6370 = vmatpush3.msra.mxu0 %v380_v54  ;;  %v388_v62 = vmul.f32 0.17677669, %v204_v58 }
 0x21e   :  { %6845 = vmatprep.subr.bf16.mxu0 %v6844_v28 }
 0x221   :  { %v6347_v57 = vpop.f32.mrb[2].mxu1 }
 0x222   :  { %v291_v59 = vpop.f32.mrb[3].mxu1  ;;  %v297_v63 = vadd.f32 %v6347_v57, %v5822_v56 }
 0x223   :  { %v292_v60 = vadd.f32 %v5822_v56, %v291_v59  ;;  %v5844_v59 = vld [vmem:[%s8112_s5 + $0x1] ss:$0 sm:$0xff] }
 0x225   :  { %6360 = vmatpush3.xpose.msk.msra.mxu1 %vm390_vm2, %v292_v60  ;;  %v5852_v60 = vld [vmem:[%s8112_s5 + $0x5] ss:$0 sm:$0xff] }
 0x226   :  { %6364 = vmatprep.subr.mxu1 %v7126_v48 }
 0x228   :  { %6362 = vmatmul.mubr.msk.f32.vlgmr.msra.gmra.mrb[4].mxu1 %vm390_vm2, %v388_v62 }
 0x229   :  { %6365 = vmatpush3.xpose.msk.msra.mxu1 %vm390_vm2, %v297_v63  ;;  %6366 = vmatprep.mubr.msk.f32.mxu1 %vm7127_vm1, %v7126_v48 }
 0x22a   :  { %6374 = vmatprep.subr.mxu1 %v7126_v48 }
 0x22c   :  { %6367 = vmatmul.mubr.msk.f32.vlgmr.msra.gmra.mrb[6].mxu1 %vm390_vm2, %v389_v2 }
 0x22d   :  { %6375 = vmatpush3.msra.mxu1 %v385_v3  ;;  %6376 = vmatprep.mubr.msk.f32.mxu1 %vm7127_vm1, %v7126_v48  ;;  %v5860_v3 = vld [vmem:[%s8112_s5 + $0x9] ss:$0 sm:$0xff] }
 0x22e   :  { %6853 = vmatprep.subr.bf16.mxu1 %v6852_v31 }
 0x2fb   :  { %v463_v8 = vpop.f32.mrb[4].mxu1 }
 0x2fc   :  { %v545_v9 = vsel %vm7334_vm3, -100000.0, %v463_v8  ;;  %v6363_v10 = vpop.f32.mrb[5].mxu1 }
 0x2fd   :  { %v547_v11 = vsel %vm390_vm2, %v545_v9, -inf }
 0x2fe   :  { %548 = vmax.xlane.f32.xlu1 %v547_v11 }
 0x2ff   :  { %v539_v12 = vpop.f32.mrb[6].mxu1 }
 0x300   :  { %v546_v13 = vsel %vm7334_vm3, -100000.0, %v539_v12  ;;  %v6368_v14 = vpop.f32.mrb[7].mxu1 }
 0x301   :  { %v550_v15 = vsel %vm390_vm2, %v546_v13, -inf }
 0x302   :  { %551 = vmax.xlane.f32.xlu0 %v550_v15 }
 0x38b   :  { %v549_v16 = vpop.xlane.xlu1 %548 }
 0x38c   :  { %v553_v17 = vsub.f32 %v545_v9, %v549_v16 }
 0x38e   :  { %v555_v18 = vmul.f32 1.442695, %v553_v17 }
 0x38f   :  { %v552_v19 = vpop.xlane.xlu0 %551 }
 0x390   :  { %7054 = vpow2.f32 %v555_v18  ;;  %v554_v20 = vsub.f32 %v546_v13, %v552_v19 }
 0x392   :  { %v557_v21 = vmul.f32 1.442695, %v554_v20 }
 0x394   :  { %7056 = vpow2.f32 %v557_v21 }
 0x39a   :  { %v7055_v22 = vpop.eup %7054 }
 0x39b   :  { %v559_v23 = vsel %vm390_vm2, %v7055_v22, 0.0 }
 0x39c   :  { %560 = vadd.xlane.f32.xlu1 %v559_v23 }
 0x39e   :  { %v7057_v24 = vpop.eup %7056 }
 0x39f   :  { %v562_v25 = vsel %vm390_vm2, %v7057_v24, 0.0 }
 0x3a0   :  { %563 = vadd.xlane.f32.xlu0 %v562_v25 }
 0x429   :  { %v561_v32 = vpop.xlane.xlu1 %560 }
 0x42a   :  { %7058 = vrcp.f32 %v561_v32  ;;  %v5875_v32 = vld [vmem:[%s8109_s26 + $0x48] sm:$0xff] }
 0x42d   :  { %v564_v33 = vpop.xlane.xlu0 %563 }
 0x42e   :  { %7060 = vrcp.f32 %v564_v33 }
 0x434   :  { %v7059_v36 = vpop.eup %7058 }
 0x435   :  { %v567_v37 = vmul.f32 %v7059_v36, %v7055_v22 }
 0x437   :  { %6372 = vmatmul.mubr.msk.f32.vlgmr.msra.gmra.mrb[2].mxu0 %vm390_vm2, %v567_v37 }
 0x438   :  { %v7061_v44 = vpop.eup %7060  ;;  %6847 = vmatpush3.bf16.msra.mxu0 %v6844_v28  ;;  %6387 = vmatprep.mubr.msk.f32.mxu0 %vm71_vm0, %v7287_v41 }
 0x439   :  { %v568_v45 = vmul.f32 %v7061_v44, %v7057_v24  ;;  %6849 = vmatprep.subr.bf16.mxu0 %v6848_v38  ;;  %v5890_v44 = vld [vmem:[%s8109_s26 + $0x140] sm:$0xff] }
 0x43b   :  { %6377 = vmatmul.mubr.msk.f32.vlgmr.msra.gmra.mrb[8].mxu1 %vm390_vm2, %v568_v45  ;;  %v5891_v45 = vld [vmem:[%s8109_s26 + $0x148] sm:$0xff] }
 0x43c   :  { %6851 = vmatpush3.bf16.msra.mxu0 %v6848_v38  ;;  %6855 = vmatpush3.bf16.msra.mxu1 %v6852_v31  ;;  %v5874_v31 = vld [vmem:[%s8109_s26 + $0x40] sm:$0xff]  ;;  %v5876_v38 = vld [vmem:[%s8109_s26 + $0x50] sm:$0xff] }
 0x43d   :  { %6398 = vmatprep.mubr.msk.f32.mxu1 %vm71_vm0, %v7287_v41  ;;  %6857 = vmatprep.subr.bf16.mxu1 %v6856_v47  ;;  %v6868_v33 = vpack.c.bf16 %v5875_v32, %v5874_v31  ;;  %v6872_v43 = vpack.c.bf16 %v5877_v39, %v5876_v38  ;;  %v5907_v38 = vld [vmem:[%s8109_s26 + $0x60] sm:$0xff]  ;;  %v5908_v39 = vld [vmem:[%s8109_s26 + $0x68] sm:$0xff] }
 0x43e   :  { %6861 = vmatprep.subr.bf16.mxu0 %v6860_v49 }
 0x43f   :  { %6388 = vmatmul.mubr.msk.f32.vlgmr.msra.gmra.mrb[4].mxu0 %vm71_vm0, %v7299_v46 }
 0x440   :  { %6859 = vmatpush3.bf16.msra.mxu1 %v6856_v47  ;;  %6863 = vmatpush3.bf16.msra.mxu0 %v6860_v49  ;;  %v6884_v47 = vpack.c.bf16 %v5891_v45, %v5890_v44  ;;  %v5892_v49 = vld [vmem:[%s8109_s26 + $0x150] sm:$0xff] }
 0x441   :  { %6409 = vmatprep.mubr.msk.f32.mxu0 %vm71_vm0, %v7287_v41  ;;  %6865 = vmatprep.subr.bf16.mxu0 %v6864_v52  ;;  %v6888_v51 = vpack.c.bf16 %v5893_v50, %v5892_v49  ;;  %v5909_v45 = vld [vmem:[%s8109_s26 + $0x70] sm:$0xff] }
 0x442   :  { %6412 = vmatprep.subr.mxu1 %v7126_v48 }
 0x443   :  { %6399 = vmatmul.mubr.msk.f32.vlgmr.msra.gmra.mrb[10].mxu1 %vm71_vm0, %v7299_v46 }
 0x444   :  { %6867 = vmatpush3.bf16.msra.mxu0 %v6864_v52  ;;  %6414 = vmatprep.mubr.msk.f32.mxu1 %vm7127_vm1, %v7126_v48  ;;  %v5869_v52 = vld [vmem:[%s8084_s6 + $0x8] sm:$0xff] }
 0x445   :  { %6422 = vmatprep.subr.mxu0 %v7126_v48 }
 0x447   :  { %6410 = vmatmul.mubr.msk.f32.vlgmr.msra.gmra.mrb[6].mxu0 %vm71_vm0, %v7299_v46 }
 0x448   :  { %6424 = vmatprep.mubr.msk.f32.mxu0 %vm7127_vm1, %v7126_v48 }
 0x50a   :  { %v7402_v53 = vpop.f32.mrb[2].mxu0 }
 0x50b   :  { %v6373_v54 = vpop.f32.mrb[3].mxu0 }
 0x50c   :  { %v715_v54 = vld [vmem:[%s8084_s6] sm:$0xff] }
 0x50e   :  { %v7404_v55 = vpop.f32.mrb[8].mxu1 }
 0x50f   :  { %v6378_v56 = vpop.f32.mrb[9].mxu1 }
 0x512   :  { %v6389_v57 = vpop.f32.mrb[4].mxu0 }
 0x513   :  { %v795_v58 = vpop.f32.mrb[5].mxu0  ;;  %v801_v5 = vadd.f32 %v6389_v57, %v5844_v59  ;;  %v5882_v57 = vld [vmem:[%s8109_s26 + $0xc0] sm:$0xff] }
 0x514   :  { %v796_v62 = vadd.f32 %v5844_v59, %v795_v58  ;;  %v5883_v58 = vld [vmem:[%s8109_s26 + $0xc8] sm:$0xff] }
 0x515   :  { %v981_v11 = vmul.f32 0.17677669, %v801_v5 }
 0x516   :  { %v6400_v61 = vpop.f32.mrb[10].mxu1  ;;  %v980_v6 = vmul.f32 0.17677669, %v796_v62 }
 0x517   :  { %v883_v63 = vpop.f32.mrb[11].mxu1  ;;  %v889_v9 = vadd.f32 %v6400_v61, %v5852_v60 }
 0x518   :  { %v884_v2 = vadd.f32 %v5852_v60, %v883_v63  ;;  %v6876_v60 = vpack.c.bf16 %v5883_v58, %v5882_v57  ;;  %v5884_v63 = vld [vmem:[%s8109_s26 + $0xd0] sm:$0xff]  ;;  %v5924_v57 = vld [vmem:[%s8109_s26 + $0x168] sm:$0xff] }
 0x51a   :  { %v6411_v4 = vpop.f32.mrb[6].mxu0  ;;  %6413 = vmatpush3.xpose.msk.msra.mxu1 %vm390_vm2, %v884_v2  ;;  %v5885_v2 = vld [vmem:[%s8109_s26 + $0xd8] sm:$0xff] }
 0x51b   :  { %v971_v8 = vpop.f32.mrb[7].mxu0  ;;  %6417 = vmatprep.subr.mxu1 %v7126_v48  ;;  %v977_v12 = vadd.f32 %v6411_v4, %v5860_v3 }
 0x51c   :  { %v972_v10 = vadd.f32 %v5860_v3, %v971_v8  ;;  %v6880_v3 = vpack.c.bf16 %v5885_v2, %v5884_v63  ;;  %v5887_v8 = vld [vmem:[%s8112_s5 + $0x6] ss:$0 sm:$0xff]  ;;  %v5916_v63 = vld [vmem:[%s8109_s26 + $0xe8] sm:$0xff] }
 0x51d   :  { %6415 = vmatmul.mubr.msk.f32.vlgmr.msra.gmra.mrb[12].mxu1 %vm390_vm2, %v980_v6 }
 0x51e   :  { %6418 = vmatpush3.xpose.msk.msra.mxu1 %vm390_vm2, %v889_v9  ;;  %6423 = vmatpush3.msra.mxu0 %v972_v10 }
 0x51f   :  { %6419 = vmatprep.mubr.msk.f32.mxu1 %vm7127_vm1, %v7126_v48  ;;  %6427 = vmatprep.subr.mxu1 %v7126_v48 }
 0x520   :  { %6432 = vmatprep.subr.mxu0 %v5869_v52 }
 0x521   :  { %6420 = vmatmul.mubr.msk.f32.vlgmr.msra.gmra.mrb[14].mxu1 %vm390_vm2, %v981_v11 }
 0x522   :  { %6428 = vmatpush3.msra.mxu1 %v977_v12  ;;  %6429 = vmatprep.mubr.msk.f32.mxu1 %vm7127_vm1, %v7126_v48 }
 0x523   :  { %6869 = vmatprep.subr.bf16.mxu1 %v6868_v33 }
 0x5f0   :  { %v1054_v13 = vpop.f32.mrb[12].mxu1 }
 0x5f1   :  { %v1134_v14 = vsel %vm7334_vm3, -100000.0, %v1054_v13  ;;  %v6416_v15 = vpop.f32.mrb[13].mxu1 }
 0x5f2   :  { %v1136_v16 = vsel %vm390_vm2, %v1134_v14, -inf }
 0x5f3   :  { %1137 = vmax.xlane.f32.xlu0 %v1136_v16 }
 0x5f4   :  { %v1130_v17 = vpop.f32.mrb[14].mxu1 }
 0x5f5   :  { %v1135_v18 = vsel %vm7334_vm3, -100000.0, %v1130_v17  ;;  %v6421_v19 = vpop.f32.mrb[15].mxu1 }
 0x5f6   :  { %v1139_v20 = vsel %vm390_vm2, %v1135_v18, -inf }
 0x5f7   :  { %1140 = vmax.xlane.f32.xlu1 %v1139_v20 }
 0x680   :  { %v1138_v21 = vpop.xlane.xlu0 %1137 }
 0x681   :  { %v1142_v22 = vsub.f32 %v1134_v14, %v1138_v21  ;;  %v5895_v14 = vld [vmem:[%s8112_s5 + $0xa] ss:$0 sm:$0xff] }
 0x683   :  { %v1144_v23 = vmul.f32 1.442695, %v1142_v22 }
 0x684   :  { %v1141_v24 = vpop.xlane.xlu1 %1140 }
 0x685   :  { %7062 = vpow2.f32 %v1144_v23  ;;  %v1143_v25 = vsub.f32 %v1135_v18, %v1141_v24 }
 0x687   :  { %v1146_v26 = vmul.f32 1.442695, %v1143_v25 }
 0x689   :  { %7064 = vpow2.f32 %v1146_v26 }
 0x68f   :  { %v7063_v27 = vpop.eup %7062 }
 0x690   :  { %v1148_v28 = vsel %vm390_vm2, %v7063_v27, 0.0 }
 0x691   :  { %1149 = vadd.xlane.f32.xlu0 %v1148_v28 }
 0x693   :  { %v7065_v29 = vpop.eup %7064 }
 0x694   :  { %v1151_v30 = vsel %vm390_vm2, %v7065_v29, 0.0 }
 0x695   :  { %1152 = vadd.xlane.f32.xlu1 %v1151_v30 }
 0x71e   :  { %v1150_v34 = vpop.xlane.xlu0 %1149 }
 0x71f   :  { %7066 = vrcp.f32 %v1150_v34 }
 0x722   :  { %v1153_v35 = vpop.xlane.xlu1 %1152 }
 0x723   :  { %7068 = vrcp.f32 %v1153_v35 }
 0x729   :  { %v7067_v36 = vpop.eup %7066 }
 0x72a   :  { %v1156_v37 = vmul.f32 %v7067_v36, %v7063_v27 }
 0x72c   :  { %6425 = vmatmul.mubr.msk.f32.vlgmr.msra.gmra.mrb[8].mxu0 %vm390_vm2, %v1156_v37 }
 0x72d   :  { %v7069_v40 = vpop.eup %7068  ;;  %6433 = vmatpush3.msra.mxu0 %v5869_v52 }
 0x72e   :  { %v1157_v42 = vmul.f32 %v7069_v40, %v7065_v29  ;;  %6437 = vmatprep.subr.mxu0 %v715_v54  ;;  %v6892_v40 = vpack.c.bf16 %v5908_v39, %v5907_v38 }
 0x730   :  { %6430 = vmatmul.mubr.msk.f32.vlgmr.msra.gmra.mrb[16].mxu1 %vm390_vm2, %v1157_v42  ;;  %v5904_v42 = vld [vmem:[%s8084_s6 + $0x10] sm:$0xff] }
 0x731   :  { %6871 = vmatpush3.bf16.msra.mxu1 %v6868_v33  ;;  %6450 = vmatprep.mubr.msk.f32.mxu1 %vm71_vm0, %v7287_v41 }
 0x732   :  { %6873 = vmatprep.subr.bf16.mxu1 %v6872_v43 }
 0x735   :  { %6875 = vmatpush3.bf16.msra.mxu1 %v6872_v43 }
 0x736   :  { %6885 = vmatprep.subr.bf16.mxu1 %v6884_v47 }
 0x738   :  { %6451 = vmatmul.mubr.msk.f32.vlgmr.msra.gmra.mrb[18].mxu1 %vm71_vm0, %v7299_v46 }
 0x739   :  { %6887 = vmatpush3.bf16.msra.mxu1 %v6884_v47  ;;  %6472 = vmatprep.mubr.msk.f32.mxu1 %vm71_vm0, %v7287_v41  ;;  %v5910_v47 = vld [vmem:[%s8109_s26 + $0x78] sm:$0xff] }
 0x73a   :  { %6889 = vmatprep.subr.bf16.mxu1 %v6888_v51  ;;  %v6896_v52 = vpack.c.bf16 %v5910_v47, %v5909_v45 }
 0x73d   :  { %6891 = vmatpush3.bf16.msra.mxu1 %v6888_v51 }
 0x73e   :  { %6480 = vmatprep.subr.mxu1 %v7126_v48 }
 0x740   :  { %6473 = vmatmul.mubr.msk.f32.vlgmr.msra.gmra.mrb[20].mxu1 %vm71_vm0, %v7299_v46 }
 0x741   :  { %6482 = vmatprep.mubr.msk.f32.mxu1 %vm7127_vm1, %v7126_v48 }
 0x7ff   :  { %v1227_v56 = vpop.f32.mrb[8].mxu0 }
 0x800   :  { %v6426_v59 = vpop.f32.mrb[9].mxu0  ;;  %6434 = vmatprep.mubr.msk.f32.mxu0 %vm390_vm2, %v1227_v56  ;;  %v5923_v56 = vld [vmem:[%s8109_s26 + $0x160] sm:$0xff] }
 0x801   :  { %v6908_v58 = vpack.c.bf16 %v5924_v57, %v5923_v56  ;;  %v5925_v59 = vld [vmem:[%s8109_s26 + $0x170] sm:$0xff]  ;;  %v5940_v57 = vld [vmem:[%s8085_s7] ss:$0 sm:$0xff] }
 0x803   :  { %v1300_v61 = vpop.f32.mrb[16].mxu1 }
 0x804   :  { %v6431_v62 = vpop.f32.mrb[17].mxu1  ;;  %6435 = vmatmul.mubr.msk.f32.vlgmr.msra.gmra.mrb[10].mxu0 %vm390_vm2, %v1300_v61 }
 0x805   :  { %6438 = vmatpush3.msra.mxu0 %v715_v54  ;;  %6439 = vmatprep.mubr.msk.f32.mxu0 %vm390_vm2, %v7402_v53  ;;  %v5915_v62 = vld [vmem:[%s8109_s26 + $0xe0] sm:$0xff] }
 0x806   :  { %6877 = vmatprep.subr.bf16.mxu0 %v6876_v60  ;;  %v6900_v2 = vpack.c.bf16 %v5916_v63, %v5915_v62 }
 0x80b   :  { %v6452_v4 = vpop.f32.mrb[18].mxu1 }
 0x80c   :  { %v1547_v5 = vpop.f32.mrb[19].mxu1  ;;  %6440 = vmatmul.mubr.msk.f32.vlgmr.msra.gmra.mrb[10].mxu0 %vm390_vm2, %v7404_v55  ;;  %v5879_v55 = vld [vmem:[%s8112_s5 + $0x2] ss:$0 sm:$0xff] }
 0x80d   :  { %6879 = vmatpush3.bf16.msra.mxu0 %v6876_v60  ;;  %6461 = vmatprep.mubr.msk.f32.mxu0 %vm71_vm0, %v7287_v41  ;;  %v1553_v9 = vadd.f32 %v6452_v4, %v5879_v55  ;;  %v1548_v11 = vadd.f32 %v5879_v55, %v1547_v5  ;;  %v5926_v60 = vld [vmem:[%s8109_s26 + $0x178] sm:$0xff] }
 0x80e   :  { %6881 = vmatprep.subr.bf16.mxu0 %v6880_v3  ;;  %v6912_v61 = vpack.c.bf16 %v5926_v60, %v5925_v59  ;;  %v5918_v4 = vld [vmem:[%s8109_s26 + $0xf8] sm:$0xff] }
 0x80f   :  { %v1733_v16 = vmul.f32 0.17677669, %v1553_v9  ;;  %v1732_v17 = vmul.f32 0.17677669, %v1548_v11  ;;  %v5928_v11 = vld [vmem:[%s8112_s5 + $0xb] ss:$0 sm:$0xff] }
 0x811   :  { %6883 = vmatpush3.bf16.msra.mxu0 %v6880_v3  ;;  %v5917_v3 = vld [vmem:[%s8109_s26 + $0xf0] sm:$0xff] }
 0x812   :  { %6475 = vmatprep.subr.mxu0 %v7126_v48  ;;  %v6904_v55 = vpack.c.bf16 %v5918_v4, %v5917_v3 }
 0x813   :  { %v6474_v53 = vpop.f32.mrb[20].mxu1 }
 0x814   :  { %6462 = vmatmul.mubr.msk.f32.vlgmr.msra.gmra.mrb[12].mxu0 %vm71_vm0, %v7299_v46  ;;  %v1723_v6 = vpop.f32.mrb[21].mxu1  ;;  %v1729_v18 = vadd.f32 %v6474_v53, %v5895_v14 }
 0x815   :  { %6477 = vmatprep.mubr.msk.f32.mxu0 %vm7127_vm1, %v7126_v48  ;;  %v1724_v19 = vadd.f32 %v5895_v14, %v1723_v6 }
 0x8e7   :  { %v6463_v10 = vpop.f32.mrb[12].mxu0 }
 0x8e8   :  { %v1641_v12 = vadd.f32 %v6463_v10, %v5887_v8  ;;  %v1635_v13 = vpop.f32.mrb[13].mxu0 }
 0x8e9   :  { %v1636_v15 = vadd.f32 %v5887_v8, %v1635_v13 }
 0x8ea   :  { %6481 = vmatpush3.xpose.msk.msra.mxu1 %vm390_vm2, %v1641_v12 }
 0x8eb   :  { %6476 = vmatpush3.xpose.msk.msra.mxu0 %vm390_vm2, %v1636_v15  ;;  %6490 = vmatprep.subr.mxu1 %v7126_v48  ;;  %v5912_v15 = vld [vmem:[%s8112_s5 + $0x3] ss:$0 sm:$0xff] }
 0x8ec   :  { %6485 = vmatprep.subr.mxu0 %v7126_v48 }
 0x8ed   :  { %6483 = vmatmul.mubr.msk.f32.vlgmr.msra.gmra.mrb[22].mxu1 %vm390_vm2, %v1733_v16 }
 0x8ee   :  { %6478 = vmatmul.mubr.msk.f32.vlgmr.msra.gmra.mrb[14].mxu0 %vm390_vm2, %v1732_v17  ;;  %6491 = vmatpush3.msra.mxu1 %v1729_v18 }
 0x8ef   :  { %6486 = vmatpush3.msra.mxu0 %v1724_v19  ;;  %6492 = vmatprep.mubr.msk.f32.mxu1 %vm7127_vm1, %v7126_v48 }
 0x8f0   :  { %6487 = vmatprep.mubr.msk.f32.mxu0 %vm7127_vm1, %v7126_v48  ;;  %6893 = vmatprep.subr.bf16.mxu1 %v6892_v40 }
 0x8f1   :  { %6495 = vmatprep.subr.mxu0 %v5904_v42 }
 0x9c0   :  { %v1882_v20 = vpop.f32.mrb[22].mxu1 }
 0x9c1   :  { %v1887_v21 = vsel %vm7334_vm3, -100000.0, %v1882_v20  ;;  %v1806_v22 = vpop.f32.mrb[14].mxu0  ;;  %v6484_v23 = vpop.f32.mrb[23].mxu1 }
 0x9c2   :  { %v1886_v24 = vsel %vm7334_vm3, -100000.0, %v1806_v22  ;;  %v6479_v25 = vpop.f32.mrb[15].mxu0  ;;  %v1891_v26 = vsel %vm390_vm2, %v1887_v21, -inf }
 0x9c3   :  { %1892 = vmax.xlane.f32.xlu1 %v1891_v26  ;;  %v1888_v27 = vsel %vm390_vm2, %v1886_v24, -inf }
 0x9c4   :  { %1889 = vmax.xlane.f32.xlu0 %v1888_v27 }
 0xa50   :  { %v1893_v28 = vpop.xlane.xlu1 %1892 }
 0xa51   :  { %v1895_v29 = vsub.f32 %v1887_v21, %v1893_v28  ;;  %v1890_v30 = vpop.xlane.xlu0 %1889 }
 0xa52   :  { %v1894_v31 = vsub.f32 %v1886_v24, %v1890_v30 }
 0xa53   :  { %v1898_v32 = vmul.f32 1.442695, %v1895_v29 }
 0xa54   :  { %v1896_v33 = vmul.f32 1.442695, %v1894_v31 }
 0xa55   :  { %7070 = vpow2.f32 %v1898_v32 }
 0xa56   :  { %7072 = vpow2.f32 %v1896_v33 }
 0xa5f   :  { %v7071_v34 = vpop.eup %7070 }
 0xa60   :  { %v7073_v35 = vpop.eup %7072  ;;  %v1903_v36 = vsel %vm390_vm2, %v7071_v34, 0.0 }
 0xa61   :  { %1904 = vadd.xlane.f32.xlu1 %v1903_v36  ;;  %v1900_v37 = vsel %vm390_vm2, %v7073_v35, 0.0 }
 0xa62   :  { %1901 = vadd.xlane.f32.xlu0 %v1900_v37 }
 0xaee   :  { %v1905_v43 = vpop.xlane.xlu1 %1904 }
 0xaef   :  { %7074 = vrcp.f32 %v1905_v43  ;;  %v1902_v44 = vpop.xlane.xlu0 %1901 }
 0xaf0   :  { %7076 = vrcp.f32 %v1902_v44 }
 0xaf9   :  { %v7075_v49 = vpop.eup %7074 }
 0xafa   :  { %v7077_v50 = vpop.eup %7076  ;;  %v1909_v51 = vmul.f32 %v7075_v49, %v7071_v34 }
 0xafb   :  { %v1908_v54 = vmul.f32 %v7077_v50, %v7073_v35  ;;  %v5937_v50 = vld [vmem:[%s8084_s6 + $0x18] sm:$0xff] }
 0xafc   :  { %6493 = vmatmul.mubr.msk.f32.vlgmr.msra.gmra.mrb[24].mxu1 %vm390_vm2, %v1909_v51 }
 0xafd   :  { %6895 = vmatpush3.bf16.msra.mxu1 %v6892_v40  ;;  %6488 = vmatmul.mubr.msk.f32.vlgmr.msra.gmra.mrb[16].mxu0 %vm390_vm2, %v1908_v54 }
 0xafe   :  { %6508 = vmatprep.mubr.msk.f32.mxu1 %vm71_vm0, %v7287_v41  ;;  %6897 = vmatprep.subr.bf16.mxu1 %v6896_v52 }
 0xaff   :  { %6496 = vmatpush3.msra.mxu0 %v5904_v42 }
 0xb00   :  { %6901 = vmatprep.subr.bf16.mxu0 %v6900_v2 }
 0xb01   :  { %6899 = vmatpush3.bf16.msra.mxu1 %v6896_v52 }
 0xb02   :  { %6909 = vmatprep.subr.bf16.mxu1 %v6908_v58 }
 0xb04   :  { %6509 = vmatmul.mubr.msk.f32.vlgmr.msra.gmra.mrb[26].mxu1 %vm71_vm0, %v7299_v46 }
 0xb05   :  { %6911 = vmatpush3.bf16.msra.mxu1 %v6908_v58  ;;  %6530 = vmatprep.mubr.msk.f32.mxu1 %vm71_vm0, %v7287_v41 }
 0xb06   :  { %6913 = vmatprep.subr.bf16.mxu1 %v6912_v61 }
 0xb09   :  { %6915 = vmatpush3.bf16.msra.mxu1 %v6912_v61 }
 0xb0a   :  { %6543 = vmatprep.subr.mxu1 %v7126_v48 }
 0xb0c   :  { %6531 = vmatmul.mubr.msk.f32.vlgmr.msra.gmra.mrb[28].mxu1 %vm71_vm0, %v7299_v46 }
 0xb0d   :  { %6545 = vmatprep.mubr.msk.f32.mxu1 %vm7127_vm1, %v7126_v48 }
 0xbcf   :  { %v2052_v5 = vpop.f32.mrb[24].mxu1 }
 0xbd0   :  { %v1979_v53 = vpop.f32.mrb[16].mxu0  ;;  %v6494_v6 = vpop.f32.mrb[25].mxu1 }
 0xbd1   :  { %v6489_v8 = vpop.f32.mrb[17].mxu0  ;;  %6497 = vmatprep.mubr.msk.f32.mxu0 %vm390_vm2, %v1979_v53 }
 0xbd2   :  { %6498 = vmatmul.mubr.msk.f32.vlgmr.msra.gmra.mrb[10].mxu0 %vm390_vm2, %v2052_v5 }
 0xbd3   :  { %6903 = vmatpush3.bf16.msra.mxu0 %v6900_v2  ;;  %6519 = vmatprep.mubr.msk.f32.mxu0 %vm71_vm0, %v7287_v41 }
 0xbd4   :  { %6905 = vmatprep.subr.bf16.mxu0 %v6904_v55 }
 0xbd7   :  { %v6510_v9 = vpop.f32.mrb[26].mxu1  ;;  %6907 = vmatpush3.bf16.msra.mxu0 %v6904_v55 }
 0xbd8   :  { %v2220_v10 = vpop.f32.mrb[27].mxu1  ;;  %6533 = vmatprep.subr.mxu0 %v7126_v48  ;;  %v2226_v20 = vadd.f32 %v6510_v9, %v5912_v15 }
 0xbd9   :  { %v2221_v17 = vadd.f32 %v5912_v15, %v2220_v10 }
 0xbda   :  { %6520 = vmatmul.mubr.msk.f32.vlgmr.msra.gmra.mrb[18].mxu0 %vm71_vm0, %v7299_v46  ;;  %v5920_v46 = vld [vmem:[%s8112_s5 + $0x7] ss:$0 sm:$0xff]  ;;  %v2406_v23 = vmul.f32 0.17677669, %v2226_v20 }
 0xbdb   :  { %6535 = vmatprep.mubr.msk.f32.mxu0 %vm7127_vm1, %v7126_v48  ;;  %v2405_v21 = vmul.f32 0.17677669, %v2221_v17 }
 0xbdf   :  { %v6532_v12 = vpop.f32.mrb[28].mxu1 }
 0xbe0   :  { %v2402_v13 = vadd.f32 %v6532_v12, %v5928_v11  ;;  %v2396_v14 = vpop.f32.mrb[29].mxu1  ;;  %v5947_v12 = vld [vmem:[%s8086_s10 + $0x88] sm:$0xff] }
 0xbe1   :  { %v2397_v41 = vadd.f32 %v5928_v11, %v2396_v14  ;;  %v5946_v11 = vld [vmem:[%s8086_s10 + $0x80] sm:$0xff] }
 0xbe2   :  { %v2869_v14 = vld [vmem:[%s8086_s10] sm:$0xff] }
 0xbe3   :  { %6544 = vmatpush3.msra.mxu1 %v2397_v41  ;;  %v2870_v41 = vld [vmem:[%s8086_s10 + $0x8] sm:$0xff] }
 0xbe4   :  { %v6916_v15 = vpack.c.bf16 %v2870_v41, %v2869_v14 }
 0xbe6   :  { %6917 = vmatprep.subr.bf16.mxu1 %v6916_v15 }
 0xcad   :  { %v6521_v16 = vpop.f32.mrb[18].mxu0 }
 0xcae   :  { %v2308_v18 = vpop.f32.mrb[19].mxu0  ;;  %v2314_v22 = vadd.f32 %v6521_v16, %v5920_v46  ;;  %v5949_v16 = vld [vmem:[%s8086_s10 + $0x98] sm:$0xff] }
 0xcaf   :  { %v2309_v19 = vadd.f32 %v5920_v46, %v2308_v18  ;;  %v5948_v46 = vld [vmem:[%s8086_s10 + $0x90] sm:$0xff] }
 0xcb0   :  { %v6928_v17 = vpack.c.bf16 %v5949_v16, %v5948_v46  ;;  %v2871_v18 = vld [vmem:[%s8086_s10 + $0x10] sm:$0xff] }
 0xcb1   :  { %6534 = vmatpush3.xpose.msk.msra.mxu0 %vm390_vm2, %v2309_v19  ;;  %v2872_v19 = vld [vmem:[%s8086_s10 + $0x18] sm:$0xff] }
 0xcb2   :  { %6538 = vmatprep.subr.mxu0 %v7126_v48  ;;  %v6920_v20 = vpack.c.bf16 %v2872_v19, %v2871_v18  ;;  %v5977_v18 = vld [vmem:[%s8086_s10 + $0xa8] sm:$0xff] }
 0xcb4   :  { %6536 = vmatmul.mubr.msk.f32.vlgmr.msra.gmra.mrb[20].mxu0 %vm390_vm2, %v2405_v21  ;;  %v7667_v21 = vld [vmem:[%s8087_s1] sm:$0xff] }
 0xcb5   :  { %6539 = vmatpush3.xpose.msk.msra.mxu0 %vm390_vm2, %v2314_v22  ;;  %6540 = vmatprep.mubr.msk.f32.mxu0 %vm7127_vm1, %v7126_v48  ;;  %v7674_v22 = vld [vmem:[%s8087_s1 + $0x8] sm:$0xff] }
 0xcb6   :  { %6548 = vmatprep.subr.mxu0 %v7126_v48 }
 0xcb8   :  { %6541 = vmatmul.mubr.msk.f32.vlgmr.msra.gmra.mrb[22].mxu0 %vm390_vm2, %v2406_v23  ;;  %v5954_v23 = vld [vmem:[%s8086_s10 + $0x100] sm:$0xff] }
 0xcb9   :  { %6549 = vmatpush3.msra.mxu0 %v2402_v13  ;;  %6550 = vmatprep.mubr.msk.f32.mxu0 %vm7127_vm1, %v7126_v48  ;;  %v6924_v13 = vpack.c.bf16 %v5947_v12, %v5946_v11 }
 0xcba   :  { %6553 = vmatprep.subr.mxu0 %v5937_v50 }
 0xd87   :  { %v2479_v24 = vpop.f32.mrb[20].mxu0 }
 0xd88   :  { %v2559_v25 = vsel %vm7334_vm3, -100000.0, %v2479_v24  ;;  %v6537_v26 = vpop.f32.mrb[21].mxu0  ;;  %v5955_v24 = vld [vmem:[%s8086_s10 + $0x108] sm:$0xff] }
 0xd89   :  { %v2561_v27 = vsel %vm390_vm2, %v2559_v25, -inf }
 0xd8a   :  { %2562 = vmax.xlane.f32.xlu0 %v2561_v27 }
 0xd8b   :  { %v2555_v28 = vpop.f32.mrb[22].mxu0 }
 0xd8c   :  { %v2560_v29 = vsel %vm7334_vm3, -100000.0, %v2555_v28  ;;  %v6542_v30 = vpop.f32.mrb[23].mxu0 }
 0xd8d   :  { %v2564_v31 = vsel %vm390_vm2, %v2560_v29, -inf }
 0xd8e   :  { %2565 = vmax.xlane.f32.xlu1 %v2564_v31 }
 0xe17   :  { %v2563_v32 = vpop.xlane.xlu0 %2562 }
 0xe18   :  { %v2567_v33 = vsub.f32 %v2559_v25, %v2563_v32  ;;  %v6932_v25 = vpack.c.bf16 %v5955_v24, %v5954_v23  ;;  %v5969_v23 = vld [vmem:[%s8086_s10 + $0x28] sm:$0xff] }
 0xe1a   :  { %v2569_v34 = vmul.f32 1.442695, %v2567_v33  ;;  %v5941_v33 = vld [vmem:[%s8088_s8] ss:$0 sm:$0xff] }
 0xe1b   :  { %v2566_v35 = vpop.xlane.xlu1 %2565 }
 0xe1c   :  { %7078 = vpow2.f32 %v2569_v34  ;;  %v2568_v36 = vsub.f32 %v2560_v29, %v2566_v35 }
 0xe1e   :  { %v2571_v37 = vmul.f32 1.442695, %v2568_v36 }
 0xe20   :  { %7080 = vpow2.f32 %v2571_v37  ;;  %v5942_v37 = vld [vmem:[%s8089_s9] ss:$0 sm:$0xff] }
 0xe26   :  { %v7079_v38 = vpop.eup %7078 }
 0xe27   :  { %v2573_v39 = vsel %vm390_vm2, %v7079_v38, 0.0 }
 0xe28   :  { %2574 = vadd.xlane.f32.xlu0 %v2573_v39 }
 0xe2a   :  { %v7081_v40 = vpop.eup %7080 }
 0xe2b   :  { %v2576_v7 = vsel %vm390_vm2, %v7081_v40, 0.0 }
 0xe2c   :  { %2577 = vadd.xlane.f32.xlu1 %v2576_v7  ;;  %v5957_v7 = vld [vmem:[%s8086_s10 + $0x118] sm:$0xff] }
 0xeb5   :  { %v2575_v42 = vpop.xlane.xlu0 %2574 }
 0xeb6   :  { %7082 = vrcp.f32 %v2575_v42 }
 0xeb9   :  { %v2578_v43 = vpop.xlane.xlu1 %2577 }
 0xeba   :  { %7084 = vrcp.f32 %v2578_v43 }
 0xec0   :  { %v7083_v44 = vpop.eup %7082 }
 0xec1   :  { %v2581_v45 = vmul.f32 %v7083_v44, %v7079_v38 }
 0xec3   :  { %6546 = vmatmul.mubr.msk.f32.vlgmr.msra.gmra.mrb[30].mxu1 %vm390_vm2, %v2581_v45  ;;  %v5951_v45 = vld [vmem:[%s8090_s11 + $0x4] ss:$0 sm:$0xff] }
 0xec4   :  { %v7085_v47 = vpop.eup %7084  ;;  %6919 = vmatpush3.bf16.msra.mxu1 %v6916_v15 }
 0xec5   :  { %v2582_v49 = vmul.f32 %v7085_v47, %v7081_v40  ;;  %6921 = vmatprep.subr.bf16.mxu1 %v6920_v20  ;;  %v5956_v40 = vld [vmem:[%s8086_s10 + $0x110] sm:$0xff] }
 0xec6   :  { %v6936_v44 = vpack.c.bf16 %v5957_v7, %v5956_v40  ;;  %v5981_v7 = vld [vmem:[%s8090_s11 + $0x5] ss:$0 sm:$0xff] }
 0xec7   :  { %6551 = vmatmul.mubr.msk.f32.vlgmr.msra.gmra.mrb[24].mxu0 %vm390_vm2, %v2582_v49 }
 0xec8   :  { %6554 = vmatpush3.msra.mxu0 %v5937_v50  ;;  %6923 = vmatpush3.bf16.msra.mxu1 %v6920_v20  ;;  %v5968_v20 = vld [vmem:[%s8086_s10 + $0x20] sm:$0xff] }
 0xec9   :  { %6925 = vmatprep.subr.bf16.mxu0 %v6924_v13  ;;  %6933 = vmatprep.subr.bf16.mxu1 %v6932_v25  ;;  %v6940_v24 = vpack.c.bf16 %v5969_v23, %v5968_v20  ;;  %v6003_v23 = vld [vmem:[%s8086_s10 + $0x40] sm:$0xff] }
 0xf96   :  { %v2652_v51 = vpop.f32.mrb[30].mxu1 }
 0xf97   :  { %v6547_v52 = vpop.f32.mrb[31].mxu1  ;;  %6555 = vmatprep.mubr.msk.f32.mxu0 %vm390_vm2, %v2652_v51 }
 0xf98   :  { %v5943_v52 = vld [vmem:[%s8090_s11] ss:$0 sm:$0xff] }
 0xf9a   :  { %v2725_v54 = vpop.f32.mrb[24].mxu0 }
 0xf9b   :  { %v6552_v56 = vpop.f32.mrb[25].mxu0  ;;  %6556 = vmatmul.mubr.msk.f32.vlgmr.msra.gmra.mrb[10].mxu0 %vm390_vm2, %v2725_v54 }
 0xf9c   :  { %6927 = vmatpush3.bf16.msra.mxu0 %v6924_v13  ;;  %6577 = vmatprep.mubr.msk.f32.mxu0 %vm71_vm0, %v7667_v21 }
 0xf9d   :  { %6929 = vmatprep.subr.bf16.mxu0 %v6928_v17 }
 0xfa0   :  { %6931 = vmatpush3.bf16.msra.mxu0 %v6928_v17  ;;  %v5976_v17 = vld [vmem:[%s8086_s10 + $0xa0] sm:$0xff] }
 0xfa1   :  { %6591 = vmatprep.subr.mxu0 %v7126_v48  ;;  %v6948_v19 = vpack.c.bf16 %v5977_v18, %v5976_v17  ;;  %v5989_v17 = vld [vmem:[%s8090_s11 + $0x9] ss:$0 sm:$0xff] }
 0xfa3   :  { %6578 = vmatmul.mubr.msk.f32.vlgmr.msra.gmra.mrb[26].mxu0 %vm71_vm0, %v7674_v22 }
 0xfa4   :  { %6593 = vmatprep.mubr.msk.f32.mxu0 %vm7127_vm1, %v7126_v48 }
0x106e   :  { %v6557_v58 = vpop.f32.mrb[10].mxu0 }
0x106f   :  { %v2822_v59 = vadd.f32 %v6557_v58, %v5940_v57  ;;  %v2803_v60 = vpop.f32.mrb[11].mxu0 }
0x1070   :  { %v2821_v61 = vadd.f32 %v5940_v57, %v2803_v60 }
0x1071   :  { %v7627_v62 = vadd.f32 %v2822_v59, %v7241_v1 }
0x1072   :  { %v7630_v63 = vadd.f32 %v2821_v61, %v7236_v0  ;;  %v5959_v61 = vld [vmem:[%s8090_s11 + $0x8] ss:$0 sm:$0xff] }
0x1073   :  { %v2830_v2 = vsel %vm71_vm0, %v7627_v62, 0.0 }
0x1074   :  { %2831 = vadd.xlane.f32.xlu1 %v2830_v2  ;;  %v2827_v3 = vsel %vm71_vm0, %v7630_v63, 0.0 }
0x1075   :  { %2828 = vadd.xlane.f32.xlu0 %v2827_v3 }
0x1076   :  { %v6579_v47 = vpop.f32.mrb[26].mxu0 }
0x1077   :  { %v3052_v49 = vadd.f32 %v6579_v47, %v5951_v45  ;;  %v3046_v50 = vpop.f32.mrb[27].mxu0 }
0x1078   :  { %v3047_v51 = vadd.f32 %v5951_v45, %v3046_v50  ;;  %v5973_v45 = vld [vmem:[%s8090_s11 + $0x1] ss:$0 sm:$0xff] }
0x107a   :  { %6592 = vmatpush3.xpose.msk.msra.mxu0 %vm390_vm2, %v3047_v51 }
0x107b   :  { %6601 = vmatprep.subr.mxu0 %v7126_v48 }
0x1101   :  { %v2832_v4 = vpop.xlane.xlu1 %2831 }
0x1102   :  { %v2834_v5 = vmul.f32 0.03125, %v2832_v4  ;;  %v2829_v53 = vpop.xlane.xlu0 %2828 }
0x1103   :  { %v2833_v6 = vmul.f32 0.03125, %v2829_v53 }
0x1104   :  { %v2836_v55 = vsub.f32 %v7627_v62, %v2834_v5 }
0x1105   :  { %v2835_v1 = vsub.f32 %v7630_v63, %v2833_v6 }
0x1106   :  { %v2838_v8 = vmul.f32 %v2836_v55, %v2836_v55 }
0x1107   :  { %v2837_v9 = vmul.f32 %v2835_v1, %v2835_v1 }
0x1108   :  { %v2842_v0 = vsel %vm71_vm0, %v2838_v8, 0.0 }
0x1109   :  { %2843 = vadd.xlane.f32.xlu1 %v2842_v0  ;;  %v2839_v10 = vsel %vm71_vm0, %v2837_v9, 0.0 }
0x110a   :  { %2840 = vadd.xlane.f32.xlu0 %v2839_v10 }
0x1196   :  { %v2844_v26 = vpop.xlane.xlu1 %2843 }
0x1197   :  { %v2846_v27 = vmul.f32 0.03125, %v2844_v26  ;;  %v2841_v28 = vpop.xlane.xlu0 %2840 }
0x1198   :  { %v2845_v29 = vmul.f32 0.03125, %v2841_v28  ;;  %v5979_v28 = vld [vmem:[%s8086_s10 + $0xb8] sm:$0xff] }
0x1199   :  { %v2848_v30 = vadd.f32 1e-05, %v2846_v27  ;;  %v5978_v27 = vld [vmem:[%s8086_s10 + $0xb0] sm:$0xff] }
0x119a   :  { %v2847_v31 = vadd.f32 1e-05, %v2845_v29  ;;  %v5970_v29 = vld [vmem:[%s8086_s10 + $0x30] sm:$0xff] }
0x119b   :  { %7086 = vrsqrt.f32 %v2848_v30  ;;  %v5971_v30 = vld [vmem:[%s8086_s10 + $0x38] sm:$0xff] }
0x119c   :  { %7088 = vrsqrt.f32 %v2847_v31 }
0x11a5   :  { %v7087_v32 = vpop.eup %7086 }
0x11a6   :  { %v7089_v34 = vpop.eup %7088  ;;  %v2852_v35 = vmul.f32 %v7087_v32, %v2836_v55 }
0x11a7   :  { %v2851_v36 = vmul.f32 %v7089_v34, %v2835_v1 }
0x11a8   :  { %v2860_v38 = vmul.f32 %v5941_v33, %v2852_v35  ;;  %v6952_v35 = vpack.c.bf16 %v5979_v28, %v5978_v27 }
0x11a9   :  { %v2859_v39 = vmul.f32 %v5941_v33, %v2851_v36  ;;  %v6944_v36 = vpack.c.bf16 %v5971_v30, %v5970_v29  ;;  %v6005_v30 = vld [vmem:[%s8086_s10 + $0x50] sm:$0xff] }
0x11aa   :  { %v7701_v43 = vadd.f32 %v5942_v37, %v2860_v38 }
0x11ab   :  { %v7699_v42 = vadd.f32 %v5942_v37, %v2859_v39 }
0x11ad   :  { %6566 = vmatprep.mubr.msk.f32.mxu1 %vm71_vm0, %v7699_v42 }
0x11ae   :  { %6567 = vmatmul.mubr.msk.f32.vlgmr.msra.gmra.mrb[32].mxu1 %vm71_vm0, %v7701_v43 }
0x11af   :  { %6935 = vmatpush3.bf16.msra.mxu1 %v6932_v25  ;;  %6588 = vmatprep.mubr.msk.f32.mxu1 %vm71_vm0, %v7667_v21 }
0x11b0   :  { %6937 = vmatprep.subr.bf16.mxu1 %v6936_v44 }
0x11b3   :  { %6939 = vmatpush3.bf16.msra.mxu1 %v6936_v44 }
0x11b4   :  { %6596 = vmatprep.subr.mxu1 %v7126_v48 }
0x11b6   :  { %6589 = vmatmul.mubr.msk.f32.vlgmr.msra.gmra.mrb[34].mxu1 %vm71_vm0, %v7674_v22 }
0x11b7   :  { %6598 = vmatprep.mubr.msk.f32.mxu1 %vm7127_vm1, %v7126_v48 }
0x11bc   :  { %6597 = vmatpush3.xpose.msk.msra.mxu1 %vm390_vm2, %v3052_v49 }
0x11bd   :  { %6606 = vmatprep.subr.mxu1 %v7126_v48 }
0x1281   :  { %v6568_v54 = vpop.f32.mrb[32].mxu1 }
0x1282   :  { %v2958_v56 = vadd.f32 %v6568_v54, %v5943_v52  ;;  %v2952_v57 = vpop.f32.mrb[33].mxu1 }
0x1283   :  { %v2953_v58 = vadd.f32 %v5943_v52, %v2952_v57 }
0x1284   :  { %v3144_v59 = vmul.f32 0.17677669, %v2958_v56 }
0x1285   :  { %v3143_v60 = vmul.f32 0.17677669, %v2953_v58 }
0x1286   :  { %6599 = vmatmul.mubr.msk.f32.vlgmr.msra.gmra.mrb[36].mxu1 %vm390_vm2, %v3144_v59  ;;  %v5984_v59 = vld [vmem:[%s8086_s10 + $0x120] sm:$0xff] }
0x1287   :  { %6594 = vmatmul.mubr.msk.f32.vlgmr.msra.gmra.mrb[28].mxu0 %vm390_vm2, %v3143_v60  ;;  %6608 = vmatprep.mubr.msk.f32.mxu1 %vm7127_vm1, %v7126_v48  ;;  %v5985_v60 = vld [vmem:[%s8086_s10 + $0x128] sm:$0xff] }
0x1288   :  { %6603 = vmatprep.mubr.msk.f32.mxu0 %vm7127_vm1, %v7126_v48 }
0x1289   :  { %v6590_v2 = vpop.f32.mrb[34].mxu1 }
0x128a   :  { %v3140_v3 = vadd.f32 %v6590_v2, %v5959_v61  ;;  %v3134_v4 = vpop.f32.mrb[35].mxu1  ;;  %v6956_v2 = vpack.c.bf16 %v5985_v60, %v5984_v59  ;;  %v6014_v59 = vld [vmem:[%s8086_s10 + $0xd8] sm:$0xff] }
0x128b   :  { %v3135_v5 = vadd.f32 %v5959_v61, %v3134_v4  ;;  %v5986_v61 = vld [vmem:[%s8086_s10 + $0x130] sm:$0xff] }
0x128c   :  { %6607 = vmatpush3.msra.mxu1 %v3140_v3  ;;  %v5987_v3 = vld [vmem:[%s8086_s10 + $0x138] sm:$0xff] }
0x128d   :  { %6602 = vmatpush3.msra.mxu0 %v3135_v5  ;;  %6949 = vmatprep.subr.bf16.mxu1 %v6948_v19  ;;  %v6960_v4 = vpack.c.bf16 %v5987_v3, %v5986_v61 }
0x128e   :  { %6941 = vmatprep.subr.bf16.mxu0 %v6940_v24 }
0x1359   :  { %v3293_v53 = vpop.f32.mrb[36].mxu1 }
0x135a   :  { %v3217_v6 = vpop.f32.mrb[28].mxu0  ;;  %v6600_v55 = vpop.f32.mrb[37].mxu1  ;;  %v3300_v1 = vsel %vm390_vm2, %v3293_v53, -inf }
0x135b   :  { %3301 = vmax.xlane.f32.xlu0 %v3300_v1  ;;  %v6595_v8 = vpop.f32.mrb[29].mxu0  ;;  %v3297_v9 = vsel %vm390_vm2, %v3217_v6, -inf }
0x135c   :  { %3298 = vmax.xlane.f32.xlu1 %v3297_v9 }
0x13e8   :  { %v3302_v0 = vpop.xlane.xlu0 %3301 }
0x13e9   :  { %v3304_v10 = vsub.f32 %v3293_v53, %v3302_v0  ;;  %v3299_v11 = vpop.xlane.xlu1 %3298 }
0x13ea   :  { %v3303_v12 = vsub.f32 %v3217_v6, %v3299_v11 }
0x13eb   :  { %v3307_v13 = vmul.f32 1.442695, %v3304_v10 }
0x13ec   :  { %v3305_v14 = vmul.f32 1.442695, %v3303_v12 }
0x13ed   :  { %7090 = vpow2.f32 %v3307_v13 }
0x13ee   :  { %7092 = vpow2.f32 %v3305_v14 }
0x13f7   :  { %v7091_v41 = vpop.eup %7090 }
0x13f8   :  { %v7093_v15 = vpop.eup %7092  ;;  %v3312_v46 = vsel %vm390_vm2, %v7091_v41, 0.0 }
0x13f9   :  { %3313 = vadd.xlane.f32.xlu0 %v3312_v46  ;;  %v3309_v16 = vsel %vm390_vm2, %v7093_v15, 0.0 }
0x13fa   :  { %3310 = vadd.xlane.f32.xlu1 %v3309_v16 }
0x1486   :  { %v3314_v25 = vpop.xlane.xlu0 %3313 }
0x1487   :  { %7094 = vrcp.f32 %v3314_v25  ;;  %v3311_v26 = vpop.xlane.xlu1 %3310 }
0x1488   :  { %7096 = vrcp.f32 %v3311_v26 }
0x1491   :  { %v7095_v31 = vpop.eup %7094 }
0x1492   :  { %v7097_v32 = vpop.eup %7096  ;;  %v3318_v33 = vmul.f32 %v7095_v31, %v7091_v41  ;;  %v6006_v31 = vld [vmem:[%s8086_s10 + $0x58] sm:$0xff] }
0x1493   :  { %v3317_v34 = vmul.f32 %v7097_v32, %v7093_v15 }
0x1494   :  { %6609 = vmatmul.mubr.msk.f32.vlgmr.msra.gmra.mrb[38].mxu1 %vm390_vm2, %v3318_v33 }
0x1495   :  { %6951 = vmatpush3.bf16.msra.mxu1 %v6948_v19  ;;  %6604 = vmatmul.mubr.msk.f32.vlgmr.msra.gmra.mrb[30].mxu0 %vm390_vm2, %v3317_v34  ;;  %v6968_v34 = vpack.c.bf16 %v6006_v31, %v6005_v30  ;;  %v6037_v30 = vld [vmem:[%s8086_s10 + $0x68] sm:$0xff] }
0x1496   :  { %6943 = vmatpush3.bf16.msra.mxu0 %v6940_v24  ;;  %6619 = vmatprep.mubr.msk.f32.mxu0 %vm71_vm0, %v7699_v42  ;;  %v6004_v24 = vld [vmem:[%s8086_s10 + $0x48] sm:$0xff] }
0x1497   :  { %6953 = vmatprep.subr.bf16.mxu1 %v6952_v35  ;;  %6945 = vmatprep.subr.bf16.mxu0 %v6944_v36  ;;  %v6964_v25 = vpack.c.bf16 %v6004_v24, %v6003_v23 }
0x1498   :  { %6630 = vmatprep.mubr.msk.f32.mxu1 %vm71_vm0, %v7667_v21 }
0x1499   :  { %6955 = vmatpush3.bf16.msra.mxu1 %v6952_v35  ;;  %v5998_v35 = vld [vmem:[%s8091_s12 + $0x8] sm:$0xff] }
0x149a   :  { %6947 = vmatpush3.bf16.msra.mxu0 %v6944_v36  ;;  %6644 = vmatprep.subr.mxu1 %v7126_v48  ;;  %v3465_v36 = vld [vmem:[%s8091_s12] sm:$0xff] }
0x149b   :  { %6957 = vmatprep.subr.bf16.mxu0 %v6956_v2 }
0x149c   :  { %6631 = vmatmul.mubr.msk.f32.vlgmr.msra.gmra.mrb[40].mxu1 %vm71_vm0, %v7674_v22 }
0x149d   :  { %6620 = vmatmul.mubr.msk.f32.vlgmr.msra.gmra.mrb[32].mxu0 %vm71_vm0, %v7701_v43  ;;  %6646 = vmatprep.mubr.msk.f32.mxu1 %vm7127_vm1, %v7126_v48 }
0x149e   :  { %6641 = vmatprep.mubr.msk.f32.mxu0 %vm71_vm0, %v7667_v21  ;;  %6959 = vmatpush3.bf16.msra.mxu0 %v6956_v2 }
0x149f   :  { %6961 = vmatprep.subr.bf16.mxu0 %v6960_v4 }
0x14a2   :  { %6963 = vmatpush3.bf16.msra.mxu0 %v6960_v4  ;;  %v6016_v4 = vld [vmem:[%s8090_s11 + $0x6] ss:$0 sm:$0xff] }
0x14a3   :  { %6654 = vmatprep.subr.mxu0 %v7126_v48 }
0x14a5   :  { %6642 = vmatmul.mubr.msk.f32.vlgmr.msra.gmra.mrb[34].mxu0 %vm71_vm0, %v7674_v22 }
0x14a6   :  { %6656 = vmatprep.mubr.msk.f32.mxu0 %vm7127_vm1, %v7126_v48 }
0x1567   :  { %v7776_v37 = vpop.f32.mrb[38].mxu1 }
0x1568   :  { %v7778_v38 = vpop.f32.mrb[30].mxu0  ;;  %v6610_v39 = vpop.f32.mrb[39].mxu1 }
0x1569   :  { %v6605_v40 = vpop.f32.mrb[31].mxu0  ;;  %v6019_v39 = vld [vmem:[%s8086_s10 + $0x140] sm:$0xff] }
0x156a   :  { %v6020_v40 = vld [vmem:[%s8086_s10 + $0x148] sm:$0xff] }
0x156f   :  { %v6632_v44 = vpop.f32.mrb[40].mxu1 }
0x1570   :  { %v6621_v47 = vpop.f32.mrb[32].mxu0  ;;  %v3633_v49 = vpop.f32.mrb[41].mxu1  ;;  %v3639_v57 = vadd.f32 %v6632_v44, %v5981_v7  ;;  %v6980_v44 = vpack.c.bf16 %v6020_v40, %v6019_v39 }
0x1571   :  { %v3634_v50 = vadd.f32 %v5981_v7, %v3633_v49  ;;  %v3545_v51 = vpop.f32.mrb[33].mxu0  ;;  %v3551_v54 = vadd.f32 %v6621_v47, %v5973_v45  ;;  %v6021_v7 = vld [vmem:[%s8086_s10 + $0x150] sm:$0xff] }
0x1572   :  { %v3546_v52 = vadd.f32 %v5973_v45, %v3545_v51  ;;  %v6022_v45 = vld [vmem:[%s8086_s10 + $0x158] sm:$0xff]  ;;  %v6012_v51 = vld [vmem:[%s8086_s10 + $0xc8] sm:$0xff] }
0x1573   :  { %6645 = vmatpush3.xpose.msk.msra.mxu1 %vm390_vm2, %v3634_v50  ;;  %v3731_v58 = vmul.f32 0.17677669, %v3551_v54  ;;  %v6984_v47 = vpack.c.bf16 %v6022_v45, %v6021_v7  ;;  %v6011_v50 = vld [vmem:[%s8086_s10 + $0xc0] sm:$0xff] }
0x1574   :  { %v3730_v56 = vmul.f32 0.17677669, %v3546_v52  ;;  %6649 = vmatprep.subr.mxu1 %v7126_v48  ;;  %v6972_v54 = vpack.c.bf16 %v6012_v51, %v6011_v50 }
0x1576   :  { %6647 = vmatmul.mubr.msk.f32.vlgmr.msra.gmra.mrb[42].mxu1 %vm390_vm2, %v3730_v56 }
0x1577   :  { %6650 = vmatpush3.xpose.msk.msra.mxu1 %vm390_vm2, %v3639_v57  ;;  %6651 = vmatprep.mubr.msk.f32.mxu1 %vm7127_vm1, %v7126_v48 }
0x1578   :  { %6659 = vmatprep.subr.mxu1 %v7126_v48  ;;  %v6643_v16 = vpop.f32.mrb[34].mxu0 }
0x1579   :  { %v3721_v18 = vpop.f32.mrb[35].mxu0  ;;  %v3727_v20 = vadd.f32 %v6643_v16, %v5989_v17 }
0x157a   :  { %6652 = vmatmul.mubr.msk.f32.vlgmr.msra.gmra.mrb[44].mxu1 %vm390_vm2, %v3731_v58  ;;  %v3722_v19 = vadd.f32 %v5989_v17, %v3721_v18  ;;  %v6013_v58 = vld [vmem:[%s8086_s10 + $0xd0] sm:$0xff] }
0x157b   :  { %6661 = vmatprep.mubr.msk.f32.mxu1 %vm7127_vm1, %v7126_v48  ;;  %6660 = vmatpush3.msra.mxu1 %v3727_v20  ;;  %v6976_v60 = vpack.c.bf16 %v6014_v59, %v6013_v58 }
0x157c   :  { %6655 = vmatpush3.msra.mxu0 %v3722_v19  ;;  %6965 = vmatprep.subr.bf16.mxu1 %v6964_v25 }
0x157d   :  { %6664 = vmatprep.subr.mxu0 %v5998_v35 }
0x1649   :  { %v3804_v5 = vpop.f32.mrb[42].mxu1 }
0x164a   :  { %v6648_v53 = vpop.f32.mrb[43].mxu1  ;;  %v3884_v6 = vsel %vm390_vm2, %v3804_v5, -inf }
0x164b   :  { %3885 = vmax.xlane.f32.xlu0 %v3884_v6  ;;  %v6024_v6 = vld [vmem:[%s8090_s11 + $0xa] ss:$0 sm:$0xff] }
0x164d   :  { %v3880_v55 = vpop.f32.mrb[44].mxu1 }
0x164e   :  { %v6653_v1 = vpop.f32.mrb[45].mxu1  ;;  %v3887_v8 = vsel %vm390_vm2, %v3880_v55, -inf }
0x164f   :  { %3888 = vmax.xlane.f32.xlu1 %v3887_v8 }
0x16d8   :  { %v3886_v9 = vpop.xlane.xlu0 %3885 }
0x16d9   :  { %v3890_v0 = vsub.f32 %v3804_v5, %v3886_v9 }
0x16db   :  { %v3892_v10 = vmul.f32 1.442695, %v3890_v0 }
0x16dc   :  { %v3889_v11 = vpop.xlane.xlu1 %3888 }
0x16dd   :  { %7098 = vpow2.f32 %v3892_v10  ;;  %v3891_v12 = vsub.f32 %v3880_v55, %v3889_v11 }
0x16df   :  { %v3894_v13 = vmul.f32 1.442695, %v3891_v12 }
0x16e1   :  { %7100 = vpow2.f32 %v3894_v13 }
0x16e7   :  { %v7099_v14 = vpop.eup %7098 }
0x16e8   :  { %v3896_v41 = vsel %vm390_vm2, %v7099_v14, 0.0 }
0x16e9   :  { %3897 = vadd.xlane.f32.xlu0 %v3896_v41 }
0x16eb   :  { %v7101_v15 = vpop.eup %7100 }
0x16ec   :  { %v3899_v46 = vsel %vm390_vm2, %v7101_v15, 0.0 }
0x16ed   :  { %3900 = vadd.xlane.f32.xlu1 %v3899_v46 }
0x1776   :  { %v3898_v26 = vpop.xlane.xlu0 %3897 }
0x1777   :  { %7102 = vrcp.f32 %v3898_v26 }
0x177a   :  { %v3901_v27 = vpop.xlane.xlu1 %3900 }
0x177b   :  { %7104 = vrcp.f32 %v3901_v27 }
0x1781   :  { %v7103_v28 = vpop.eup %7102 }
0x1782   :  { %v3904_v29 = vmul.f32 %v7103_v28, %v7099_v14 }
0x1784   :  { %6657 = vmatmul.mubr.msk.f32.vlgmr.msra.gmra.mrb[36].mxu0 %vm390_vm2, %v3904_v29  ;;  %v6036_v29 = vld [vmem:[%s8086_s10 + $0x60] sm:$0xff] }
0x1785   :  { %v7105_v32 = vpop.eup %7104  ;;  %6665 = vmatpush3.msra.mxu0 %v5998_v35  ;;  %v6988_v31 = vpack.c.bf16 %v6037_v30, %v6036_v29  ;;  %v6038_v35 = vld [vmem:[%s8086_s10 + $0x70] sm:$0xff] }
0x1786   :  { %v3905_v33 = vmul.f32 %v7105_v32, %v7101_v15  ;;  %6669 = vmatprep.subr.mxu0 %v3465_v36  ;;  %v6033_v32 = vld [vmem:[%s8091_s12 + $0x10] sm:$0xff] }
0x1788   :  { %6662 = vmatmul.mubr.msk.f32.vlgmr.msra.gmra.mrb[46].mxu1 %vm390_vm2, %v3905_v33 }
0x1789   :  { %6967 = vmatpush3.bf16.msra.mxu1 %v6964_v25  ;;  %6682 = vmatprep.mubr.msk.f32.mxu1 %vm71_vm0, %v7699_v42 }
0x178a   :  { %6969 = vmatprep.subr.bf16.mxu1 %v6968_v34 }
0x178d   :  { %6971 = vmatpush3.bf16.msra.mxu1 %v6968_v34 }
0x178e   :  { %6981 = vmatprep.subr.bf16.mxu1 %v6980_v44 }
0x1790   :  { %6683 = vmatmul.mubr.msk.f32.vlgmr.msra.gmra.mrb[48].mxu1 %vm71_vm0, %v7701_v43 }
0x1791   :  { %6704 = vmatprep.mubr.msk.f32.mxu1 %vm71_vm0, %v7667_v21  ;;  %6983 = vmatpush3.bf16.msra.mxu1 %v6980_v44 }
0x1792   :  { %6985 = vmatprep.subr.bf16.mxu1 %v6984_v47 }
0x1795   :  { %6987 = vmatpush3.bf16.msra.mxu1 %v6984_v47  ;;  %v6044_v47 = vld [vmem:[%s8086_s10 + $0xe0] sm:$0xff] }
0x1796   :  { %6712 = vmatprep.subr.mxu1 %v7126_v48 }
0x1798   :  { %6705 = vmatmul.mubr.msk.f32.vlgmr.msra.gmra.mrb[50].mxu1 %vm71_vm0, %v7674_v22 }
0x1799   :  { %6714 = vmatprep.mubr.msk.f32.mxu1 %vm7127_vm1, %v7126_v48 }
0x1857   :  { %v3975_v49 = vpop.f32.mrb[36].mxu0 }
0x1858   :  { %v6658_v52 = vpop.f32.mrb[37].mxu0  ;;  %6666 = vmatprep.mubr.msk.f32.mxu0 %vm390_vm2, %v3975_v49  ;;  %v6045_v49 = vld [vmem:[%s8086_s10 + $0xe8] sm:$0xff] }
0x1859   :  { %v6996_v50 = vpack.c.bf16 %v6045_v49, %v6044_v47 }
0x185b   :  { %v4048_v56 = vpop.f32.mrb[46].mxu1 }
0x185c   :  { %v6663_v57 = vpop.f32.mrb[47].mxu1  ;;  %6667 = vmatmul.mubr.msk.f32.vlgmr.msra.gmra.mrb[38].mxu0 %vm390_vm2, %v4048_v56 }
0x185d   :  { %6670 = vmatpush3.msra.mxu0 %v3465_v36  ;;  %6671 = vmatprep.mubr.msk.f32.mxu0 %vm390_vm2, %v7778_v38  ;;  %v6039_v36 = vld [vmem:[%s8086_s10 + $0x78] sm:$0xff] }
0x185e   :  { %6973 = vmatprep.subr.bf16.mxu0 %v6972_v54  ;;  %v6992_v44 = vpack.c.bf16 %v6039_v36, %v6038_v35  ;;  %v6066_v35 = vld [vmem:[%s8091_s12 + $0x18] sm:$0xff] }
0x1863   :  { %v6684_v61 = vpop.f32.mrb[48].mxu1 }
0x1864   :  { %v4295_v2 = vpop.f32.mrb[49].mxu1  ;;  %6672 = vmatmul.mubr.msk.f32.vlgmr.msra.gmra.mrb[38].mxu0 %vm390_vm2, %v7776_v37  ;;  %v6008_v37 = vld [vmem:[%s8090_s11 + $0x2] ss:$0 sm:$0xff] }
0x1865   :  { %6975 = vmatpush3.bf16.msra.mxu0 %v6972_v54  ;;  %6693 = vmatprep.mubr.msk.f32.mxu0 %vm71_vm0, %v7667_v21  ;;  %v4301_v5 = vadd.f32 %v6684_v61, %v6008_v37  ;;  %v4296_v55 = vadd.f32 %v6008_v37, %v4295_v2 }
0x1866   :  { %6977 = vmatprep.subr.bf16.mxu0 %v6976_v60 }
0x1867   :  { %v4481_v10 = vmul.f32 0.17677669, %v4301_v5  ;;  %v4480_v12 = vmul.f32 0.17677669, %v4296_v55  ;;  %v6053_v55 = vld [vmem:[%s8086_s10 + $0x168] sm:$0xff] }
0x1869   :  { %6979 = vmatpush3.bf16.msra.mxu0 %v6976_v60  ;;  %v6041_v60 = vld [vmem:[%s8090_s11 + $0x3] ss:$0 sm:$0xff] }
0x186a   :  { %6707 = vmatprep.subr.mxu0 %v7126_v48 }
0x186b   :  { %v6706_v38 = vpop.f32.mrb[50].mxu1 }
0x186c   :  { %6694 = vmatmul.mubr.msk.f32.vlgmr.msra.gmra.mrb[40].mxu0 %vm71_vm0, %v7674_v22  ;;  %v4471_v3 = vpop.f32.mrb[51].mxu1  ;;  %v4477_v0 = vadd.f32 %v6706_v38, %v6024_v6 }
0x186d   :  { %6709 = vmatprep.mubr.msk.f32.mxu0 %vm7127_vm1, %v7126_v48  ;;  %v4472_v11 = vadd.f32 %v6024_v6, %v4471_v3  ;;  %v6052_v6 = vld [vmem:[%s8086_s10 + $0x160] sm:$0xff] }
0x193f   :  { %v6695_v53 = vpop.f32.mrb[40].mxu0 }
0x1940   :  { %v4389_v1 = vadd.f32 %v6695_v53, %v6016_v4  ;;  %v4383_v8 = vpop.f32.mrb[41].mxu0 }
0x1941   :  { %v4384_v9 = vadd.f32 %v6016_v4, %v4383_v8  ;;  %v7004_v8 = vpack.c.bf16 %v6053_v55, %v6052_v6  ;;  %v5619_v6 = vld [vmem:[%s8094_s18 + $0x8] sm:$0xff]  ;;  %v5620_v55 = vld [vmem:[%s8094_s18 + $0x10] sm:$0xff] }
0x1942   :  { %6713 = vmatpush3.xpose.msk.msra.mxu1 %vm390_vm2, %v4389_v1  ;;  %v6054_v1 = vld [vmem:[%s8086_s10 + $0x170] sm:$0xff] }
0x1943   :  { %6708 = vmatpush3.xpose.msk.msra.mxu0 %vm390_vm2, %v4384_v9  ;;  %6722 = vmatprep.subr.mxu1 %v7126_v48  ;;  %v6055_v9 = vld [vmem:[%s8086_s10 + $0x178] sm:$0xff] }
0x1944   :  { %6717 = vmatprep.subr.mxu0 %v7126_v48 }
0x1945   :  { %6715 = vmatmul.mubr.msk.f32.vlgmr.msra.gmra.mrb[52].mxu1 %vm390_vm2, %v4481_v10 }
0x1946   :  { %6710 = vmatmul.mubr.msk.f32.vlgmr.msra.gmra.mrb[42].mxu0 %vm390_vm2, %v4480_v12  ;;  %6723 = vmatpush3.msra.mxu1 %v4477_v0  ;;  %v7008_v0 = vpack.c.bf16 %v6055_v9, %v6054_v1 }
0x1947   :  { %6718 = vmatpush3.msra.mxu0 %v4472_v11  ;;  %6724 = vmatprep.mubr.msk.f32.mxu1 %vm7127_vm1, %v7126_v48 }
0x1948   :  { %6719 = vmatprep.mubr.msk.f32.mxu0 %vm7127_vm1, %v7126_v48  ;;  %6989 = vmatprep.subr.bf16.mxu1 %v6988_v31 }
0x1949   :  { %6727 = vmatprep.subr.mxu0 %v6033_v32 }
0x1a18   :  { %v4630_v13 = vpop.f32.mrb[52].mxu1 }
0x1a19   :  { %v4554_v14 = vpop.f32.mrb[42].mxu0  ;;  %v6716_v41 = vpop.f32.mrb[53].mxu1  ;;  %v4637_v15 = vsel %vm390_vm2, %v4630_v13, -inf }
0x1a1a   :  { %4638 = vmax.xlane.f32.xlu1 %v4637_v15  ;;  %v6711_v46 = vpop.f32.mrb[43].mxu0  ;;  %v4634_v16 = vsel %vm390_vm2, %v4554_v14, -inf }
0x1a1b   :  { %4635 = vmax.xlane.f32.xlu0 %v4634_v16 }
0x1aa7   :  { %v4639_v17 = vpop.xlane.xlu1 %4638 }
0x1aa8   :  { %v4641_v18 = vsub.f32 %v4630_v13, %v4639_v17  ;;  %v4636_v19 = vpop.xlane.xlu0 %4635 }
0x1aa9   :  { %v4640_v20 = vsub.f32 %v4554_v14, %v4636_v19 }
0x1aaa   :  { %v4644_v23 = vmul.f32 1.442695, %v4641_v18 }
0x1aab   :  { %v4642_v24 = vmul.f32 1.442695, %v4640_v20 }
0x1aac   :  { %7106 = vpow2.f32 %v4644_v23 }
0x1aad   :  { %7108 = vpow2.f32 %v4642_v24 }
0x1ab6   :  { %v7107_v25 = vpop.eup %7106 }
0x1ab7   :  { %v7109_v26 = vpop.eup %7108  ;;  %v4649_v27 = vsel %vm390_vm2, %v7107_v25, 0.0 }
0x1ab8   :  { %4650 = vadd.xlane.f32.xlu1 %v4649_v27  ;;  %v4646_v28 = vsel %vm390_vm2, %v7109_v26, 0.0 }
0x1ab9   :  { %4647 = vadd.xlane.f32.xlu0 %v4646_v28 }
0x1b45   :  { %v4651_v33 = vpop.xlane.xlu1 %4650 }
0x1b46   :  { %7110 = vrcp.f32 %v4651_v33  ;;  %v4648_v34 = vpop.xlane.xlu0 %4647 }
0x1b47   :  { %7112 = vrcp.f32 %v4648_v34 }
0x1b50   :  { %v7111_v39 = vpop.eup %7110 }
0x1b51   :  { %v7113_v40 = vpop.eup %7112  ;;  %v4655_v7 = vmul.f32 %v7111_v39, %v7107_v25  ;;  %v6057_v25 = vld [vmem:[%s8090_s11 + $0xb] ss:$0 sm:$0xff] }
0x1b52   :  { %v4654_v45 = vmul.f32 %v7113_v40, %v7109_v26 }
0x1b53   :  { %6725 = vmatmul.mubr.msk.f32.vlgmr.msra.gmra.mrb[54].mxu1 %vm390_vm2, %v4655_v7 }
0x1b54   :  { %6991 = vmatpush3.bf16.msra.mxu1 %v6988_v31  ;;  %6720 = vmatmul.mubr.msk.f32.vlgmr.msra.gmra.mrb[44].mxu0 %vm390_vm2, %v4654_v45 }
0x1b55   :  { %6740 = vmatprep.mubr.msk.f32.mxu1 %vm71_vm0, %v7699_v42  ;;  %6993 = vmatprep.subr.bf16.mxu1 %v6992_v44  ;;  %v6046_v42 = vld [vmem:[%s8086_s10 + $0xf0] sm:$0xff] }
0x1b56   :  { %6728 = vmatpush3.msra.mxu0 %v6033_v32 }
0x1b57   :  { %6997 = vmatprep.subr.bf16.mxu0 %v6996_v50 }
0x1b58   :  { %6995 = vmatpush3.bf16.msra.mxu1 %v6992_v44  ;;  %v6069_v44 = vld [vmem:[%s8092_s13] ss:$0 sm:$0xff] }
0x1b59   :  { %7005 = vmatprep.subr.bf16.mxu1 %v7004_v8 }
0x1b5b   :  { %6741 = vmatmul.mubr.msk.f32.vlgmr.msra.gmra.mrb[56].mxu1 %vm71_vm0, %v7701_v43  ;;  %v6047_v43 = vld [vmem:[%s8086_s10 + $0xf8] sm:$0xff] }
0x1b5c   :  { %6762 = vmatprep.mubr.msk.f32.mxu1 %vm71_vm0, %v7667_v21  ;;  %v7000_v56 = vpack.c.bf16 %v6047_v43, %v6046_v42  ;;  %7007 = vmatpush3.bf16.msra.mxu1 %v7004_v8  ;;  %v5621_v8 = vld [vmem:[%s8094_s18 + $0x18] sm:$0xff] }
0x1b5d   :  { %7009 = vmatprep.subr.bf16.mxu1 %v7008_v0  ;;  %v7024_v9 = vpack.c.bf16 %v5621_v8, %v5620_v55 }
0x1b60   :  { %7011 = vmatpush3.bf16.msra.mxu1 %v7008_v0  ;;  %v5622_v0 = vld [vmem:[%s8094_s18 + $0x20] sm:$0xff] }
0x1b61   :  { %6775 = vmatprep.subr.mxu1 %v7126_v48 }
0x1b63   :  { %6763 = vmatmul.mubr.msk.f32.vlgmr.msra.gmra.mrb[58].mxu1 %vm71_vm0, %v7674_v22 }
0x1b64   :  { %6777 = vmatprep.mubr.msk.f32.mxu1 %vm7127_vm1, %v7126_v48 }
0x1c26   :  { %v4798_v51 = vpop.f32.mrb[54].mxu1 }
0x1c27   :  { %v4725_v52 = vpop.f32.mrb[44].mxu0  ;;  %v6726_v54 = vpop.f32.mrb[55].mxu1 }
0x1c28   :  { %v6721_v57 = vpop.f32.mrb[45].mxu0  ;;  %6729 = vmatprep.mubr.msk.f32.mxu0 %vm390_vm2, %v4725_v52 }
0x1c29   :  { %6730 = vmatmul.mubr.msk.f32.vlgmr.msra.gmra.mrb[38].mxu0 %vm390_vm2, %v4798_v51 }
0x1c2a   :  { %6999 = vmatpush3.bf16.msra.mxu0 %v6996_v50  ;;  %6751 = vmatprep.mubr.msk.f32.mxu0 %vm71_vm0, %v7667_v21  ;;  %v6049_v21 = vld [vmem:[%s8090_s11 + $0x7] ss:$0 sm:$0xff] }
0x1c2b   :  { %7001 = vmatprep.subr.bf16.mxu0 %v7000_v56 }
0x1c2e   :  { %v6742_v58 = vpop.f32.mrb[56].mxu1  ;;  %7003 = vmatpush3.bf16.msra.mxu0 %v7000_v56 }
0x1c2f   :  { %v4966_v59 = vpop.f32.mrb[57].mxu1  ;;  %6765 = vmatprep.subr.mxu0 %v7126_v48  ;;  %v4972_v37 = vadd.f32 %v6742_v58, %v6041_v60 }
0x1c30   :  { %v4967_v2 = vadd.f32 %v6041_v60, %v4966_v59 }
0x1c31   :  { %6752 = vmatmul.mubr.msk.f32.vlgmr.msra.gmra.mrb[46].mxu0 %vm71_vm0, %v7674_v22  ;;  %v5152_v53 = vmul.f32 0.17677669, %v4972_v37  ;;  %v5615_v37 = vld [vmem:[%s8093_s16 + $0x10] sm:$0xff] }
0x1c32   :  { %6767 = vmatprep.mubr.msk.f32.mxu0 %vm7127_vm1, %v7126_v48  ;;  %v5151_v4 = vmul.f32 0.17677669, %v4967_v2  ;;  %v5613_v2 = vld [vmem:[%s8093_s16] sm:$0xff] }
0x1c36   :  { %v6764_v24 = vpop.f32.mrb[58].mxu1 }
0x1c37   :  { %v5142_v26 = vpop.f32.mrb[59].mxu1  ;;  %v5148_v28 = vadd.f32 %v6764_v24, %v6057_v25 }
0x1c38   :  { %v5143_v27 = vadd.f32 %v6057_v25, %v5142_v26  ;;  %v5624_v26 = vld [vmem:[%s8094_s18 + $0x30] sm:$0xff] }
0x1c3a   :  { %6776 = vmatpush3.msra.mxu1 %v5143_v27  ;;  %v5625_v27 = vld [vmem:[%s8094_s18 + $0x38] sm:$0xff] }
0x1d04   :  { %v6753_v61 = vpop.f32.mrb[46].mxu0 }
0x1d05   :  { %v5054_v38 = vpop.f32.mrb[47].mxu0  ;;  %v5060_v5 = vadd.f32 %v6753_v61, %v6049_v21 }
0x1d06   :  { %v5055_v3 = vadd.f32 %v6049_v21, %v5054_v38  ;;  %v5614_v38 = vld [vmem:[%s8093_s16 + $0x8] sm:$0xff] }
0x1d08   :  { %6766 = vmatpush3.xpose.msk.msra.mxu0 %vm390_vm2, %v5055_v3  ;;  %v7012_v3 = vpack.c.bf16 %v5614_v38, %v5613_v2 }
0x1d09   :  { %6770 = vmatprep.subr.mxu0 %v7126_v48 }
0x1d0a   :  { %7013 = vmatprep.subr.bf16.mxu1 %v7012_v3 }
0x1d0b   :  { %6768 = vmatmul.mubr.msk.f32.vlgmr.msra.gmra.mrb[48].mxu0 %vm390_vm2, %v5151_v4  ;;  %v5616_v4 = vld [vmem:[%s8093_s16 + $0x18] sm:$0xff] }
0x1d0c   :  { %6771 = vmatpush3.xpose.msk.msra.mxu0 %vm390_vm2, %v5060_v5  ;;  %6772 = vmatprep.mubr.msk.f32.mxu0 %vm7127_vm1, %v7126_v48  ;;  %v7016_v5 = vpack.c.bf16 %v5616_v4, %v5615_v37 }
0x1d0d   :  { %6780 = vmatprep.subr.mxu0 %v7126_v48 }
0x1d0f   :  { %6773 = vmatmul.mubr.msk.f32.vlgmr.msra.gmra.mrb[50].mxu0 %vm390_vm2, %v5152_v53  ;;  %v5618_v53 = vld [vmem:[%s8094_s18] sm:$0xff] }
0x1d10   :  { %6782 = vmatprep.mubr.msk.f32.mxu0 %vm7127_vm1, %v7126_v48  ;;  %6781 = vmatpush3.msra.mxu0 %v5148_v28  ;;  %v7020_v1 = vpack.c.bf16 %v5619_v6, %v5618_v53  ;;  %v7032_v28 = vpack.c.bf16 %v5625_v27, %v5624_v26 }
0x1d11   :  { %6785 = vmatprep.subr.mxu0 %v6066_v35 }
0x1dde   :  { %v5225_v10 = vpop.f32.mrb[48].mxu0 }
0x1ddf   :  { %v6769_v11 = vpop.f32.mrb[49].mxu0  ;;  %v5305_v12 = vsel %vm390_vm2, %v5225_v10, -inf }
0x1de0   :  { %5306 = vmax.xlane.f32.xlu0 %v5305_v12 }
0x1de2   :  { %v5301_v13 = vpop.f32.mrb[50].mxu0 }
0x1de3   :  { %v6774_v14 = vpop.f32.mrb[51].mxu0  ;;  %v5308_v41 = vsel %vm390_vm2, %v5301_v13, -inf }
0x1de4   :  { %5309 = vmax.xlane.f32.xlu1 %v5308_v41 }
0x1e6d   :  { %v5307_v15 = vpop.xlane.xlu0 %5306 }
0x1e6e   :  { %v5311_v46 = vsub.f32 %v5225_v10, %v5307_v15  ;;  %v5623_v10 = vld [vmem:[%s8094_s18 + $0x28] sm:$0xff] }
0x1e6f   :  { %v7028_v11 = vpack.c.bf16 %v5623_v10, %v5622_v0 }
0x1e70   :  { %v5313_v16 = vmul.f32 1.442695, %v5311_v46 }
0x1e71   :  { %v5310_v17 = vpop.xlane.xlu1 %5309 }
0x1e72   :  { %7114 = vpow2.f32 %v5313_v16  ;;  %v5312_v18 = vsub.f32 %v5301_v13, %v5310_v17  ;;  %v6070_v17 = vld [vmem:[%s8095_s14] ss:$0 sm:$0xff] }
0x1e74   :  { %v5315_v22 = vmul.f32 1.442695, %v5312_v18 }
0x1e76   :  { %7116 = vpow2.f32 %v5315_v22 }
0x1e7c   :  { %v7115_v19 = vpop.eup %7114 }
0x1e7d   :  { %v5317_v48 = vsel %vm390_vm2, %v7115_v19, 0.0 }
0x1e7e   :  { %5318 = vadd.xlane.f32.xlu0 %v5317_v48  ;;  %v6071_v48 = vld [vmem:[%s8096_s15] ss:$0 sm:$0xff] }
0x1e80   :  { %v7117_v20 = vpop.eup %7116 }
0x1e81   :  { %v5320_v23 = vsel %vm390_vm2, %v7117_v20, 0.0 }
0x1e82   :  { %5321 = vadd.xlane.f32.xlu1 %v5320_v23 }
0x1f0b   :  { %v5319_v29 = vpop.xlane.xlu0 %5318 }
0x1f0c   :  { %7118 = vrcp.f32 %v5319_v29  ;;  %v6072_v29 = vld [vmem:[%s8097_s17] ss:$0 sm:$0xff] }
0x1f0f   :  { %v5322_v30 = vpop.xlane.xlu1 %5321 }
0x1f10   :  { %7120 = vrcp.f32 %v5322_v30 }
0x1f16   :  { %v7119_v31 = vpop.eup %7118 }
0x1f17   :  { %v5325_v32 = vmul.f32 %v7119_v31, %v7115_v19 }
0x1f19   :  { %6778 = vmatmul.mubr.msk.f32.vlgmr.msra.gmra.mrb[60].mxu1 %vm390_vm2, %v5325_v32 }
0x1f1a   :  { %v7121_v33 = vpop.eup %7120  ;;  %7015 = vmatpush3.bf16.msra.mxu1 %v7012_v3 }
0x1f1b   :  { %v5326_v34 = vmul.f32 %v7121_v33, %v7117_v20  ;;  %7017 = vmatprep.subr.bf16.mxu1 %v7016_v5 }
0x1f1d   :  { %6783 = vmatmul.mubr.msk.f32.vlgmr.msra.gmra.mrb[52].mxu0 %vm390_vm2, %v5326_v34 }
0x1f1e   :  { %6786 = vmatpush3.msra.mxu0 %v6066_v35  ;;  %7019 = vmatpush3.bf16.msra.mxu1 %v7016_v5 }
0x1f1f   :  { %7021 = vmatprep.subr.bf16.mxu0 %v7020_v1 }
0x1fec   :  { %v5396_v36 = vpop.f32.mrb[60].mxu1 }
0x1fed   :  { %v6779_v39 = vpop.f32.mrb[61].mxu1  ;;  %6787 = vmatprep.mubr.msk.f32.mxu0 %vm390_vm2, %v5396_v36  ;;  %v6075_v36 = vld [vmem:[%s8098_s19] ss:$0 sm:$0xff] }
0x1ff0   :  { %v5469_v40 = vpop.f32.mrb[52].mxu0 }
0x1ff1   :  { %v6784_v7 = vpop.f32.mrb[53].mxu0  ;;  %6788 = vmatmul.mubr.msk.f32.vlgmr.msra.gmra.mrb[38].mxu0 %vm390_vm2, %v5469_v40 }
0x1ff2   :  { %7023 = vmatpush3.bf16.msra.mxu0 %v7020_v1 }
0x1ff3   :  { %7025 = vmatprep.subr.bf16.mxu0 %v7024_v9 }
0x1ff6   :  { %7027 = vmatpush3.bf16.msra.mxu0 %v7024_v9 }
0x1ff7   :  { %7029 = vmatprep.subr.bf16.mxu0 %v7028_v11 }
0x1ffa   :  { %7031 = vmatpush3.bf16.msra.mxu0 %v7028_v11 }
0x1ffb   :  { %7033 = vmatprep.subr.bf16.mxu0 %v7032_v28 }
0x1ffe   :  { %7035 = vmatpush3.bf16.msra.mxu0 %v7032_v28 }
0x20c4   :  { %v6789_v45 = vpop.f32.mrb[38].mxu0 }
0x20c5   :  { %v5566_v47 = vadd.f32 %v6789_v45, %v6069_v44  ;;  %v5547_v49 = vpop.f32.mrb[39].mxu0 }
0x20c6   :  { %v5565_v50 = vadd.f32 %v6069_v44, %v5547_v49 }
0x20c7   :  { %v8006_v42 = vadd.f32 %v5566_v47, %v7627_v62 }
0x20c8   :  { %v8009_v43 = vadd.f32 %v5565_v50, %v7630_v63 }
0x20c9   :  { %v5574_v51 = vsel %vm71_vm0, %v8006_v42, 0.0 }
0x20ca   :  { %5575 = vadd.xlane.f32.xlu1 %v5574_v51  ;;  %v5571_v52 = vsel %vm71_vm0, %v8009_v43, 0.0 }
0x20cb   :  { %5572 = vadd.xlane.f32.xlu0 %v5571_v52 }
0x2157   :  { %v5576_v54 = vpop.xlane.xlu1 %5575 }
0x2158   :  { %v5578_v56 = vmul.f32 0.03125, %v5576_v54  ;;  %v5573_v57 = vpop.xlane.xlu0 %5572 }
0x2159   :  { %v5577_v58 = vmul.f32 0.03125, %v5573_v57 }
0x215a   :  { %v5580_v59 = vsub.f32 %v8006_v42, %v5578_v56 }
0x215b   :  { %v5579_v62 = vsub.f32 %v8009_v43, %v5577_v58 }
0x215c   :  { %v5582_v60 = vmul.f32 %v5580_v59, %v5580_v59 }
0x215d   :  { %v5581_v21 = vmul.f32 %v5579_v62, %v5579_v62 }
0x215e   :  { %v5586_v63 = vsel %vm71_vm0, %v5582_v60, 0.0 }
0x215f   :  { %5587 = vadd.xlane.f32.xlu1 %v5586_v63  ;;  %v5583_v61 = vsel %vm71_vm0, %v5581_v21, 0.0 }
0x2160   :  { %5584 = vadd.xlane.f32.xlu0 %v5583_v61 }
0x21ec   :  { %v5588_v12 = vpop.xlane.xlu1 %5587 }
0x21ed   :  { %v5590_v13 = vmul.f32 0.03125, %v5588_v12  ;;  %v5585_v14 = vpop.xlane.xlu0 %5584 }
0x21ee   :  { %v5589_v41 = vmul.f32 0.03125, %v5585_v14 }
0x21ef   :  { %v5592_v15 = vadd.f32 1e-05, %v5590_v13 }
0x21f0   :  { %v5591_v46 = vadd.f32 1e-05, %v5589_v41 }
0x21f1   :  { %7122 = vrsqrt.f32 %v5592_v15 }
0x21f2   :  { %7124 = vrsqrt.f32 %v5591_v46 }
0x21fb   :  { %v7123_v16 = vpop.eup %7122 }
0x21fc   :  { %v7125_v18 = vpop.eup %7124  ;;  %v5596_v22 = vmul.f32 %v7123_v16, %v5580_v59 }
0x21fd   :  { %v5595_v19 = vmul.f32 %v7125_v18, %v5579_v62 }
0x21fe   :  { %v5604_v20 = vmul.f32 %v6070_v17, %v5596_v22 }
0x21ff   :  { %v5603_v23 = vmul.f32 %v6070_v17, %v5595_v19 }
0x2200   :  { %v5612_v25 = vadd.f32 %v6071_v48, %v5604_v20 }
0x2201   :  { %v5611_v24 = vadd.f32 %v6071_v48, %v5603_v23 }
0x2203   :  { %6798 = vmatprep.mubr.msk.f32.mxu1 %vm71_vm0, %v5611_v24 }
0x2204   :  { %6799 = vmatmul.mubr.msk.f32.vlgmr.msra.gmra.mrb[62].mxu1 %vm71_vm0, %v5612_v25 }
0x22d7   :  { %v6800_v30 = vpop.f32.mrb[62].mxu1 }
0x22d8   :  { %v5711_v31 = vadd.f32 %v6800_v30, %v6072_v29  ;;  %v5705_v32 = vpop.f32.mrb[63].mxu1 }
0x22d9   :  { %v5706_v33 = vadd.f32 %v6072_v29, %v5705_v32 }
0x22da   :  { %v5715_v35 = vmax.f32 %v5711_v31, 0.0 }
0x22db   :  { %v5714_v34 = vmax.f32 %v5706_v33, 0.0 }
0x22dd   :  { %6817 = vmatprep.mubr.msk.f32.mxu0 %vm5722_vm4, %v5714_v34 }
0x22de   :  { %6818 = vmatmul.mubr.msk.f32.vlgmr.msra.gmra.mrb[54].mxu0 %vm5722_vm4, %v5715_v35 }
0x23b1   :  { %v6819_v39 = vpop.f32.mrb[54].mxu0 }
0x23b2   :  { %v5801_v40 = vadd.f32 %v6819_v39, %v6075_v36  ;;  %v5795_v7 = vpop.f32.mrb[55].mxu0 }
0x23b3   :  { %v5796_v44 = vadd.f32 %v6075_v36, %v5795_v7 }
0x23b4   :  { %v5805_v45 = vadd.f32 %v5801_v40, %v8006_v42 }
0x23b5   :  { %v5804_v47 = vadd.f32 %v5796_v44, %v8009_v43 }
0x23b6   :  { %5807 = vst.msk [vmem:[%s8099_s20 + $0x8] sm:$0xff] %vm71_vm0, %v5805_v45 }
0x23b7   :  { %5806 = vst.msk [vmem:[%s8099_s20] sm:$0xff] %vm71_vm0, %v5804_v47 }

</bundles_post_ra>
